<compile_context>
chip_gen: v7x
topology: tpu7x:2x2x1
jax: 0.10.0
libtpu: 0.0.40
codegen_flags: <defaults>
</compile_context>

<pallas_src>
import functools

import numpy as np
import jax
import jax.numpy as jnp
from jax.experimental import pallas as pl
from jax.experimental.pallas import tpu as pltpu


def _round_up(v, m):
    return ((v + m - 1) // m) * m


_COMPILER_PARAMS = pltpu.CompilerParams(
    dimension_semantics=("parallel",),        # batch axis -> both TCs on v7x
    # Sized for these small per-image blocks; raise together with row tiling
    # (see TODO below) for production feature-map sizes on v5e/v6e.
    vmem_limit_bytes=32 * 1024 * 1024,
)


# ----------------------------------------------------------------------------
# Kernel 1: backbone conv (stride-2 3x3 lowered to stride-1 2x2 on a
# space-to-depth image) + direct write of the zero-padded res4 layout the RPN
# conv consumes + fused ROI box head on the VMEM-resident feature.
# ----------------------------------------------------------------------------
def _backbone_boxhead_kernel(x_ref, w_ref, b_ref, w5_ref, b5_ref, wpr_ref,
                             bpr_ref, feat_ref, box_ref,
                             *, kh, kw, wp_in, ho, wo, pad_out):
    l_out = ho * wp_in
    # Shift-and-accumulate conv: tap (i, j) of flat output row r reads
    # x[r + i*wp_in + j, :] (bf16 operands, f32 MXU accumulation).
    acc = None
    for i in range(kh):
        for j in range(kw):
            d = i * wp_in + j                                  # static offset
            xs = x_ref[d:d + l_out, :]                         # (l_out, Cin)
            wt = w_ref[i * kw + j, :, :]                       # (Cin, C)
            c = jnp.dot(xs, wt, preferred_element_type=jnp.float32)
            acc = c if acc is None else acc + c
    acc = jnp.maximum(acc + b_ref[...], 0.0)                   # (l_out, C) f32
    c_out = acc.shape[-1]
    valid = acc.reshape(ho, wp_in, c_out)[:, :wo, :]           # drop garbage cols
    valid_bf = valid.astype(feat_ref.dtype)

    # res4 in the zero-padded layout consumed by the RPN conv: zero border +
    # interior block (no crop->re-pad HBM round trip in the wrapper).
    feat_ref[...] = jnp.zeros(feat_ref.shape, feat_ref.dtype)
    feat_ref[pad_out:pad_out + ho, pad_out:pad_out + wo, :] = valid_bf

    # Fused ROI box head on the VMEM-resident res4.  Global average pooling
    # (stand-in for ROIAlign) is a ones-row matmul: rides the MXU and keeps the
    # (1, C) result lane dense.  affine_rcnn is folded into w5/b5 (exact).
    ones = jnp.ones((1, ho * wo), jnp.bfloat16)
    pooled = jnp.dot(ones, valid_bf.reshape(ho * wo, c_out),
                     preferred_element_type=jnp.float32) * (1.0 / (ho * wo))
    h = jnp.dot(pooled.astype(jnp.bfloat16), w5_ref[...],
                preferred_element_type=jnp.float32) + b5_ref[...]
    h = jnp.maximum(h, 0.0)
    box = jnp.dot(h.astype(jnp.bfloat16), wpr_ref[...],
                  preferred_element_type=jnp.float32) + bpr_ref[...]
    box_ref[...] = box.astype(box_ref.dtype)


# ----------------------------------------------------------------------------
# Kernel 2: exact AffineLayer (interior-masked bias) + 3x3 RPN conv + ReLU +
# fused 1x1 objectness / anchor-delta heads (zero-padded to 128 output lanes).
# ----------------------------------------------------------------------------
def _rpn_head_kernel(x_ref, mask_ref, aw_ref, ab_ref, w_ref, b_ref, hw_ref,
                     hb_ref, o_ref, feat_scr, *, kh, kw, wp, ho):
    l_out = ho * wp
    # affine_rpn on the zero-padded res4: scale everywhere, bias only on the
    # interior (mask) so the conv's zero padding stays exactly zero — matches
    # the reference, which zero-pads the *affined* feature map.
    feat = (x_ref[...].astype(jnp.float32) * aw_ref[...]
            + mask_ref[...] * ab_ref[...])
    feat_scr[...] = feat.astype(feat_scr.dtype)

    acc = None
    for i in range(kh):
        for j in range(kw):
            d = i * wp + j
            xs = feat_scr[d:d + l_out, :]
            wt = w_ref[i * kw + j, :, :]
            c = jnp.dot(xs, wt, preferred_element_type=jnp.float32)
            acc = c if acc is None else acc + c
    hid = jnp.maximum(acc + b_ref[...], 0.0).astype(jnp.bfloat16)
    out = jnp.dot(hid, hw_ref[...], preferred_element_type=jnp.float32) + hb_ref[...]
    o_ref[...] = out.astype(o_ref.dtype)


# ----------------------------------------------------------------------------
# Pallas wrappers
# ----------------------------------------------------------------------------
def backbone_boxhead_call(xflat, w_taps, bias, w5, b5, w_pred, b_pred, *,
                          kh, kw, wp_in, ho, wo, hp_out, wp_out, pad_out,
                          feat_dtype):
    N, l_in, cin = xflat.shape
    c4 = w_taps.shape[-1]
    d5 = w5.shape[1]
    n_pred = w_pred.shape[1]
    kern = functools.partial(_backbone_boxhead_kernel, kh=kh, kw=kw,
                             wp_in=wp_in, ho=ho, wo=wo, pad_out=pad_out)
    # TODO(synk): for production feature-map sizes, add an output-row tile grid
    # axis with a (kh-1)-row halo and single-buffer the constant weight blocks.
    return pl.pallas_call(
        kern,
        out_shape=(jax.ShapeDtypeStruct((N, hp_out, wp_out, c4), feat_dtype),
                   jax.ShapeDtypeStruct((N, 1, n_pred), jnp.float32)),
        grid=(N,),
        in_specs=[
            pl.BlockSpec((None, l_in, cin), lambda n: (n, 0, 0)),
            pl.BlockSpec((kh * kw, cin, c4), lambda n: (0, 0, 0)),
            pl.BlockSpec((1, c4), lambda n: (0, 0)),
            pl.BlockSpec((c4, d5), lambda n: (0, 0)),
            pl.BlockSpec((1, d5), lambda n: (0, 0)),
            pl.BlockSpec((d5, n_pred), lambda n: (0, 0)),
            pl.BlockSpec((1, n_pred), lambda n: (0, 0)),
        ],
        out_specs=(
            pl.BlockSpec((None, hp_out, wp_out, c4), lambda n: (n, 0, 0, 0)),
            pl.BlockSpec((None, 1, n_pred), lambda n: (n, 0, 0)),
        ),
        compiler_params=_COMPILER_PARAMS,
    )(xflat, w_taps, bias, w5, b5, w_pred, b_pred)


def rpn_head_call(feat_flat, mask, aff_w, aff_b, w_taps, bias, head_w, head_b,
                  *, wp, ho, out_dtype):
    N, l_in, c4 = feat_flat.shape
    n_out = head_w.shape[1]
    l_out = ho * wp
    kern = functools.partial(_rpn_head_kernel, kh=3, kw=3, wp=wp, ho=ho)
    return pl.pallas_call(
        kern,
        out_shape=jax.ShapeDtypeStruct((N, l_out, n_out), out_dtype),
        grid=(N,),
        in_specs=[
            pl.BlockSpec((None, l_in, c4), lambda n: (n, 0, 0)),
            pl.BlockSpec((l_in, 1), lambda n: (0, 0)),
            pl.BlockSpec((1, c4), lambda n: (0, 0)),
            pl.BlockSpec((1, c4), lambda n: (0, 0)),
            pl.BlockSpec((9, c4, c4), lambda n: (0, 0, 0)),
            pl.BlockSpec((1, c4), lambda n: (0, 0)),
            pl.BlockSpec((c4, n_out), lambda n: (0, 0)),
            pl.BlockSpec((1, n_out), lambda n: (0, 0)),
        ],
        out_specs=pl.BlockSpec((None, l_out, n_out), lambda n: (n, 0, 0)),
        scratch_shapes=[pltpu.VMEM((l_in, c4), jnp.bfloat16)],
        compiler_params=_COMPILER_PARAMS,
    )(feat_flat, mask, aff_w, aff_b, w_taps, bias, head_w, head_b)


# ----------------------------------------------------------------------------
# Layout / weight-folding glue (runs once on tiny tensors)
# ----------------------------------------------------------------------------
def _space_to_depth_2x2(x_nhwc):
    N, H, W, C = x_nhwc.shape
    assert H % 2 == 0 and W % 2 == 0
    x = x_nhwc.reshape(N, H // 2, 2, W // 2, 2, C)
    return x.transpose(0, 1, 3, 2, 4, 5).reshape(N, H // 2, W // 2, 4 * C)


def _stride2_weights_to_s2d(w_hwio):
    # A 3x3 stride-2 conv equals a 2x2 stride-1 conv on the space-to-depth
    # input, with the 3x3 kernel zero-padded to 4x4 and regrouped by parity.
    kh, kw, C, F = w_hwio.shape
    assert kh == 3 and kw == 3
    w4 = jnp.pad(w_hwio, ((0, 1), (0, 1), (0, 0), (0, 0)))         # (4,4,C,F)
    w2 = w4.reshape(2, 2, 2, 2, C, F).transpose(0, 2, 1, 3, 4, 5)  # a,b,di,dj,c,f
    return w2.reshape(4, 4 * C, F)                                 # (taps,4C,F)


def decouple_layer(x, scale):
    # GradientDecoupleLayer: forward is identity (scale only affects backward).
    del scale
    return x


# ----------------------------------------------------------------------------
# Parameters & forward
# ----------------------------------------------------------------------------
def init_params(key, c_in=3, c_res4=128, num_anchors=3, box_dim=128,
                num_classes=8):
    ks = jax.random.split(key, 13)
    n = jax.random.normal
    return {
        "pixel_mean": jnp.array([103.530, 116.280, 123.675], jnp.float32)[:c_in],
        "pixel_std": jnp.array([57.375, 57.120, 58.395], jnp.float32)[:c_in],
        # backbone (single "res4"-producing conv, 3x3 stride 2), HWIO layout
        "bb_w": 0.05 * n(ks[0], (3, 3, c_in, c_res4), jnp.float32),
        "bb_b": 0.01 * n(ks[1], (c_res4,), jnp.float32),
        # AffineLayer(num_channels=res4.channels, bias=True) x2 — nonzero scale
        # AND bias so the exact (non-border-corrupting) handling is exercised.
        "aff_rpn_w": 1.0 + 0.1 * n(ks[2], (c_res4,), jnp.float32),
        "aff_rpn_b": 0.1 * n(ks[3], (c_res4,), jnp.float32),
        "aff_rcnn_w": 1.0 + 0.1 * n(ks[4], (c_res4,), jnp.float32),
        "aff_rcnn_b": 0.1 * n(ks[5], (c_res4,), jnp.float32),
        # RPN head
        "rpn_conv_w": 0.05 * n(ks[6], (3, 3, c_res4, c_res4), jnp.float32),
        "rpn_conv_b": 0.01 * n(ks[7], (c_res4,), jnp.float32),
        "rpn_obj_w": 0.05 * n(ks[8], (c_res4, num_anchors), jnp.float32),
        "rpn_obj_b": jnp.zeros((num_anchors,), jnp.float32),
        "rpn_del_w": 0.05 * n(ks[9], (c_res4, 4 * num_anchors), jnp.float32),
        "rpn_del_b": jnp.zeros((4 * num_anchors,), jnp.float32),
        # ROI box head ("res5" projection + predictors)
        "res5_w": 0.05 * n(ks[10], (c_res4, box_dim), jnp.float32),
        "res5_b": jnp.zeros((box_dim,), jnp.float32),
        "cls_w": 0.05 * n(ks[11], (box_dim, num_classes + 1), jnp.float32),
        "cls_b": jnp.zeros((num_classes + 1,), jnp.float32),
        "bbox_w": 0.05 * n(ks[12], (box_dim, 4 * num_classes), jnp.float32),
        "bbox_b": jnp.zeros((4 * num_classes,), jnp.float32),
    }


def generalized_rcnn_forward(params, images_nchw):
    p = params
    x = images_nchw.transpose(0, 2, 3, 1)          # NCHW -> NHWC at I/O boundary
    N, H, W, Cin = x.shape
    C4 = p["bb_w"].shape[-1]
    Ho, Wo = H // 2, W // 2

    # ---- preprocess_image: subtract mean here (exact zero-padding semantics),
    # fold 1/std into the backbone conv weights (exact under zero padding).
    xm = x - p["pixel_mean"]
    # TODO(synk): ImageList.from_tensors size-divisibility padding not modeled.

    # ---- backbone "res4": 3x3 stride-2 conv + ReLU as a stride-1 2x2 conv on
    # a space-to-depth image.
    xpad = jnp.pad(xm, ((0, 0), (1, 1), (1, 1), (0, 0)))
    s2d = _space_to_depth_2x2(xpad)                          # (N, H/2+1, W/2+1, 4Cin)
    # TODO(synk): fold the s2d gather + zero pad into the backbone kernel as
    # strided in-kernel loads instead of XLA ops on the raw image.
    Hs, Ws = s2d.shape[1], s2d.shape[2]
    Wp_in = _round_up(Ws, 8)              # sublane-aligned flat row stride
    Hp_in = Hs + 1                        # one spare row for flat tap offsets
    s2d_p = jnp.pad(s2d, ((0, 0), (0, Hp_in - Hs), (0, Wp_in - Ws), (0, 0)))
    xflat = s2d_p.reshape(N, Hp_in * Wp_in, 4 * Cin).astype(jnp.bfloat16)

    inv_std = 1.0 / p["pixel_std"]
    w_bb = p["bb_w"] * inv_std[None, None, :, None]
    w_bb_s2d = _stride2_weights_to_s2d(w_bb).astype(jnp.bfloat16)   # (4, 4Cin, C4)
    b_bb = p["bb_b"].reshape(1, C4).astype(jnp.float32)

    # ---- ROI box head constants: affine_rcnn folded into res5 (exact, pooling
    # is linear and no padding is involved); [cls | bbox] fused and zero-padded
    # to 128 output lanes for a lane-dense store.
    D = p["res5_w"].shape[1]
    w5 = (p["aff_rcnn_w"][:, None] * p["res5_w"]).astype(jnp.bfloat16)
    b5 = (p["res5_b"] + p["aff_rcnn_b"] @ p["res5_w"]).reshape(1, D).astype(jnp.float32)
    n_cls = p["cls_w"].shape[1]
    n_box = p["bbox_w"].shape[1]
    n_pred = n_cls + n_box
    n_pred_pad = _round_up(n_pred, 128)
    w_pred = jnp.concatenate([p["cls_w"], p["bbox_w"]], axis=1)
    w_pred = jnp.pad(w_pred, ((0, 0), (0, n_pred_pad - n_pred))).astype(jnp.bfloat16)
    b_pred = jnp.concatenate([p["cls_b"], p["bbox_b"]], axis=0)
    b_pred = jnp.pad(b_pred, (0, n_pred_pad - n_pred)).reshape(1, n_pred_pad)
    b_pred = b_pred.astype(jnp.float32)

    # ---- kernel 1: backbone conv + padded-layout res4 write + fused box head
    pad_r = 1
    Wp_out = _round_up(Wo + 2 * pad_r, 8)
    Hp_out = Ho + 2 * pad_r + 1
    feat_pad, box_out = backbone_boxhead_call(
        xflat, w_bb_s2d, b_bb, w5, b5, w_pred, b_pred,
        kh=2, kw=2, wp_in=Wp_in, ho=Ho, wo=Wo,
        hp_out=Hp_out, wp_out=Wp_out, pad_out=pad_r, feat_dtype=jnp.bfloat16)

    # ---- RPN branch: affine_rpn(decouple_layer(res4)) applied exactly inside
    # the kernel, 3x3 conv + ReLU, fused 1x1 objectness / anchor-delta heads.
    feat_rpn_src = decouple_layer(feat_pad, 0.0)             # identity forward
    A = p["rpn_obj_w"].shape[1]
    n_rpn = A + 4 * A
    n_rpn_pad = _round_up(n_rpn, 128)
    head_w = jnp.concatenate([p["rpn_obj_w"], p["rpn_del_w"]], axis=1)
    head_w = jnp.pad(head_w, ((0, 0), (0, n_rpn_pad - n_rpn))).astype(jnp.bfloat16)
    head_b = jnp.concatenate([p["rpn_obj_b"], p["rpn_del_b"]], axis=0)
    head_b = jnp.pad(head_b, (0, n_rpn_pad - n_rpn)).reshape(1, n_rpn_pad)
    head_b = head_b.astype(jnp.float32)

    # interior mask (positions where the affine bias applies; zero on padding)
    mask = jnp.zeros((Hp_out, Wp_out), jnp.float32)
    mask = mask.at[pad_r:pad_r + Ho, pad_r:pad_r + Wo].set(1.0)
    mask = mask.reshape(Hp_out * Wp_out, 1)

    feat_flat = feat_rpn_src.reshape(N, Hp_out * Wp_out, C4)   # free reshape
    w_rpn = p["rpn_conv_w"].reshape(9, C4, C4).astype(jnp.bfloat16)
    b_rpn = p["rpn_conv_b"].reshape(1, C4).astype(jnp.float32)
    aw = p["aff_rpn_w"].reshape(1, C4).astype(jnp.float32)
    ab = p["aff_rpn_b"].reshape(1, C4).astype(jnp.float32)

    rpn_out = rpn_head_call(feat_flat, mask, aw, ab, w_rpn, b_rpn, head_w,
                            head_b, wp=Wp_out, ho=Ho, out_dtype=jnp.bfloat16)
    rpn_out = rpn_out.reshape(N, Ho, Wp_out, n_rpn_pad)[:, :, :Wo, :n_rpn]
    objectness = rpn_out[..., :A]
    anchor_deltas = rpn_out[..., A:]
    # TODO(synk): proposal selection (anchor decode, top-k, NMS) not implemented.

    # ---- ROI heads outputs (computed in kernel 1)
    _ = decouple_layer(feat_pad, 0.0)
    # TODO(synk): ROIAlign over RPN proposals not implemented; a global-average
    # pooled per-image feature stands in for the box-head input.
    box_out = box_out.reshape(N, n_pred_pad)[:, :n_pred]
    cls_scores = box_out[:, :n_cls]
    bbox_deltas = box_out[:, n_cls:]
    # TODO(synk): detector_postprocess (box decode, per-class NMS, rescale) and
    # training-mode losses are not modeled.

    res4 = feat_pad[:, pad_r:pad_r + Ho, pad_r:pad_r + Wo, :]
    return {
        "res4": res4.transpose(0, 3, 1, 2),                      # NCHW at I/O
        "rpn_objectness_logits": objectness.transpose(0, 3, 1, 2),
        "rpn_anchor_deltas": anchor_deltas.transpose(0, 3, 1, 2),
        "roi_cls_scores": cls_scores,
        "roi_bbox_deltas": bbox_deltas,
    }


# ----------------------------------------------------------------------------
# Pure-JAX (XLA, f32) reference for numerical validation
# ----------------------------------------------------------------------------
def reference_forward(params, images_nchw):
    p = params
    x = images_nchw.transpose(0, 2, 3, 1).astype(jnp.float32)
    x = (x - p["pixel_mean"]) / p["pixel_std"]

    def conv(inp, w, b, stride, pad):
        y = jax.lax.conv_general_dilated(
            inp, w, (stride, stride), [(pad, pad), (pad, pad)],
            dimension_numbers=("NHWC", "HWIO", "NHWC"))
        return y + b

    res4 = jax.nn.relu(conv(x, p["bb_w"], p["bb_b"], 2, 1))
    feat_rpn = res4 * p["aff_rpn_w"] + p["aff_rpn_b"]
    hid = jax.nn.relu(conv(feat_rpn, p["rpn_conv_w"], p["rpn_conv_b"], 1, 1))
    obj = jnp.einsum("nhwc,cf->nhwf", hid, p["rpn_obj_w"]) + p["rpn_obj_b"]
    dlt = jnp.einsum("nhwc,cf->nhwf", hid, p["rpn_del_w"]) + p["rpn_del_b"]
    feat_rcnn = res4 * p["aff_rcnn_w"] + p["aff_rcnn_b"]
    pooled = feat_rcnn.mean(axis=(1, 2))
    bf = jax.nn.relu(pooled @ p["res5_w"] + p["res5_b"])
    cls = bf @ p["cls_w"] + p["cls_b"]
    bbox = bf @ p["bbox_w"] + p["bbox_b"]
    return {
        "res4": res4.transpose(0, 3, 1, 2),
        "rpn_objectness_logits": obj.transpose(0, 3, 1, 2),
        "rpn_anchor_deltas": dlt.transpose(0, 3, 1, 2),
        "roi_cls_scores": cls,
        "roi_bbox_deltas": bbox,
    }


# ----------------------------------------------------------------------------
if __name__ == "__main__":
    key = jax.random.PRNGKey(0)
    k_img, k_par = jax.random.split(key)

    N, C, H, W = 2, 3, 32, 32
    images = 255.0 * jax.random.uniform(k_img, (N, C, H, W), jnp.float32)
    params = init_params(k_par, c_in=C)

    out = jax.jit(generalized_rcnn_forward)(params, images)
    out = jax.block_until_ready(out)

    C4 = params["bb_w"].shape[-1]
    assert out["res4"].shape == (N, C4, H // 2, W // 2)
    assert out["rpn_objectness_logits"].shape == (N, 3, H // 2, W // 2)
    assert out["rpn_anchor_deltas"].shape == (N, 12, H // 2, W // 2)
    assert out["roi_cls_scores"].shape == (N, 9)
    assert out["roi_bbox_deltas"].shape == (N, 32)

    # numerical check against the un-folded, un-fused f32 XLA reference;
    # tolerances sized for bf16 matmul operands with f32 accumulation.
    ref = reference_forward(params, images)
    for name in out:
        got = np.asarray(jnp.asarray(out[name], jnp.float32))
        exp = np.asarray(jnp.asarray(ref[name], jnp.float32))
        np.testing.assert_allclose(got, exp, rtol=5e-2, atol=5e-2, err_msg=name)

    print("KERNEL_OK")
</pallas_src>

<mosaic_0001>
module attributes {stable_mosaic.version = 11 : i64} {
  func.func @_backbone_boxhead_kernel(%arg0: i32, %arg1: memref<1x432x12xbf16, #tpu.memory_space<vmem>>, %arg2: memref<4x12x128xbf16, #tpu.memory_space<vmem>>, %arg3: memref<1x128xf32, #tpu.memory_space<vmem>>, %arg4: memref<128x128xbf16, #tpu.memory_space<vmem>>, %arg5: memref<1x128xf32, #tpu.memory_space<vmem>>, %arg6: memref<128x128xbf16, #tpu.memory_space<vmem>>, %arg7: memref<1x128xf32, #tpu.memory_space<vmem>>, %arg8: memref<1x19x24x128xbf16, #tpu.memory_space<vmem>>, %arg9: memref<1x1x128xf32, #tpu.memory_space<vmem>>) attributes {dimension_semantics = [#tpu.dimension_semantics<parallel>], iteration_bounds = array<i64: 2>, scalar_prefetch = 0 : i64, scratch_operands = 0 : i64, tpu.core_type = #tpu.core_type<tc>, window_params = [{transform_indices = @transform_0, window_bounds = array<i64: 1, 432, 12>}, {pipeline_mode = #tpu.pipeline_mode<synchronous>, transform_indices = @transform_1, window_bounds = array<i64: 4, 12, 128>}, {pipeline_mode = #tpu.pipeline_mode<synchronous>, transform_indices = @transform_2, window_bounds = array<i64: 1, 128>}, {pipeline_mode = #tpu.pipeline_mode<synchronous>, transform_indices = @transform_3, window_bounds = array<i64: 128, 128>}, {pipeline_mode = #tpu.pipeline_mode<synchronous>, transform_indices = @transform_4, window_bounds = array<i64: 1, 128>}, {pipeline_mode = #tpu.pipeline_mode<synchronous>, transform_indices = @transform_5, window_bounds = array<i64: 128, 128>}, {pipeline_mode = #tpu.pipeline_mode<synchronous>, transform_indices = @transform_6, window_bounds = array<i64: 1, 128>}, {transform_indices = @transform_7, window_bounds = array<i64: 1, 19, 24, 128>}, {transform_indices = @transform_8, window_bounds = array<i64: 1, 1, 128>}]} {
    %c0 = arith.constant 0 : index
    %c0_0 = arith.constant 0 : index
    %c0_1 = arith.constant 0 : index
    %0 = vector.load %arg1[%c0, %c0_0, %c0_1] : memref<1x432x12xbf16, #tpu.memory_space<vmem>>, vector<1x384x12xbf16>
    %1 = vector.shape_cast %0 : vector<1x384x12xbf16> to vector<384x12xbf16>
    %c0_2 = arith.constant 0 : index
    %c0_3 = arith.constant 0 : index
    %c0_4 = arith.constant 0 : index
    %2 = vector.load %arg2[%c0_2, %c0_3, %c0_4] : memref<4x12x128xbf16, #tpu.memory_space<vmem>>, vector<1x12x128xbf16>
    %3 = vector.shape_cast %2 : vector<1x12x128xbf16> to vector<12x128xbf16>
    %cst = arith.constant dense<0.000000e+00> : vector<384x128xf32>
    %4 = tpu.matmul %1, %3, %cst {dimension_numbers = #tpu.dot_dimension_numbers<[1], [0], [0], [1], [0, 0, 1, 1], [], []>} : vector<384x12xbf16>, vector<12x128xbf16>, vector<384x128xf32> -> vector<384x128xf32>
    %c0_5 = arith.constant 0 : index
    %c1 = arith.constant 1 : index
    %c0_6 = arith.constant 0 : index
    %5 = vector.load %arg1[%c0_5, %c1, %c0_6] : memref<1x432x12xbf16, #tpu.memory_space<vmem>>, vector<1x384x12xbf16>
    %6 = vector.shape_cast %5 : vector<1x384x12xbf16> to vector<384x12xbf16>
    %c1_7 = arith.constant 1 : index
    %c0_8 = arith.constant 0 : index
    %c0_9 = arith.constant 0 : index
    %7 = vector.load %arg2[%c1_7, %c0_8, %c0_9] : memref<4x12x128xbf16, #tpu.memory_space<vmem>>, vector<1x12x128xbf16>
    %8 = vector.shape_cast %7 : vector<1x12x128xbf16> to vector<12x128xbf16>
    %cst_10 = arith.constant dense<0.000000e+00> : vector<384x128xf32>
    %9 = tpu.matmul %6, %8, %cst_10 {dimension_numbers = #tpu.dot_dimension_numbers<[1], [0], [0], [1], [0, 0, 1, 1], [], []>} : vector<384x12xbf16>, vector<12x128xbf16>, vector<384x128xf32> -> vector<384x128xf32>
    %10 = arith.addf %4, %9 : vector<384x128xf32>
    %c0_11 = arith.constant 0 : index
    %c24 = arith.constant 24 : index
    %c0_12 = arith.constant 0 : index
    %11 = vector.load %arg1[%c0_11, %c24, %c0_12] : memref<1x432x12xbf16, #tpu.memory_space<vmem>>, vector<1x384x12xbf16>
    %12 = vector.shape_cast %11 : vector<1x384x12xbf16> to vector<384x12xbf16>
    %c2 = arith.constant 2 : index
    %c0_13 = arith.constant 0 : index
    %c0_14 = arith.constant 0 : index
    %13 = vector.load %arg2[%c2, %c0_13, %c0_14] : memref<4x12x128xbf16, #tpu.memory_space<vmem>>, vector<1x12x128xbf16>
    %14 = vector.shape_cast %13 : vector<1x12x128xbf16> to vector<12x128xbf16>
    %cst_15 = arith.constant dense<0.000000e+00> : vector<384x128xf32>
    %15 = tpu.matmul %12, %14, %cst_15 {dimension_numbers = #tpu.dot_dimension_numbers<[1], [0], [0], [1], [0, 0, 1, 1], [], []>} : vector<384x12xbf16>, vector<12x128xbf16>, vector<384x128xf32> -> vector<384x128xf32>
    %16 = arith.addf %10, %15 : vector<384x128xf32>
    %c0_16 = arith.constant 0 : index
    %c25 = arith.constant 25 : index
    %c0_17 = arith.constant 0 : index
    %17 = vector.load %arg1[%c0_16, %c25, %c0_17] : memref<1x432x12xbf16, #tpu.memory_space<vmem>>, vector<1x384x12xbf16>
    %18 = vector.shape_cast %17 : vector<1x384x12xbf16> to vector<384x12xbf16>
    %c3 = arith.constant 3 : index
    %c0_18 = arith.constant 0 : index
    %c0_19 = arith.constant 0 : index
    %19 = vector.load %arg2[%c3, %c0_18, %c0_19] : memref<4x12x128xbf16, #tpu.memory_space<vmem>>, vector<1x12x128xbf16>
    %20 = vector.shape_cast %19 : vector<1x12x128xbf16> to vector<12x128xbf16>
    %cst_20 = arith.constant dense<0.000000e+00> : vector<384x128xf32>
    %21 = tpu.matmul %18, %20, %cst_20 {dimension_numbers = #tpu.dot_dimension_numbers<[1], [0], [0], [1], [0, 0, 1, 1], [], []>} : vector<384x12xbf16>, vector<12x128xbf16>, vector<384x128xf32> -> vector<384x128xf32>
    %22 = arith.addf %16, %21 : vector<384x128xf32>
    %c0_21 = arith.constant 0 : index
    %c0_22 = arith.constant 0 : index
    %23 = vector.load %arg3[%c0_21, %c0_22] : memref<1x128xf32, #tpu.memory_space<vmem>>, vector<1x128xf32>
    %24 = vector.broadcast %23 : vector<1x128xf32> to vector<384x128xf32>
    %25 = arith.addf %22, %24 : vector<384x128xf32>
    %cst_23 = arith.constant 0.000000e+00 : f32
    %26 = vector.broadcast %cst_23 : f32 to vector<384x128xf32>
    %27 = arith.maximumf %25, %26 : vector<384x128xf32>
    %28 = vector.shape_cast %27 : vector<384x128xf32> to vector<16x24x128xf32>
    %29 = vector.extract_strided_slice %28 {offsets = [0, 0, 0], sizes = [16, 16, 128], strides = [1, 1, 1]} : vector<16x24x128xf32> to vector<16x16x128xf32>
    %30 = arith.truncf %29 : vector<16x16x128xf32> to vector<16x16x128xbf16>
    %cst_24 = arith.constant 0.000000e+00 : bf16
    %31 = vector.broadcast %cst_24 : bf16 to vector<19x24x128xbf16>
    %c0_25 = arith.constant 0 : index
    %c0_26 = arith.constant 0 : index
    %c0_27 = arith.constant 0 : index
    %c0_28 = arith.constant 0 : index
    %32 = vector.load %arg8[%c0_25, %c0_26, %c0_27, %c0_28] : memref<1x19x24x128xbf16, #tpu.memory_space<vmem>>, vector<1x19x24x128xbf16>
    %33 = vector.shape_cast %32 : vector<1x19x24x128xbf16> to vector<19x24x128xbf16>
    %34 = vector.shape_cast %31 : vector<19x24x128xbf16> to vector<1x19x24x128xbf16>
    tpu.vector_store %arg8[%c0_25, %c0_26, %c0_27, %c0_28], %34 {strides = array<i32>} : memref<1x19x24x128xbf16, #tpu.memory_space<vmem>>, vector<1x19x24x128xbf16>,
    %c0_29 = arith.constant 0 : index
    %c1_30 = arith.constant 1 : index
    %c1_31 = arith.constant 1 : index
    %c0_32 = arith.constant 0 : index
    %35 = vector.load %arg8[%c0_29, %c1_30, %c1_31, %c0_32] : memref<1x19x24x128xbf16, #tpu.memory_space<vmem>>, vector<1x16x16x128xbf16>
    %36 = vector.shape_cast %35 : vector<1x16x16x128xbf16> to vector<16x16x128xbf16>
    %37 = vector.shape_cast %30 : vector<16x16x128xbf16> to vector<1x16x16x128xbf16>
    tpu.vector_store %arg8[%c0_29, %c1_30, %c1_31, %c0_32], %37 {strides = array<i32>} : memref<1x19x24x128xbf16, #tpu.memory_space<vmem>>, vector<1x16x16x128xbf16>,
    %cst_33 = arith.constant 1.000000e+00 : bf16
    %38 = vector.broadcast %cst_33 : bf16 to vector<1x256xbf16>
    %39 = vector.shape_cast %30 : vector<16x16x128xbf16> to vector<256x128xbf16>
    %cst_34 = arith.constant dense<0.000000e+00> : vector<1x128xf32>
    %40 = tpu.matmul %38, %39, %cst_34 {dimension_numbers = #tpu.dot_dimension_numbers<[1], [0], [0], [1], [0, 0, 1, 1], [], []>} : vector<1x256xbf16>, vector<256x128xbf16>, vector<1x128xf32> -> vector<1x128xf32>
    %cst_35 = arith.constant 3.906250e-03 : f32
    %41 = vector.broadcast %cst_35 : f32 to vector<1x128xf32>
    %42 = arith.mulf %40, %41 : vector<1x128xf32>
    %43 = arith.truncf %42 : vector<1x128xf32> to vector<1x128xbf16>
    %c0_36 = arith.constant 0 : index
    %c0_37 = arith.constant 0 : index
    %44 = vector.load %arg4[%c0_36, %c0_37] : memref<128x128xbf16, #tpu.memory_space<vmem>>, vector<128x128xbf16>
    %cst_38 = arith.constant dense<0.000000e+00> : vector<1x128xf32>
    %45 = tpu.matmul %43, %44, %cst_38 {dimension_numbers = #tpu.dot_dimension_numbers<[1], [0], [0], [1], [0, 0, 1, 1], [], []>} : vector<1x128xbf16>, vector<128x128xbf16>, vector<1x128xf32> -> vector<1x128xf32>
    %c0_39 = arith.constant 0 : index
    %c0_40 = arith.constant 0 : index
    %46 = vector.load %arg5[%c0_39, %c0_40] : memref<1x128xf32, #tpu.memory_space<vmem>>, vector<1x128xf32>
    %47 = arith.addf %45, %46 : vector<1x128xf32>
    %cst_41 = arith.constant 0.000000e+00 : f32
    %48 = vector.broadcast %cst_41 : f32 to vector<1x128xf32>
    %49 = arith.maximumf %47, %48 : vector<1x128xf32>
    %50 = arith.truncf %49 : vector<1x128xf32> to vector<1x128xbf16>
    %c0_42 = arith.constant 0 : index
    %c0_43 = arith.constant 0 : index
    %51 = vector.load %arg6[%c0_42, %c0_43] : memref<128x128xbf16, #tpu.memory_space<vmem>>, vector<128x128xbf16>
    %cst_44 = arith.constant dense<0.000000e+00> : vector<1x128xf32>
    %52 = tpu.matmul %50, %51, %cst_44 {dimension_numbers = #tpu.dot_dimension_numbers<[1], [0], [0], [1], [0, 0, 1, 1], [], []>} : vector<1x128xbf16>, vector<128x128xbf16>, vector<1x128xf32> -> vector<1x128xf32>
    %c0_45 = arith.constant 0 : index
    %c0_46 = arith.constant 0 : index
    %53 = vector.load %arg7[%c0_45, %c0_46] : memref<1x128xf32, #tpu.memory_space<vmem>>, vector<1x128xf32>
    %54 = arith.addf %52, %53 : vector<1x128xf32>
    %c0_47 = arith.constant 0 : index
    %c0_48 = arith.constant 0 : index
    %c0_49 = arith.constant 0 : index
    %55 = vector.load %arg9[%c0_47, %c0_48, %c0_49] : memref<1x1x128xf32, #tpu.memory_space<vmem>>, vector<1x1x128xf32>
    %56 = vector.shape_cast %55 : vector<1x1x128xf32> to vector<1x128xf32>
    %57 = vector.shape_cast %54 : vector<1x128xf32> to vector<1x1x128xf32>
    tpu.vector_store %arg9[%c0_47, %c0_48, %c0_49], %57 {strides = array<i32>} : memref<1x1x128xf32, #tpu.memory_space<vmem>>, vector<1x1x128xf32>,
    return
  }
  func.func @transform_0(%arg0: i32) -> (i32, i32, i32) {
    %c0_i32 = arith.constant 0 : i32
    %c0_i32_0 = arith.constant 0 : i32
    %c0_i32_1 = arith.constant 0 : i32
    return %arg0, %c0_i32, %c0_i32_0 : i32, i32, i32
  }
  func.func @transform_1(%arg0: i32) -> (i32, i32, i32) {
    %c0_i32 = arith.constant 0 : i32
    %c0_i32_0 = arith.constant 0 : i32
    %c0_i32_1 = arith.constant 0 : i32
    %c0_i32_2 = arith.constant 0 : i32
    return %c0_i32, %c0_i32_0, %c0_i32_1 : i32, i32, i32
  }
  func.func @transform_2(%arg0: i32) -> (i32, i32) {
    %c0_i32 = arith.constant 0 : i32
    %c0_i32_0 = arith.constant 0 : i32
    %c0_i32_1 = arith.constant 0 : i32
    return %c0_i32, %c0_i32_0 : i32, i32
  }
  func.func @transform_3(%arg0: i32) -> (i32, i32) {
    %c0_i32 = arith.constant 0 : i32
    %c0_i32_0 = arith.constant 0 : i32
    %c0_i32_1 = arith.constant 0 : i32
    return %c0_i32, %c0_i32_0 : i32, i32
  }
  func.func @transform_4(%arg0: i32) -> (i32, i32) {
    %c0_i32 = arith.constant 0 : i32
    %c0_i32_0 = arith.constant 0 : i32
    %c0_i32_1 = arith.constant 0 : i32
    return %c0_i32, %c0_i32_0 : i32, i32
  }
  func.func @transform_5(%arg0: i32) -> (i32, i32) {
    %c0_i32 = arith.constant 0 : i32
    %c0_i32_0 = arith.constant 0 : i32
    %c0_i32_1 = arith.constant 0 : i32
    return %c0_i32, %c0_i32_0 : i32, i32
  }
  func.func @transform_6(%arg0: i32) -> (i32, i32) {
    %c0_i32 = arith.constant 0 : i32
    %c0_i32_0 = arith.constant 0 : i32
    %c0_i32_1 = arith.constant 0 : i32
    return %c0_i32, %c0_i32_0 : i32, i32
  }
  func.func @transform_7(%arg0: i32) -> (i32, i32, i32, i32) {
    %c0_i32 = arith.constant 0 : i32
    %c0_i32_0 = arith.constant 0 : i32
    %c0_i32_1 = arith.constant 0 : i32
    %c0_i32_2 = arith.constant 0 : i32
    return %arg0, %c0_i32, %c0_i32_0, %c0_i32_1 : i32, i32, i32, i32
  }
  func.func @transform_8(%arg0: i32) -> (i32, i32, i32) {
    %c0_i32 = arith.constant 0 : i32
    %c0_i32_0 = arith.constant 0 : i32
    %c0_i32_1 = arith.constant 0 : i32
    return %arg0, %c0_i32, %c0_i32_0 : i32, i32, i32
  }
}

module attributes {stable_mosaic.version = 11 : i64} {
  func.func @_rpn_head_kernel(%arg0: i32, %arg1: memref<1x456x128xbf16, #tpu.memory_space<vmem>>, %arg2: memref<456x1xf32, #tpu.memory_space<vmem>>, %arg3: memref<1x128xf32, #tpu.memory_space<vmem>>, %arg4: memref<1x128xf32, #tpu.memory_space<vmem>>, %arg5: memref<9x128x128xbf16, #tpu.memory_space<vmem>>, %arg6: memref<1x128xf32, #tpu.memory_space<vmem>>, %arg7: memref<128x128xbf16, #tpu.memory_space<vmem>>, %arg8: memref<1x128xf32, #tpu.memory_space<vmem>>, %arg9: memref<1x384x128xbf16, #tpu.memory_space<vmem>>, %arg10: memref<456x128xbf16, #tpu.memory_space<vmem>>) attributes {dimension_semantics = [#tpu.dimension_semantics<parallel>], iteration_bounds = array<i64: 2>, scalar_prefetch = 0 : i64, scratch_operands = 1 : i64, tpu.core_type = #tpu.core_type<tc>, window_params = [{transform_indices = @transform_0, window_bounds = array<i64: 1, 456, 128>}, {pipeline_mode = #tpu.pipeline_mode<synchronous>, transform_indices = @transform_1, window_bounds = array<i64: 456, 1>}, {pipeline_mode = #tpu.pipeline_mode<synchronous>, transform_indices = @transform_2, window_bounds = array<i64: 1, 128>}, {pipeline_mode = #tpu.pipeline_mode<synchronous>, transform_indices = @transform_3, window_bounds = array<i64: 1, 128>}, {pipeline_mode = #tpu.pipeline_mode<synchronous>, transform_indices = @transform_4, window_bounds = array<i64: 9, 128, 128>}, {pipeline_mode = #tpu.pipeline_mode<synchronous>, transform_indices = @transform_5, window_bounds = array<i64: 1, 128>}, {pipeline_mode = #tpu.pipeline_mode<synchronous>, transform_indices = @transform_6, window_bounds = array<i64: 128, 128>}, {pipeline_mode = #tpu.pipeline_mode<synchronous>, transform_indices = @transform_7, window_bounds = array<i64: 1, 128>}, {transform_indices = @transform_8, window_bounds = array<i64: 1, 384, 128>}]} {
    %c0 = arith.constant 0 : index
    %c0_0 = arith.constant 0 : index
    %c0_1 = arith.constant 0 : index
    %0 = vector.load %arg1[%c0, %c0_0, %c0_1] : memref<1x456x128xbf16, #tpu.memory_space<vmem>>, vector<1x456x128xbf16>
    %1 = vector.shape_cast %0 : vector<1x456x128xbf16> to vector<456x128xbf16>
    %2 = arith.extf %1 : vector<456x128xbf16> to vector<456x128xf32>
    %c0_2 = arith.constant 0 : index
    %c0_3 = arith.constant 0 : index
    %3 = vector.load %arg3[%c0_2, %c0_3] : memref<1x128xf32, #tpu.memory_space<vmem>>, vector<1x128xf32>
    %4 = vector.broadcast %3 : vector<1x128xf32> to vector<456x128xf32>
    %5 = arith.mulf %2, %4 : vector<456x128xf32>
    %c0_4 = arith.constant 0 : index
    %c0_5 = arith.constant 0 : index
    %6 = vector.load %arg2[%c0_4, %c0_5] : memref<456x1xf32, #tpu.memory_space<vmem>>, vector<456x1xf32>
    %c0_6 = arith.constant 0 : index
    %c0_7 = arith.constant 0 : index
    %7 = vector.load %arg4[%c0_6, %c0_7] : memref<1x128xf32, #tpu.memory_space<vmem>>, vector<1x128xf32>
    %8 = vector.broadcast %6 : vector<456x1xf32> to vector<456x128xf32>
    %9 = vector.broadcast %7 : vector<1x128xf32> to vector<456x128xf32>
    %10 = arith.mulf %8, %9 : vector<456x128xf32>
    %11 = arith.addf %5, %10 : vector<456x128xf32>
    %12 = arith.truncf %11 : vector<456x128xf32> to vector<456x128xbf16>
    %c0_8 = arith.constant 0 : index
    %c0_9 = arith.constant 0 : index
    %13 = vector.load %arg10[%c0_8, %c0_9] : memref<456x128xbf16, #tpu.memory_space<vmem>>, vector<456x128xbf16>
    tpu.vector_store %arg10[%c0_8, %c0_9], %12 {strides = array<i32>} : memref<456x128xbf16, #tpu.memory_space<vmem>>, vector<456x128xbf16>,
    %c0_10 = arith.constant 0 : index
    %c0_11 = arith.constant 0 : index
    %14 = vector.load %arg10[%c0_10, %c0_11] : memref<456x128xbf16, #tpu.memory_space<vmem>>, vector<384x128xbf16>
    %c0_12 = arith.constant 0 : index
    %c0_13 = arith.constant 0 : index
    %c0_14 = arith.constant 0 : index
    %15 = vector.load %arg5[%c0_12, %c0_13, %c0_14] : memref<9x128x128xbf16, #tpu.memory_space<vmem>>, vector<1x128x128xbf16>
    %16 = vector.shape_cast %15 : vector<1x128x128xbf16> to vector<128x128xbf16>
    %cst = arith.constant dense<0.000000e+00> : vector<384x128xf32>
    %17 = tpu.matmul %14, %16, %cst {dimension_numbers = #tpu.dot_dimension_numbers<[1], [0], [0], [1], [0, 0, 1, 1], [], []>} : vector<384x128xbf16>, vector<128x128xbf16>, vector<384x128xf32> -> vector<384x128xf32>
    %c1 = arith.constant 1 : index
    %c0_15 = arith.constant 0 : index
    %18 = vector.load %arg10[%c1, %c0_15] : memref<456x128xbf16, #tpu.memory_space<vmem>>, vector<384x128xbf16>
    %c1_16 = arith.constant 1 : index
    %c0_17 = arith.constant 0 : index
    %c0_18 = arith.constant 0 : index
    %19 = vector.load %arg5[%c1_16, %c0_17, %c0_18] : memref<9x128x128xbf16, #tpu.memory_space<vmem>>, vector<1x128x128xbf16>
    %20 = vector.shape_cast %19 : vector<1x128x128xbf16> to vector<128x128xbf16>
    %cst_19 = arith.constant dense<0.000000e+00> : vector<384x128xf32>
    %21 = tpu.matmul %18, %20, %cst_19 {dimension_numbers = #tpu.dot_dimension_numbers<[1], [0], [0], [1], [0, 0, 1, 1], [], []>} : vector<384x128xbf16>, vector<128x128xbf16>, vector<384x128xf32> -> vector<384x128xf32>
    %22 = arith.addf %17, %21 : vector<384x128xf32>
    %c2 = arith.constant 2 : index
    %c0_20 = arith.constant 0 : index
    %23 = vector.load %arg10[%c2, %c0_20] : memref<456x128xbf16, #tpu.memory_space<vmem>>, vector<384x128xbf16>
    %c2_21 = arith.constant 2 : index
    %c0_22 = arith.constant 0 : index
    %c0_23 = arith.constant 0 : index
    %24 = vector.load %arg5[%c2_21, %c0_22, %c0_23] : memref<9x128x128xbf16, #tpu.memory_space<vmem>>, vector<1x128x128xbf16>
    %25 = vector.shape_cast %24 : vector<1x128x128xbf16> to vector<128x128xbf16>
    %cst_24 = arith.constant dense<0.000000e+00> : vector<384x128xf32>
    %26 = tpu.matmul %23, %25, %cst_24 {dimension_numbers = #tpu.dot_dimension_numbers<[1], [0], [0], [1], [0, 0, 1, 1], [], []>} : vector<384x128xbf16>, vector<128x128xbf16>, vector<384x128xf32> -> vector<384x128xf32>
    %27 = arith.addf %22, %26 : vector<384x128xf32>
    %c24 = arith.constant 24 : index
    %c0_25 = arith.constant 0 : index
    %28 = vector.load %arg10[%c24, %c0_25] : memref<456x128xbf16, #tpu.memory_space<vmem>>, vector<384x128xbf16>
    %c3 = arith.constant 3 : index
    %c0_26 = arith.constant 0 : index
    %c0_27 = arith.constant 0 : index
    %29 = vector.load %arg5[%c3, %c0_26, %c0_27] : memref<9x128x128xbf16, #tpu.memory_space<vmem>>, vector<1x128x128xbf16>
    %30 = vector.shape_cast %29 : vector<1x128x128xbf16> to vector<128x128xbf16>
    %cst_28 = arith.constant dense<0.000000e+00> : vector<384x128xf32>
    %31 = tpu.matmul %28, %30, %cst_28 {dimension_numbers = #tpu.dot_dimension_numbers<[1], [0], [0], [1], [0, 0, 1, 1], [], []>} : vector<384x128xbf16>, vector<128x128xbf16>, vector<384x128xf32> -> vector<384x128xf32>
    %32 = arith.addf %27, %31 : vector<384x128xf32>
    %c25 = arith.constant 25 : index
    %c0_29 = arith.constant 0 : index
    %33 = vector.load %arg10[%c25, %c0_29] : memref<456x128xbf16, #tpu.memory_space<vmem>>, vector<384x128xbf16>
    %c4 = arith.constant 4 : index
    %c0_30 = arith.constant 0 : index
    %c0_31 = arith.constant 0 : index
    %34 = vector.load %arg5[%c4, %c0_30, %c0_31] : memref<9x128x128xbf16, #tpu.memory_space<vmem>>, vector<1x128x128xbf16>
    %35 = vector.shape_cast %34 : vector<1x128x128xbf16> to vector<128x128xbf16>
    %cst_32 = arith.constant dense<0.000000e+00> : vector<384x128xf32>
    %36 = tpu.matmul %33, %35, %cst_32 {dimension_numbers = #tpu.dot_dimension_numbers<[1], [0], [0], [1], [0, 0, 1, 1], [], []>} : vector<384x128xbf16>, vector<128x128xbf16>, vector<384x128xf32> -> vector<384x128xf32>
    %37 = arith.addf %32, %36 : vector<384x128xf32>
    %c26 = arith.constant 26 : index
    %c0_33 = arith.constant 0 : index
    %38 = vector.load %arg10[%c26, %c0_33] : memref<456x128xbf16, #tpu.memory_space<vmem>>, vector<384x128xbf16>
    %c5 = arith.constant 5 : index
    %c0_34 = arith.constant 0 : index
    %c0_35 = arith.constant 0 : index
    %39 = vector.load %arg5[%c5, %c0_34, %c0_35] : memref<9x128x128xbf16, #tpu.memory_space<vmem>>, vector<1x128x128xbf16>
    %40 = vector.shape_cast %39 : vector<1x128x128xbf16> to vector<128x128xbf16>
    %cst_36 = arith.constant dense<0.000000e+00> : vector<384x128xf32>
    %41 = tpu.matmul %38, %40, %cst_36 {dimension_numbers = #tpu.dot_dimension_numbers<[1], [0], [0], [1], [0, 0, 1, 1], [], []>} : vector<384x128xbf16>, vector<128x128xbf16>, vector<384x128xf32> -> vector<384x128xf32>
    %42 = arith.addf %37, %41 : vector<384x128xf32>
    %c48 = arith.constant 48 : index
    %c0_37 = arith.constant 0 : index
    %43 = vector.load %arg10[%c48, %c0_37] : memref<456x128xbf16, #tpu.memory_space<vmem>>, vector<384x128xbf16>
    %c6 = arith.constant 6 : index
    %c0_38 = arith.constant 0 : index
    %c0_39 = arith.constant 0 : index
    %44 = vector.load %arg5[%c6, %c0_38, %c0_39] : memref<9x128x128xbf16, #tpu.memory_space<vmem>>, vector<1x128x128xbf16>
    %45 = vector.shape_cast %44 : vector<1x128x128xbf16> to vector<128x128xbf16>
    %cst_40 = arith.constant dense<0.000000e+00> : vector<384x128xf32>
    %46 = tpu.matmul %43, %45, %cst_40 {dimension_numbers = #tpu.dot_dimension_numbers<[1], [0], [0], [1], [0, 0, 1, 1], [], []>} : vector<384x128xbf16>, vector<128x128xbf16>, vector<384x128xf32> -> vector<384x128xf32>
    %47 = arith.addf %42, %46 : vector<384x128xf32>
    %c49 = arith.constant 49 : index
    %c0_41 = arith.constant 0 : index
    %48 = vector.load %arg10[%c49, %c0_41] : memref<456x128xbf16, #tpu.memory_space<vmem>>, vector<384x128xbf16>
    %c7 = arith.constant 7 : index
    %c0_42 = arith.constant 0 : index
    %c0_43 = arith.constant 0 : index
    %49 = vector.load %arg5[%c7, %c0_42, %c0_43] : memref<9x128x128xbf16, #tpu.memory_space<vmem>>, vector<1x128x128xbf16>
    %50 = vector.shape_cast %49 : vector<1x128x128xbf16> to vector<128x128xbf16>
    %cst_44 = arith.constant dense<0.000000e+00> : vector<384x128xf32>
    %51 = tpu.matmul %48, %50, %cst_44 {dimension_numbers = #tpu.dot_dimension_numbers<[1], [0], [0], [1], [0, 0, 1, 1], [], []>} : vector<384x128xbf16>, vector<128x128xbf16>, vector<384x128xf32> -> vector<384x128xf32>
    %52 = arith.addf %47, %51 : vector<384x128xf32>
    %c50 = arith.constant 50 : index
    %c0_45 = arith.constant 0 : index
    %53 = vector.load %arg10[%c50, %c0_45] : memref<456x128xbf16, #tpu.memory_space<vmem>>, vector<384x128xbf16>
    %c8 = arith.constant 8 : index
    %c0_46 = arith.constant 0 : index
    %c0_47 = arith.constant 0 : index
    %54 = vector.load %arg5[%c8, %c0_46, %c0_47] : memref<9x128x128xbf16, #tpu.memory_space<vmem>>, vector<1x128x128xbf16>
    %55 = vector.shape_cast %54 : vector<1x128x128xbf16> to vector<128x128xbf16>
    %cst_48 = arith.constant dense<0.000000e+00> : vector<384x128xf32>
    %56 = tpu.matmul %53, %55, %cst_48 {dimension_numbers = #tpu.dot_dimension_numbers<[1], [0], [0], [1], [0, 0, 1, 1], [], []>} : vector<384x128xbf16>, vector<128x128xbf16>, vector<384x128xf32> -> vector<384x128xf32>
    %57 = arith.addf %52, %56 : vector<384x128xf32>
    %c0_49 = arith.constant 0 : index
    %c0_50 = arith.constant 0 : index
    %58 = vector.load %arg6[%c0_49, %c0_50] : memref<1x128xf32, #tpu.memory_space<vmem>>, vector<1x128xf32>
    %59 = vector.broadcast %58 : vector<1x128xf32> to vector<384x128xf32>
    %60 = arith.addf %57, %59 : vector<384x128xf32>
    %cst_51 = arith.constant 0.000000e+00 : f32
    %61 = vector.broadcast %cst_51 : f32 to vector<384x128xf32>
    %62 = arith.maximumf %60, %61 : vector<384x128xf32>
    %63 = arith.truncf %62 : vector<384x128xf32> to vector<384x128xbf16>
    %c0_52 = arith.constant 0 : index
    %c0_53 = arith.constant 0 : index
    %64 = vector.load %arg7[%c0_52, %c0_53] : memref<128x128xbf16, #tpu.memory_space<vmem>>, vector<128x128xbf16>
    %cst_54 = arith.constant dense<0.000000e+00> : vector<384x128xf32>
    %65 = tpu.matmul %63, %64, %cst_54 {dimension_numbers = #tpu.dot_dimension_numbers<[1], [0], [0], [1], [0, 0, 1, 1], [], []>} : vector<384x128xbf16>, vector<128x128xbf16>, vector<384x128xf32> -> vector<384x128xf32>
    %c0_55 = arith.constant 0 : index
    %c0_56 = arith.constant 0 : index
    %66 = vector.load %arg8[%c0_55, %c0_56] : memref<1x128xf32, #tpu.memory_space<vmem>>, vector<1x128xf32>
    %67 = vector.broadcast %66 : vector<1x128xf32> to vector<384x128xf32>
    %68 = arith.addf %65, %67 : vector<384x128xf32>
    %69 = arith.truncf %68 : vector<384x128xf32> to vector<384x128xbf16>
    %c0_57 = arith.constant 0 : index
    %c0_58 = arith.constant 0 : index
    %c0_59 = arith.constant 0 : index
    %70 = vector.load %arg9[%c0_57, %c0_58, %c0_59] : memref<1x384x128xbf16, #tpu.memory_space<vmem>>, vector<1x384x128xbf16>
    %71 = vector.shape_cast %70 : vector<1x384x128xbf16> to vector<384x128xbf16>
    %72 = vector.shape_cast %69 : vector<384x128xbf16> to vector<1x384x128xbf16>
    tpu.vector_store %arg9[%c0_57, %c0_58, %c0_59], %72 {strides = array<i32>} : memref<1x384x128xbf16, #tpu.memory_space<vmem>>, vector<1x384x128xbf16>,
    return
  }
  func.func @transform_0(%arg0: i32) -> (i32, i32, i32) {
    %c0_i32 = arith.constant 0 : i32
    %c0_i32_0 = arith.constant 0 : i32
    %c0_i32_1 = arith.constant 0 : i32
    return %arg0, %c0_i32, %c0_i32_0 : i32, i32, i32
  }
  func.func @transform_1(%arg0: i32) -> (i32, i32) {
    %c0_i32 = arith.constant 0 : i32
    %c0_i32_0 = arith.constant 0 : i32
    %c0_i32_1 = arith.constant 0 : i32
    return %c0_i32, %c0_i32_0 : i32, i32
  }
  func.func @transform_2(%arg0: i32) -> (i32, i32) {
    %c0_i32 = arith.constant 0 : i32
    %c0_i32_0 = arith.constant 0 : i32
    %c0_i32_1 = arith.constant 0 : i32
    return %c0_i32, %c0_i32_0 : i32, i32
  }
  func.func @transform_3(%arg0: i32) -> (i32, i32) {
    %c0_i32 = arith.constant 0 : i32
    %c0_i32_0 = arith.constant 0 : i32
    %c0_i32_1 = arith.constant 0 : i32
    return %c0_i32, %c0_i32_0 : i32, i32
  }
  func.func @transform_4(%arg0: i32) -> (i32, i32, i32) {
    %c0_i32 = arith.constant 0 : i32
    %c0_i32_0 = arith.constant 0 : i32
    %c0_i32_1 = arith.constant 0 : i32
    %c0_i32_2 = arith.constant 0 : i32
    return %c0_i32, %c0_i32_0, %c0_i32_1 : i32, i32, i32
  }
  func.func @transform_5(%arg0: i32) -> (i32, i32) {
    %c0_i32 = arith.constant 0 : i32
    %c0_i32_0 = arith.constant 0 : i32
    %c0_i32_1 = arith.constant 0 : i32
    return %c0_i32, %c0_i32_0 : i32, i32
  }
  func.func @transform_6(%arg0: i32) -> (i32, i32) {
    %c0_i32 = arith.constant 0 : i32
    %c0_i32_0 = arith.constant 0 : i32
    %c0_i32_1 = arith.constant 0 : i32
    return %c0_i32, %c0_i32_0 : i32, i32
  }
  func.func @transform_7(%arg0: i32) -> (i32, i32) {
    %c0_i32 = arith.constant 0 : i32
    %c0_i32_0 = arith.constant 0 : i32
    %c0_i32_1 = arith.constant 0 : i32
    return %c0_i32, %c0_i32_0 : i32, i32
  }
  func.func @transform_8(%arg0: i32) -> (i32, i32, i32) {
    %c0_i32 = arith.constant 0 : i32
    %c0_i32_0 = arith.constant 0 : i32
    %c0_i32_1 = arith.constant 0 : i32
    return %arg0, %c0_i32, %c0_i32_0 : i32, i32, i32
  }
}

</mosaic_0001>

<bundles_post_ra>
// kernel: generalized_rcnn_forward.2
= control target key start
LH: loop header
LB: loop body
LE: loop exit
PB: predicated region body
PF: predicated region fallthrough
CT: control target
= control target key end

     0   :  { %s4333_s27 = smov 0   ;;  %s5400_s0 = inlined_call_operand.vmem [shape: bf16[2,432,12], index: 0, kind: input, shape index: {}]   ;;  %s5401_s1 = inlined_call_operand.vmem [shape: bf16[4,12,128], index: 1, kind: input, shape index: {}]   ;;  %s5402_s2 = inlined_call_operand.vmem [shape: f32[1,128], index: 2, kind: input, shape index: {}]   ;;  %s5403_s3 = inlined_call_operand.vmem [shape: bf16[128,128], index: 3, kind: input, shape index: {}]   ;;  %s5404_s4 = inlined_call_operand.vmem [shape: f32[1,128], index: 4, kind: input, shape index: {}]   ;;  %s5405_s5 = inlined_call_operand.vmem [shape: bf16[128,128], index: 5, kind: input, shape index: {}]   ;;  %s5406_s6 = inlined_call_operand.vmem [shape: f32[1,128], index: 6, kind: input, shape index: {}]   ;;  %s5407_s7 = inlined_call_operand.vmem [shape: bf16[2,19,24,128], index: 7, kind: output, shape index: {0}]   ;;  %s5408_s8 = inlined_call_operand.vmem [shape: f32[2,1,128], index: 8, kind: output, shape index: {1}]  }
   0x1 LB: > { %s3431_s28 = sadd.s32 4294967295, %s4282_s27   ;;  %p3435_p0 = scmp.ge.s32.totalorder %s4282_s27, 1  ;;  %s4282_s27 = sphi %s4333_s27, %s19_s27  }
   0x2   : > { %p265_p1 = scmp.lt.s32.totalorder %s4282_s27, 3 }
   0x4   : > { %p266_p2 = pnand %p3435_p0, %p265_p1 }
   0x5   : > { %v4182_v0 = vld [vmem:[%s5401_s1 + $0x8] sm:$0x3f] (!%p266_p2)   ;;  %vm769_vm0 = vcmask (!%p266_p2), 1045504   ;;  %p302_p3 = scmp.lt.s32.totalorder (!%p266_p2), %s3431_s28, 1  ;;  %v4193_v2 = vld [vmem:[%s5401_s1] sm:$0x3f] (!%p266_p2)  }
   0x6   : > { %269 = sbr.rel (%p266_p2) target bundleno = 1109 (0x455), region = 48  ;;  %4163 = vmatprep.subr.msk.bf16.mxu0 (!%p266_p2), %vm769_vm0, %v4182_v0  ;;  %4164 = vmatprep.subr.msk.bf16.mxu1 (!%p266_p2), %vm769_vm0, %v4182_v0  ;;  %v771_v1 = vsel (!%p266_p2), %vm769_vm0, %v4182_v0, 0  ;;  %v4210_v3 = vld [vmem:[%s5401_s1 + $0x10] sm:$0x3f] (!%p266_p2)   ;;  %vm494_vm1 = vsmask.f32 (!%p266_p2), 7424 }
   0x7   : > { %3922 = vmatpush3.bf16.msra.mxu0 (!%p266_p2), %v771_v1  ;;  %4162 = vmatpush3.bf16.msra.mxu1 (!%p266_p2), %v771_v1  ;;  %vm696_vm2 = vcmask (!%p266_p2), 97280   ;;  %v1036_v12 = vsel (!%p266_p2), %vm769_vm0, %v4193_v2, 0  ;;  %v1496_v13 = vsel (!%p266_p2), %vm769_vm0, %v4210_v3, 0  ;;  %v4208_v39 = vld [vmem:[%s5401_s1 + $0x18] sm:$0x3f] (!%p266_p2)   ;;  %vm2979_vm3 = vcmask (!%p266_p2), 1043456  }
   0x8   : > { %4165 = vmatprep.subr.msk.bf16.mxu1 (!%p266_p2), %vm769_vm0, %v4193_v2  ;;  %4166 = vmatprep.subr.msk.bf16.mxu0 (!%p266_p2), %vm769_vm0, %v4210_v3  ;;  %vm2980_vm4 = vsmask.f32 (!%p266_p2), 7938  ;;  %vm2655_vm5 = vsmask.f32 (!%p266_p2), 256  ;;  %vm2656_vm6 = vsmask.f32 (!%p266_p2), 4368 }
   0x9   : > { %vm2986_vm7 = vcmask (!%p266_p2), 1040384   ;;  %vm4935_vm8 = vmand (!%p266_p2), %vm2979_vm3, %vm2980_vm4  ;;  %vm4287_vm11 = vmmov (!%p266_p2), 0  }
   0xa   : > { %vm4951_vm9 = vmor (!%p266_p2), %vm2655_vm5, %vm2656_vm6 }
   0xb   : > { %vm4959_vm10 = vmand (!%p266_p2), %vm2986_vm7, %vm2655_vm5 }
   0xd   : > { %s5425_s28 = smov (!%p302_p3, %s3431_s28), 1 }
   0xe   : > { %s4168_s11 = smul.u32 216, %s5425_s28  ;;  %s314_s24 = scalar_lea.vmem %s5408_s8, %s5425_s28 }
   0xf   : > { %s4169_s19 = smul.u32 228, %s5425_s28 }
  0x10   : > { %s4360_s16 = scalar_lea.vmem %s5400_s0, %s4168_s11 }
  0x11   : > { %v4364_v4 = vld [vmem:[%s4360_s16] sm:$0xff]   ;;  %v4367_v5 = vld [vmem:[%s4360_s16 + $0x8] sm:$0xff]   ;;  %v4382_v16 = vld [vmem:[%s4360_s16 + $0x10] sm:$0xff]   ;;  %s4690_s22 = scalar_lea.vmem %s5407_s7, %s4169_s19 }
  0x12   : > { %v496_v6 = vshrl.u32 %v4364_v4, 16  ;;  %v498_v7 = vshll.u32 %v4364_v4, 16  ;;  %v503_v8 = vshll.u32 %v4367_v5, 16  ;;  %v507_v9 = vshrl.u32 %v4367_v5, 16  ;;  %v4374_v10 = vld [vmem:[%s4360_s16 + $0xa0] sm:$0xff]   ;;  %v4377_v11 = vld [vmem:[%s4360_s16 + $0xa8] sm:$0xff]  }
  0x13   : > { %v4385_v17 = vld [vmem:[%s4360_s16 + $0xb0] sm:$0xff]   ;;  %v655_v18 = vshll.u32 %v4374_v10, 16  ;;  %v659_v19 = vshrl.u32 %v4374_v10, 16  ;;  %v663_v20 = vshll.u32 %v4377_v11, 16  ;;  %v667_v21 = vshrl.u32 %v4377_v11, 16  ;;  %v4396_v28 = vld [vmem:[%s4360_s16 + $0x18] sm:$0xff]  }
  0x14   : > { %v500_v14 = vrot.slane %v498_v7, 1  ;;  %v505_v15 = vrot.slane %v503_v8, 1  ;;  %v511_v24 = vshll.u32 %v4382_v16, 16  ;;  %v671_v25 = vshll.u32 %v4385_v17, 16  ;;  %v4404_v36 = vld [vmem:[%s4360_s16 + $0xb8] sm:$0xff]   ;;  %v4408_v38 = vld [vmem:[%s4360_s16 + $0x20] sm:$0xff]  }
  0x15   : > { %v4393_v26 = vrot.slane %v655_v18, 1  ;;  %v665_v27 = vrot.slane %v663_v20, 1  ;;  %v515_v29 = vshrl.u32 %v4382_v16, 16  ;;  %v519_v35 = vshll.u32 %v4396_v28, 16  ;;  %v4416_v43 = vld [vmem:[%s4360_s16 + $0x28] sm:$0xff]   ;;  %v4432_v59 = vld [vmem:[%s4360_s16 + $0x30] sm:$0xff]  }
  0x16   : > { %v501_v22 = vor.u32 %v500_v14, %v496_v6  ;;  %v509_v23 = vor.u32 %v507_v9, %v505_v15  ;;  %v513_v31 = vrot.slane %v511_v24, 1  ;;  %v673_v32 = vrot.slane %v671_v25, 1  ;;  %v4192_v48 = vld [vmem:[%s4360_s16 + $0xc0] ss:$0 sps:$4 sm:$0x11]   ;;  %v4436_v63 = vld [vmem:[%s4360_s16 + $0x38] sm:$0xff]  }
  0x17   : > { %v661_v33 = vor.u32 %v659_v19, %v4393_v26  ;;  %v669_v34 = vor.u32 %v667_v21, %v665_v27  ;;  %v675_v37 = vshrl.u32 %v4385_v17, 16  ;;  %v523_v42 = vshrl.u32 %v4396_v28, 16  ;;  %v4449_v14 = vld [vmem:[%s4360_s16 + $0x40] sm:$0xff]   ;;  %v4454_v20 = vld [vmem:[%s4360_s16 + $0x48] sm:$0xff]  }
  0x18   : > { %v506_v30 = vsel %vm494_vm1, %v501_v22, %v505_v15  ;;  %v514_v40 = vsel %vm494_vm1, %v509_v23, %v513_v31  ;;  %v517_v41 = vor.u32 %v515_v29, %v513_v31  ;;  %v521_v46 = vrot.slane %v519_v35, 1 }
  0x19   : > { %3923 = vmatprep.mubr.msk.bf16.mxu0 %vm696_vm2, %v506_v30  ;;  %v666_v44 = vsel %vm494_vm1, %v661_v33, %v665_v27  ;;  %v674_v45 = vsel %vm494_vm1, %v669_v34, %v673_v32  ;;  %v677_v47 = vor.u32 %v675_v37, %v673_v32  ;;  %v679_v49 = vshll.u32 %v4404_v36, 16  ;;  %v4466_v30 = vld [vmem:[%s4360_s16 + $0x50] sm:$0xff]   ;;  %v4473_v34 = vld [vmem:[%s4360_s16 + $0x58] sm:$0xff]  }
  0x1a   : > { %3924 = vmatmul.mubr.msk.bf16.vlgmr.msra.gmra.mrb[0].mxu0 %vm696_vm2, %v514_v40  ;;  %3963 = vmatprep.mubr.msk.bf16.mxu1 %vm696_vm2, %v666_v44  ;;  %v527_v50 = vshll.u32 %v4408_v38, 16  ;;  %v683_v51 = vshrl.u32 %v4404_v36, 16  ;;  %v531_v52 = vshrl.u32 %v4408_v38, 16  ;;  %v522_v53 = vsel %vm494_vm1, %v517_v41, %v521_v46  ;;  %v4485_v44 = vld [vmem:[%s4360_s16 + $0x60] sm:$0xff]  }
  0x1b   : > { %4022 = vmatpush3.bf16.msra.mxu0 %v1496_v13  ;;  %3964 = vmatmul.mubr.msk.bf16.vlgmr.msra.gmra.mrb[0].mxu1 %vm696_vm2, %v674_v45  ;;  %v525_v54 = vor.u32 %v523_v42, %v521_v46  ;;  %v687_v55 = vshll.u32 %v4192_v48, 16  ;;  %v535_v56 = vshll.u32 %v4416_v43, 16  ;;  %v681_v57 = vrot.slane %v679_v49, 1 }
  0x1c   : > { %3927 = vmatprep.mubr.msk.bf16.mxu0 %vm696_vm2, %v522_v53  ;;  %v529_v58 = vrot.slane %v527_v50, 1  ;;  %3972 = vmatpush3.bf16.msra.mxu1 %v1036_v12  ;;  %v539_v62 = vshrl.u32 %v4416_v43, 16  ;;  %v543_v6 = vshll.u32 %v4432_v59, 16  ;;  %v547_v7 = vshrl.u32 %v4432_v59, 16 }
  0x1d   : > { %v689_v60 = vrot.slane %v687_v55, 1  ;;  %v537_v61 = vrot.slane %v535_v56, 1  ;;  %4167 = vmatprep.subr.msk.bf16.mxu1 %vm769_vm0, %v4208_v39  ;;  %v682_v0 = vsel %vm494_vm1, %v677_v47, %v681_v57  ;;  %v685_v2 = vor.u32 %v683_v51, %v681_v57  ;;  %v4491_v47 = vld [vmem:[%s4360_s16 + $0x68] sm:$0xff]   ;;  %v4505_v55 = vld [vmem:[%s4360_s16 + $0x78] sm:$0xff]  }
  0x1e   : > { %v530_v1 = vsel %vm494_vm1, %v525_v54, %v529_v58  ;;  %v533_v3 = vor.u32 %v531_v52, %v529_v58  ;;  %3967 = vmatprep.mubr.msk.bf16.mxu1 %vm696_vm2, %v682_v0  ;;  %v551_v8 = vshll.u32 %v4436_v63, 16  ;;  %v545_v13 = vrot.slane %v543_v6, 1  ;;  %v4203_v54 = vld [vmem:[%s4360_s16 + $0x70] sm:$0xff]  }
  0x1f   : > { %v690_v9 = vsel %vm494_vm1, %v685_v2, %v689_v60  ;;  %v541_v15 = vor.u32 %v539_v62, %v537_v61  ;;  %v559_v21 = vshll.u32 %v4449_v14, 16  ;;  %v555_v23 = vshrl.u32 %v4436_v63, 16 }
  0x20   : > { %v538_v12 = vsel %vm494_vm1, %v533_v3, %v537_v61  ;;  %v549_v18 = vor.u32 %v547_v7, %v545_v13  ;;  %v553_v19 = vrot.slane %v551_v8, 1  ;;  %v563_v25 = vshrl.u32 %v4449_v14, 16 }
  0x21   : > { %v546_v22 = vsel %vm494_vm1, %v541_v15, %v545_v13  ;;  %v567_v27 = vshll.u32 %v4454_v20, 16  ;;  %v561_v29 = vrot.slane %v559_v21, 1  ;;  %v575_v35 = vshll.u32 %v4466_v30, 16  ;;  %v4207_v21 = vld [vmem:[%s4360_s16 + $0x90] sm:$0xff]  }
  0x22   : > { %3928 = vmatmul.mubr.msk.bf16.gmra.mrb[4].mxu0 %vm696_vm2, %v530_v1  ;;  %v554_v24 = vsel %vm494_vm1, %v549_v18, %v553_v19  ;;  %v557_v31 = vor.u32 %v555_v23, %v553_v19  ;;  %v579_v41 = vshrl.u32 %v4466_v30, 16  ;;  %v591_v48 = vshll.u32 %v4485_v44, 16  ;;  %v4209_v23 = vld [vmem:[%s4360_s16 + $0x98] sm:$0xff]  }
  0x23   : > { %3931 = vmatprep.mubr.msk.bf16.mxu0 %vm696_vm2, %v538_v12  ;;  %3968 = vmatmul.mubr.msk.bf16.gmra.mrb[4].mxu1 %vm696_vm2, %v690_v9  ;;  %v565_v32 = vor.u32 %v563_v25, %v561_v29  ;;  %v569_v33 = vrot.slane %v567_v27, 1  ;;  %v577_v42 = vrot.slane %v575_v35, 1  ;;  %v587_v50 = vshrl.u32 %v4473_v34, 16 }
  0x24   : > { %3973 = vmatprep.mubr.msk.bf16.mxu1 %vm696_vm2, %v4364_v4  ;;  %v2188_v4 = vsel %vm769_vm0, %v4208_v39, 0  ;;  %v562_v37 = vsel %vm494_vm1, %v557_v31, %v561_v29  ;;  %v571_v39 = vshrl.u32 %v4454_v20, 16  ;;  %v595_v52 = vshrl.u32 %v4485_v44, 16 }
  0x25   : > { %v570_v40 = vsel %vm494_vm1, %v565_v32, %v569_v33  ;;  %v581_v45 = vor.u32 %v579_v41, %v577_v42  ;;  %v593_v53 = vrot.slane %v591_v48, 1  ;;  %v607_v58 = vshll.u32 %v4203_v54, 16  ;;  %v4211_v41 = vld [vmem:[%s4360_s16 + $0xc] sm:$0xff]   ;;  %v4217_v48 = vld [vmem:[%s4360_s16 + $0x3c] sm:$0xff]  }
  0x26   : > { %v603_v61 = vshrl.u32 %v4491_v47, 16  ;;  %v615_v62 = vshll.u32 %v4505_v55, 16  ;;  %v611_v1 = vshrl.u32 %v4203_v54, 16  ;;  %v619_v12 = vshrl.u32 %v4505_v55, 16 }
  0x27   : > { %v597_v56 = vor.u32 %v595_v52, %v593_v53  ;;  %v609_v2 = vrot.slane %v607_v58, 1  ;;  %v639_v25 = vshll.u32 %v4207_v21, 16  ;;  %v647_v31 = vshll.u32 %v4209_v23, 16  ;;  %v4223_v52 = vld [vmem:[%s4360_s16 + $0x1c] sm:$0xff]  }
  0x28   : > { %v617_v6 = vrot.slane %v615_v62, 1  ;;  %v4222_v62 = vld [vmem:[%s4360_s16 + $0x54] sm:$0xff]  }
  0x29   : > { %v613_v7 = vor.u32 %v611_v1, %v609_v2  ;;  %v641_v32 = vrot.slane %v639_v25, 1 }
  0x2a   : > { %3932 = vmatmul.mubr.msk.bf16.gmra.mrb[8].mxu0 %vm696_vm2, %v546_v22 }
  0x2b   : > { %3935 = vmatprep.mubr.msk.bf16.mxu0 %vm696_vm2, %v554_v24  ;;  %3974 = vmatmul.mubr.msk.bf16.vlgmr.msra.gmra.mrb[8].mxu1 %vm696_vm2, %v4367_v5  ;;  %v583_v5 = vshll.u32 %v4473_v34, 16  ;;  %v618_v13 = vsel %vm494_vm1, %v613_v7, %v617_v6 }
  0x2c   : > { %3977 = vmatprep.mubr.msk.bf16.mxu1 %vm696_vm2, %v4382_v16  ;;  %4072 = vmatpush3.bf16.msra.mxu1 %v2188_v4  ;;  %v573_v16 = vor.u32 %v571_v39, %v569_v33  ;;  %v643_v4 = vshrl.u32 %v4207_v21, 16 }
  0x2d   : > { %v585_v46 = vrot.slane %v583_v5, 1  ;;  %v4212_v5 = vld [vmem:[%s4360_s16 + $0x14] sm:$0xff]  }
  0x2e   : > { %v578_v49 = vsel %vm494_vm1, %v573_v16, %v577_v42  ;;  %v645_v33 = vor.u32 %v643_v4, %v641_v32  ;;  %v4213_v42 = vld [vmem:[%s4360_s16 + $0x1c] sm:$0xff]   ;;  %v4220_v16 = vld [vmem:[%s4360_s16 + $0xc] sm:$0xff]  }
  0x2f   : > { %v586_v51 = vsel %vm494_vm1, %v581_v45, %v585_v46  ;;  %v4216_v45 = vld [vmem:[%s4360_s16 + $0x34] sm:$0xff]   ;;  %v4235_v4 = vld [vmem:[%s4360_s16 + $0x4c] sm:$0xff]  }
  0x32   : > { %3936 = vmatmul.mubr.msk.bf16.gmra.mrb[12].mxu0 %vm696_vm2, %v562_v37  ;;  %v651_v37 = vshrl.u32 %v4209_v23, 16 }
  0x33   : > { %3939 = vmatprep.mubr.msk.bf16.mxu0 %vm696_vm2, %v570_v40  ;;  %3978 = vmatmul.mubr.msk.bf16.gmra.mrb[12].mxu1 %vm696_vm2, %v4396_v28  ;;  %v599_v28 = vshll.u32 %v4491_v47, 16 }
  0x34   : > { %3981 = vmatprep.mubr.msk.bf16.mxu1 %vm696_vm2, %v4408_v38  ;;  %v589_v38 = vor.u32 %v587_v50, %v585_v46  ;;  %v4221_v46 = vld [vmem:[%s4360_s16 + $0x14] sm:$0xff]  }
  0x35   : > { %v601_v57 = vrot.slane %v599_v28, 1 }
  0x36   : > { %v594_v60 = vsel %vm494_vm1, %v589_v38, %v593_v53  ;;  %v4219_v38 = vld [vmem:[%s4360_s16 + $0x4c] sm:$0xff]  }
  0x37   : > { %v602_v0 = vsel %vm494_vm1, %v597_v56, %v601_v57  ;;  %v605_v3 = vor.u32 %v603_v61, %v601_v57  ;;  %v1926_v56 = vshrl.u32 %v4221_v46, 16 }
  0x39   : > { %v610_v9 = vsel %vm494_vm1, %v605_v3, %v609_v2  ;;  %v4229_v2 = vld [vmem:[%s4360_s16 + $0x34] sm:$0xff]  }
  0x3a   : > { %3940 = vmatmul.mubr.msk.bf16.gmra.mrb[16].mxu0 %vm696_vm2, %v578_v49  ;;  %v1915_v49 = vshrl.u32 %v4220_v16, 16 }
  0x3b   : > { %3943 = vmatprep.mubr.msk.bf16.mxu0 %vm696_vm2, %v586_v51  ;;  %3982 = vmatmul.mubr.msk.bf16.gmra.mrb[16].mxu1 %vm696_vm2, %v4416_v43  ;;  %v4205_v43 = vld [vmem:[%s4360_s16 + $0x80] sm:$0xff]   ;;  %v1922_v51 = vshll.u32 %v4221_v46, 16 }
  0x3c   : > { %3985 = vmatprep.mubr.msk.bf16.mxu1 %vm696_vm2, %v4432_v59  ;;  %v4206_v59 = vld [vmem:[%s4360_s16 + $0x88] sm:$0xff]   ;;  %v623_v8 = vshll.u32 %v4205_v43, 16  ;;  %v627_v15 = vshrl.u32 %v4205_v43, 16 }
  0x3d   : > { %v631_v18 = vshll.u32 %v4206_v59, 16  ;;  %v635_v24 = vshrl.u32 %v4206_v59, 16  ;;  %v1924_v53 = vrot.slane %v1922_v51, 1 }
  0x3e   : > { %v625_v19 = vrot.slane %v623_v8, 1  ;;  %v1954_v8 = vshll.u32 %v4229_v2, 16 }
  0x3f   : > { %v633_v22 = vrot.slane %v631_v18, 1  ;;  %v1928_v61 = vor.u32 %v1926_v56, %v1924_v53 }
  0x42   : > { %3944 = vmatmul.mubr.msk.bf16.gmra.mrb[20].mxu0 %vm696_vm2, %v594_v60  ;;  %v4227_v60 = vld [vmem:[%s4360_s16 + $0x2c] sm:$0xff]  }
  0x43   : > { %3947 = vmatprep.mubr.msk.bf16.mxu0 %vm696_vm2, %v602_v0  ;;  %3986 = vmatmul.mubr.msk.bf16.gmra.mrb[20].mxu1 %vm696_vm2, %v4436_v63  ;;  %v621_v63 = vor.u32 %v619_v12, %v617_v6  ;;  %v1946_v3 = vshll.u32 %v4227_v60, 16  ;;  %v1950_v7 = vshrl.u32 %v4227_v60, 16  ;;  %v4231_v12 = vld [vmem:[%s4360_s16 + $0x3c] sm:$0xff]  }
  0x44   : > { %3989 = vmatprep.mubr.msk.bf16.mxu1 %vm696_vm2, %v4449_v14  ;;  %v629_v14 = vor.u32 %v627_v15, %v625_v19  ;;  %v4226_v15 = vld [vmem:[%s4360_s16 + $0x64] sm:$0xff]   ;;  %v1966_v25 = vshrl.u32 %v4231_v12, 16 }
  0x45   : > { %v626_v27 = vsel %vm494_vm1, %v621_v63, %v625_v19  ;;  %v1956_v19 = vrot.slane %v1954_v8, 1  ;;  %v4228_v63 = vld [vmem:[%s4360_s16 + $0x6c] sm:$0xff]  }
  0x46   : > { %v634_v29 = vsel %vm494_vm1, %v629_v14, %v633_v22  ;;  %v1962_v14 = vshll.u32 %v4231_v12, 16  ;;  %v4244_v8 = vld [vmem:[%s4360_s16 + $0xac] sm:$0xff]  }
  0x4a   : > { %3948 = vmatmul.mubr.msk.bf16.gmra.mrb[24].mxu0 %vm696_vm2, %v610_v9  ;;  %v1948_v9 = vrot.slane %v1946_v3, 1 }
  0x4b   : > { %3951 = vmatprep.mubr.msk.bf16.mxu0 %vm696_vm2, %v618_v13  ;;  %3990 = vmatmul.mubr.msk.bf16.gmra.mrb[24].mxu1 %vm696_vm2, %v4454_v20  ;;  %v637_v20 = vor.u32 %v635_v24, %v633_v22 }
  0x4c   : > { %3993 = vmatprep.mubr.msk.bf16.mxu1 %vm696_vm2, %v4466_v30  ;;  %v649_v30 = vrot.slane %v647_v31, 1  ;;  %v1952_v18 = vor.u32 %v1950_v7, %v1948_v9  ;;  %v4249_v7 = vld [vmem:[%s4360_s16 + $0x84] sm:$0xff]  }
  0x4d   : > { %v642_v35 = vsel %vm494_vm1, %v637_v20, %v641_v32  ;;  %v4230_v32 = vld [vmem:[%s4360_s16 + $0x74] sm:$0xff]  }
  0x4e   : > { %v650_v39 = vsel %vm494_vm1, %v645_v33, %v649_v30  ;;  %v653_v40 = vor.u32 %v651_v37, %v649_v30  ;;  %v1957_v24 = vsel %vm494_vm1, %v1952_v18, %v1956_v19  ;;  %v4237_v30 = vld [vmem:[%s4360_s16 + $0x54] sm:$0xff]   ;;  %v1978_v37 = vshll.u32 %v4235_v4, 16 }
  0x4f   : > { %v1990_v51 = vshrl.u32 %v4237_v30, 16 }
  0x52   : > { %3952 = vmatmul.mubr.msk.bf16.gmra.mrb[28].mxu0 %vm696_vm2, %v626_v27 }
  0x53   : > { %3955 = vmatprep.mubr.msk.bf16.mxu0 %vm696_vm2, %v634_v29  ;;  %3994 = vmatmul.mubr.msk.bf16.gmra.mrb[28].mxu1 %vm696_vm2, %v4473_v34  ;;  %v658_v34 = vsel %vm494_vm1, %v653_v40, %v4393_v26  ;;  %v4214_v26 = vld [vmem:[%s4360_s16 + $0x24] sm:$0xff]   ;;  %v1964_v29 = vrot.slane %v1962_v14, 1 }
  0x54   : > { %3997 = vmatprep.mubr.msk.bf16.mxu1 %vm696_vm2, %v4485_v44  ;;  %v4215_v44 = vld [vmem:[%s4360_s16 + $0x2c] sm:$0xff]  }
  0x55   : > { %v1968_v20 = vor.u32 %v1966_v25, %v1964_v29  ;;  %v4252_v25 = vld [vmem:[%s4360_s16 + $0x94] sm:$0xff]  }
  0x5a   : > { %3956 = vmatmul.mubr.msk.bf16.gmra.mrb[32].mxu0 %vm696_vm2, %v642_v35  ;;  %v4232_v35 = vld [vmem:[%s4360_s16 + $0x7c] sm:$0xff]  }
  0x5b   : > { %3959 = vmatprep.mubr.msk.bf16.mxu0 %vm696_vm2, %v650_v39  ;;  %3998 = vmatmul.mubr.msk.bf16.gmra.mrb[32].mxu1 %vm696_vm2, %v4491_v47  ;;  %v1917_v47 = vshll.u32 %v4220_v16, 16  ;;  %v4234_v16 = vld [vmem:[%s4360_s16 + $0x84] sm:$0xff]  }
  0x5c   : > { %4001 = vmatprep.mubr.msk.bf16.mxu1 %vm696_vm2, %v4203_v54  ;;  %v4225_v54 = vld [vmem:[%s4360_s16 + $0x24] sm:$0xff]  }
  0x5d   : > { %v1919_v50 = vrot.slane %v1917_v47, 1  ;;  %v1938_v58 = vshll.u32 %v4225_v54, 16  ;;  %v4241_v47 = vld [vmem:[%s4360_s16 + $0x64] sm:$0xff]  }
  0x5f   : > { %v1920_v28 = vor.u32 %v1919_v50, %v1915_v49  ;;  %v1940_v1 = vrot.slane %v1938_v58, 1  ;;  %v4240_v58 = vld [vmem:[%s4360_s16 + $0x9c] sm:$0xff]  }
  0x61   : > { %v1925_v57 = vsel %vm494_vm1, %v1920_v28, %v1924_v53  ;;  %v2002_v28 = vshll.u32 %v4241_v47, 16 }
  0x62   : > { %3960 = vmatmul.mubr.msk.bf16.gmra.mrb[36].mxu0 %vm696_vm2, %v658_v34 }
  0x63   : > { %4023 = vmatprep.mubr.msk.bf16.mxu0 %vm696_vm2, %v4211_v41  ;;  %4002 = vmatmul.mubr.msk.bf16.gmra.mrb[36].mxu1 %vm696_vm2, %v4505_v55  ;;  %v1930_v55 = vshll.u32 %v4223_v52, 16  ;;  %v1982_v41 = vshrl.u32 %v4235_v4, 16 }
  0x64   : > { %4005 = vmatprep.mubr.msk.bf16.mxu1 %vm696_vm2, %v4205_v43  ;;  %v4224_v43 = vld [vmem:[%s4360_s16 + $0x5c] sm:$0xff]  }
  0x6a   : > { %4024 = vmatmul.mubr.msk.bf16.vlgmr.msra.gmra.mrb[40].mxu0 %vm696_vm2, %v4212_v5  ;;  %v1986_v5 = vshll.u32 %v4237_v30, 16 }
  0x6b   : > { %4027 = vmatprep.mubr.msk.bf16.mxu0 %vm696_vm2, %v4213_v42  ;;  %4006 = vmatmul.mubr.msk.bf16.gmra.mrb[40].mxu1 %vm696_vm2, %v4206_v59  ;;  %v1942_v59 = vshrl.u32 %v4225_v54, 16  ;;  %v1980_v42 = vrot.slane %v1978_v37, 1  ;;  %v4243_v54 = vld [vmem:[%s4360_s16 + $0x6c] sm:$0xff]  }
  0x6c   : > { %4009 = vmatprep.mubr.msk.bf16.mxu1 %vm696_vm2, %v4207_v21  ;;  %v4233_v21 = vld [vmem:[%s4360_s16 + $0x44] sm:$0xff]   ;;  %v1988_v46 = vrot.slane %v1986_v5, 1 }
  0x6d   : > { %v1944_v13 = vor.u32 %v1942_v59, %v1940_v1  ;;  %v1970_v27 = vshll.u32 %v4233_v21, 16  ;;  %v1974_v40 = vshrl.u32 %v4233_v21, 16 }
  0x6f   : > { %v1949_v22 = vsel %vm494_vm1, %v1944_v13, %v1948_v9  ;;  %v1972_v33 = vrot.slane %v1970_v27, 1  ;;  %v4248_v27 = vld [vmem:[%s4360_s16 + $0xbc] sm:$0xff]  }
  0x71   : > { %v1973_v34 = vsel %vm494_vm1, %v1968_v20, %v1972_v33 }
  0x72   : > { %4028 = vmatmul.mubr.msk.bf16.gmra.mrb[44].mxu0 %vm696_vm2, %v4214_v26  ;;  %v4239_v26 = vld [vmem:[%s4360_s16 + $0x5c] sm:$0xff]  }
  0x73   : > { %4031 = vmatprep.mubr.msk.bf16.mxu0 %vm696_vm2, %v4215_v44  ;;  %4010 = vmatmul.mubr.msk.bf16.gmra.mrb[44].mxu1 %vm696_vm2, %v4209_v23  ;;  %v1958_v23 = vshrl.u32 %v4229_v2, 16  ;;  %v1976_v44 = vor.u32 %v1974_v40, %v1972_v33  ;;  %v1994_v49 = vshll.u32 %v4239_v26, 16  ;;  %v2050_v33 = vshll.u32 %v4252_v25, 16 }
  0x74   : > { %4013 = vmatprep.mubr.msk.bf16.mxu1 %vm696_vm2, %v4374_v10  ;;  %v4218_v10 = vld [vmem:[%s4360_s16 + $0x44] sm:$0xff]  }
  0x75   : > { %v1960_v31 = vor.u32 %v1958_v23, %v1956_v19  ;;  %v1981_v50 = vsel %vm494_vm1, %v1976_v44, %v1980_v42  ;;  %v1996_v53 = vrot.slane %v1994_v49, 1  ;;  %v2034_v19 = vshll.u32 %v4249_v7, 16 }
  0x77   : > { %v1965_v39 = vsel %vm494_vm1, %v1960_v31, %v1964_v29  ;;  %v2038_v31 = vshrl.u32 %v4249_v7, 16 }
  0x7a   : > { %4032 = vmatmul.mubr.msk.bf16.gmra.mrb[48].mxu0 %vm696_vm2, %v4216_v45  ;;  %v1984_v45 = vor.u32 %v1982_v41, %v1980_v42  ;;  %v4254_v41 = vld [vmem:[%s4360_s16 + $0xa4] sm:$0xff]  }
  0x7b   : > { %4035 = vmatprep.mubr.msk.bf16.mxu0 %vm696_vm2, %v4217_v48  ;;  %4014 = vmatmul.mubr.msk.bf16.gmra.mrb[48].mxu1 %vm696_vm2, %v4377_v11  ;;  %v1934_v11 = vshrl.u32 %v4223_v52, 16  ;;  %v4236_v48 = vld [vmem:[%s4360_s16 + $0x8c] sm:$0xff]  }
  0x7c   : > { %4017 = vmatprep.mubr.msk.bf16.mxu1 %vm696_vm2, %v4385_v17  ;;  %v1932_v17 = vrot.slane %v1930_v55, 1  ;;  %v1989_v52 = vsel %vm494_vm1, %v1984_v45, %v1988_v46  ;;  %v4238_v55 = vld [vmem:[%s4360_s16 + $0x94] sm:$0xff]   ;;  %v2066_v45 = vshll.u32 %v4254_v41, 16 }
  0x7e   : > { %v1936_v0 = vor.u32 %v1934_v11, %v1932_v17  ;;  %v1933_v6 = vsel %vm494_vm1, %v1928_v61, %v1932_v17  ;;  %v4245_v11 = vld [vmem:[%s4360_s16 + $0x74] sm:$0xff]   ;;  %v2010_v17 = vshll.u32 %v4243_v54, 16  ;;  %v2006_v61 = vshrl.u32 %v4241_v47, 16  ;;  %v4255_v47 = vld [vmem:[%s4360_s16 + $0xac] sm:$0xff]  }
  0x7f   : > { %v2022_v13 = vshrl.u32 %v4245_v11, 16 }
  0x80   : > { %v2012_v2 = vrot.slane %v2010_v17, 1  ;;  %v4258_v17 = vld [vmem:[%s4360_s16 + $0xc4] sm:$0xff]  }
  0x82   : > { %4036 = vmatmul.mubr.msk.bf16.gmra.mrb[52].mxu0 %vm696_vm2, %v4218_v10  ;;  %v1998_v10 = vshrl.u32 %v4239_v26, 16  ;;  %v2054_v26 = vshrl.u32 %v4252_v25, 16 }
  0x83   : > { %4039 = vmatprep.mubr.msk.bf16.mxu0 %vm696_vm2, %v4219_v38  ;;  %4018 = vmatmul.mubr.msk.bf16.gmra.mrb[52].mxu1 %vm696_vm2, %v4404_v36  ;;  %v1941_v36 = vsel %vm494_vm1, %v1936_v0, %v1940_v1  ;;  %v1992_v38 = vor.u32 %v1990_v51, %v1988_v46  ;;  %v2014_v0 = vshrl.u32 %v4243_v54, 16  ;;  %v2018_v1 = vshll.u32 %v4245_v11, 16  ;;  %v4256_v51 = vld [vmem:[%s4360_s16 + $0xb4] sm:$0xff]  }
  0x84   : > { %4073 = vmatprep.mubr.msk.bf16.mxu1 %vm696_vm2, %v1925_v57  ;;  %v2000_v56 = vor.u32 %v1998_v10, %v1996_v53  ;;  %v2004_v57 = vrot.slane %v2002_v28, 1  ;;  %v2070_v28 = vshrl.u32 %v4254_v41, 16  ;;  %v2078_v54 = vshrl.u32 %v4255_v47, 16 }
  0x85   : > { %v1997_v60 = vsel %vm494_vm1, %v1992_v38, %v1996_v53  ;;  %v2016_v59 = vor.u32 %v2014_v0, %v2012_v2  ;;  %v2082_v38 = vshll.u32 %v4256_v51, 16 }
  0x86   : > { %v2008_v3 = vor.u32 %v2006_v61, %v2004_v57 }
  0x88   : > { %v2013_v12 = vsel %vm494_vm1, %v2008_v3, %v2012_v2  ;;  %v2098_v2 = vshll.u32 %v4258_v17, 16 }
  0x8a   : > { %4040 = vmatmul.mubr.msk.bf16.gmra.mrb[56].mxu0 %vm696_vm2, %v4222_v62  ;;  %v2005_v62 = vsel %vm494_vm1, %v2000_v56, %v2004_v57  ;;  %v4257_v56 = vld [vmem:[%s4360_s16 + $0xbc] sm:$0xff]  }
  0x8b   : > { %4043 = vmatprep.mubr.msk.bf16.mxu0 %vm696_vm2, %v4224_v43  ;;  %4074 = vmatmul.mubr.msk.bf16.vlgmr.msra.gmra.mrb[56].mxu1 %vm696_vm2, %v1933_v6  ;;  %v4247_v43 = vld [vmem:[%s4360_s16 + $0x7c] sm:$0xff]   ;;  %v4242_v6 = vld [vmem:[%s4360_s16 + $0xa4] sm:$0xff]  }
  0x8c   : > { %4077 = vmatprep.mubr.msk.bf16.mxu1 %vm696_vm2, %v1941_v36  ;;  %v2020_v36 = vrot.slane %v2018_v1, 1  ;;  %v2026_v9 = vshll.u32 %v4247_v43, 16  ;;  %v2030_v18 = vshrl.u32 %v4247_v43, 16  ;;  %v2094_v1 = vshrl.u32 %v4257_v56, 16 }
  0x8e   : > { %v2028_v21 = vrot.slane %v2026_v9, 1  ;;  %v2024_v14 = vor.u32 %v2022_v13, %v2020_v36 }
  0x90   : > { %v2032_v23 = vor.u32 %v2030_v18, %v2028_v21  ;;  %v2029_v4 = vsel %vm494_vm1, %v2024_v14, %v2028_v21 }
  0x92   : > { %4044 = vmatmul.mubr.msk.bf16.gmra.mrb[60].mxu0 %vm696_vm2, %v4226_v15  ;;  %v2021_v15 = vsel %vm494_vm1, %v2016_v59, %v2020_v36  ;;  %v2100_v36 = vrot.slane %v2098_v2, 1 }
  0x93   : > { %4047 = vmatprep.mubr.msk.bf16.mxu0 %vm696_vm2, %v4228_v63  ;;  %4078 = vmatmul.mubr.msk.bf16.gmra.mrb[60].mxu1 %vm696_vm2, %v1949_v22  ;;  %v4251_v63 = vld [vmem:[%s4360_s16 + $0x8c] sm:$0xff]   ;;  %v4246_v22 = vld [vmem:[%s4360_s16 + $0xb4] sm:$0xff]  }
  0x94   : > { %4081 = vmatprep.mubr.msk.bf16.mxu1 %vm696_vm2, %v1957_v24  ;;  %v2036_v24 = vrot.slane %v2034_v19, 1  ;;  %v2042_v29 = vshll.u32 %v4251_v63, 16  ;;  %v2046_v20 = vshrl.u32 %v4251_v63, 16  ;;  %v4284_v19 = vmov 0  }
  0x95   : > { %2521 = vst [vmem:[%s4690_s22 + $0xc] sm:$0xf] %v4284_v19  ;;  %2518 = vst [vmem:[%s4690_s22] sm:$0xf] %v4284_v19 }
  0x96   : > { %v2044_v30 = vrot.slane %v2042_v29, 1  ;;  %v2040_v37 = vor.u32 %v2038_v31, %v2036_v24  ;;  %2519 = vst [vmem:[%s4690_s22 + $0x4] sm:$0xf] %v4284_v19  ;;  %2520 = vst [vmem:[%s4690_s22 + $0x8] sm:$0xf] %v4284_v19 }
  0x97   : > { %2522 = vst [vmem:[%s4690_s22 + $0x10] sm:$0xf] %v4284_v19  ;;  %2523 = vst [vmem:[%s4690_s22 + $0x14] sm:$0xf] %v4284_v19 }
  0x98   : > { %v2048_v40 = vor.u32 %v2046_v20, %v2044_v30  ;;  %v2045_v42 = vsel %vm494_vm1, %v2040_v37, %v2044_v30  ;;  %2524 = vst [vmem:[%s4690_s22 + $0x18] sm:$0xf] %v4284_v19  ;;  %2525 = vst [vmem:[%s4690_s22 + $0x1c] sm:$0xf] %v4284_v19 }
  0x99   : > { %2526 = vst [vmem:[%s4690_s22 + $0x20] sm:$0xf] %v4284_v19  ;;  %2527 = vst [vmem:[%s4690_s22 + $0x24] sm:$0xf] %v4284_v19 }
  0x9a   : > { %4048 = vmatmul.mubr.msk.bf16.gmra.mrb[64].mxu0 %vm696_vm2, %v4230_v32  ;;  %v2037_v32 = vsel %vm494_vm1, %v2032_v23, %v2036_v24  ;;  %2528 = vst [vmem:[%s4690_s22 + $0x28] sm:$0xf] %v4284_v19  ;;  %2529 = vst [vmem:[%s4690_s22 + $0x2c] sm:$0xf] %v4284_v19 }
  0x9b   : > { %4051 = vmatprep.mubr.msk.bf16.mxu0 %vm696_vm2, %v4232_v35  ;;  %4082 = vmatmul.mubr.msk.bf16.gmra.mrb[64].mxu1 %vm696_vm2, %v1965_v39  ;;  %v4253_v35 = vld [vmem:[%s4360_s16 + $0x9c] sm:$0xff]   ;;  %v4250_v39 = vld [vmem:[%s4360_s16 + $0xc4] sm:$0xff]   ;;  %2530 = vst [vmem:[%s4690_s22 + $0x30] sm:$0xf] %v4284_v19  ;;  %2531 = vst [vmem:[%s4690_s22 + $0x34] sm:$0xf] %v4284_v19 }
  0x9c   : > { %4085 = vmatprep.mubr.msk.bf16.mxu1 %vm696_vm2, %v1973_v34  ;;  %v2052_v34 = vrot.slane %v2050_v33, 1  ;;  %v2058_v5 = vshll.u32 %v4253_v35, 16  ;;  %2532 = vst [vmem:[%s4690_s22 + $0x38] sm:$0xf] %v4284_v19  ;;  %2533 = vst [vmem:[%s4690_s22 + $0x3c] sm:$0xf] %v4284_v19 }
  0x9d   : > { %2534 = vst [vmem:[%s4690_s22 + $0x40] sm:$0xf] %v4284_v19  ;;  %2535 = vst [vmem:[%s4690_s22 + $0x44] sm:$0xf] %v4284_v19 }
  0x9e   : > { %v2053_v44 = vsel %vm494_vm1, %v2048_v40, %v2052_v34  ;;  %v2060_v46 = vrot.slane %v2058_v5, 1  ;;  %2536 = vst [vmem:[%s4690_s22 + $0x48] sm:$0xf] %v4284_v19  ;;  %2537 = vst [vmem:[%s4690_s22 + $0x4c] sm:$0xf] %v4284_v19 }
  0x9f   : > { %2538 = vst [vmem:[%s4690_s22 + $0x50] sm:$0xf] %v4284_v19  ;;  %2539 = vst [vmem:[%s4690_s22 + $0x54] sm:$0xf] %v4284_v19 }
  0xa0   : > { %2540 = vst [vmem:[%s4690_s22 + $0x58] sm:$0xf] %v4284_v19  ;;  %2541 = vst [vmem:[%s4690_s22 + $0x5c] sm:$0xf] %v4284_v19 }
  0xa1   : > { %2542 = vst [vmem:[%s4690_s22 + $0x60] sm:$0xf] %v4284_v19  ;;  %2543 = vst [vmem:[%s4690_s22 + $0x64] sm:$0xf] %v4284_v19 }
  0xa2   : > { %4052 = vmatmul.mubr.msk.bf16.gmra.mrb[68].mxu0 %vm696_vm2, %v4234_v16  ;;  %v2062_v16 = vshrl.u32 %v4253_v35, 16  ;;  %2544 = vst [vmem:[%s4690_s22 + $0x68] sm:$0xf] %v4284_v19  ;;  %2545 = vst [vmem:[%s4690_s22 + $0x6c] sm:$0xf] %v4284_v19 }
  0xa3   : > { %4055 = vmatprep.mubr.msk.bf16.mxu0 %vm696_vm2, %v4236_v48  ;;  %4086 = vmatmul.mubr.msk.bf16.gmra.mrb[68].mxu1 %vm696_vm2, %v1981_v50  ;;  %v2056_v48 = vor.u32 %v2054_v26, %v2052_v34  ;;  %v2068_v50 = vrot.slane %v2066_v45, 1  ;;  %2546 = vst [vmem:[%s4690_s22 + $0x70] sm:$0xf] %v4284_v19  ;;  %2547 = vst [vmem:[%s4690_s22 + $0x74] sm:$0xf] %v4284_v19 }
  0xa4   : > { %4089 = vmatprep.mubr.msk.bf16.mxu1 %vm696_vm2, %v1989_v52  ;;  %v2064_v49 = vor.u32 %v2062_v16, %v2060_v46  ;;  %v2074_v52 = vshll.u32 %v4255_v47, 16  ;;  %2548 = vst [vmem:[%s4690_s22 + $0x78] sm:$0xf] %v4284_v19  ;;  %2549 = vst [vmem:[%s4690_s22 + $0x7c] sm:$0xf] %v4284_v19 }
  0xa5   : > { %v2061_v10 = vsel %vm494_vm1, %v2056_v48, %v2060_v46  ;;  %v2072_v57 = vor.u32 %v2070_v28, %v2068_v50  ;;  %2550 = vst [vmem:[%s4690_s22 + $0x80] sm:$0xf] %v4284_v19  ;;  %2551 = vst [vmem:[%s4690_s22 + $0x84] sm:$0xf] %v4284_v19 }
  0xa6   : > { %v2069_v53 = vsel %vm494_vm1, %v2064_v49, %v2068_v50  ;;  %2552 = vst [vmem:[%s4690_s22 + $0x88] sm:$0xf] %v4284_v19  ;;  %2553 = vst [vmem:[%s4690_s22 + $0x8c] sm:$0xf] %v4284_v19 }
  0xa7   : > { %2554 = vst [vmem:[%s4690_s22 + $0x90] sm:$0xf] %v4284_v19  ;;  %2555 = vst [vmem:[%s4690_s22 + $0x94] sm:$0xf] %v4284_v19 }
  0xa8   : > { %2556 = vst [vmem:[%s4690_s22 + $0x98] sm:$0xf] %v4284_v19  ;;  %2557 = vst [vmem:[%s4690_s22 + $0x9c] sm:$0xf] %v4284_v19 }
  0xa9   : > { %2558 = vst [vmem:[%s4690_s22 + $0xa0] sm:$0xf] %v4284_v19  ;;  %2559 = vst [vmem:[%s4690_s22 + $0xa4] sm:$0xf] %v4284_v19 }
  0xaa   : > { %4056 = vmatmul.mubr.msk.bf16.gmra.mrb[72].mxu0 %vm696_vm2, %v4238_v55  ;;  %v2076_v55 = vrot.slane %v2074_v52, 1  ;;  %2560 = vst [vmem:[%s4690_s22 + $0xa8] sm:$0xf] %v4284_v19  ;;  %2561 = vst [vmem:[%s4690_s22 + $0xac] sm:$0xf] %v4284_v19 }
  0xab   : > { %4059 = vmatprep.mubr.msk.bf16.mxu0 %vm696_vm2, %v4240_v58  ;;  %4090 = vmatmul.mubr.msk.bf16.gmra.mrb[72].mxu1 %vm696_vm2, %v1997_v60  ;;  %v2084_v58 = vrot.slane %v2082_v38, 1  ;;  %v2090_v60 = vshll.u32 %v4257_v56, 16  ;;  %2562 = vst [vmem:[%s4690_s22 + $0xb0] sm:$0xf] %v4284_v19  ;;  %2563 = vst [vmem:[%s4690_s22 + $0xb4] sm:$0xf] %v4284_v19 }
  0xac   : > { %4093 = vmatprep.mubr.msk.bf16.mxu1 %vm696_vm2, %v2005_v62  ;;  %v2080_v11 = vor.u32 %v2078_v54, %v2076_v55  ;;  %v2077_v61 = vsel %vm494_vm1, %v2072_v57, %v2076_v55  ;;  %v2086_v62 = vshrl.u32 %v4256_v51, 16  ;;  %2564 = vst [vmem:[%s4690_s22 + $0xb8] sm:$0xf] %v4284_v19  ;;  %2565 = vst [vmem:[%s4690_s22 + $0xbc] sm:$0xf] %v4284_v19 }
  0xad   : > { %v2092_v43 = vrot.slane %v2090_v60, 1  ;;  %2566 = vst [vmem:[%s4690_s22 + $0xc0] sm:$0xf] %v4284_v19  ;;  %2567 = vst [vmem:[%s4690_s22 + $0xc4] sm:$0xf] %v4284_v19 }
  0xae   : > { %v2085_v0 = vsel %vm494_vm1, %v2080_v11, %v2084_v58  ;;  %v2088_v3 = vor.u32 %v2086_v62, %v2084_v58  ;;  %2568 = vst [vmem:[%s4690_s22 + $0xc8] sm:$0xf] %v4284_v19  ;;  %2569 = vst [vmem:[%s4690_s22 + $0xcc] sm:$0xf] %v4284_v19 }
  0xaf   : > { %v2096_v59 = vor.u32 %v2094_v1, %v2092_v43  ;;  %2570 = vst [vmem:[%s4690_s22 + $0xd0] sm:$0xf] %v4284_v19  ;;  %2571 = vst [vmem:[%s4690_s22 + $0xd4] sm:$0xf] %v4284_v19 }
  0xb0   : > { %v2093_v7 = vsel %vm494_vm1, %v2088_v3, %v2092_v43  ;;  %2572 = vst [vmem:[%s4690_s22 + $0xd8] sm:$0xf] %v4284_v19  ;;  %2573 = vst [vmem:[%s4690_s22 + $0xdc] sm:$0xf] %v4284_v19 }
  0xb1   : > { %2574 = vst [vmem:[%s4690_s22 + $0xe0] sm:$0xf] %v4284_v19 }
  0xb2   : > { %4060 = vmatmul.mubr.msk.bf16.gmra.mrb[76].mxu0 %vm696_vm2, %v4242_v6  ;;  %v4259_v6 = vld [vmem:[%s4360_s16 + $0xcc] ss:$0 sps:$4 sm:$0x11]  }
  0xb3   : > { %4063 = vmatprep.mubr.msk.bf16.mxu0 %vm696_vm2, %v4244_v8  ;;  %4094 = vmatmul.mubr.msk.bf16.gmra.mrb[76].mxu1 %vm696_vm2, %v2013_v12  ;;  %v2102_v8 = vshrl.u32 %v4258_v17, 16  ;;  %v2106_v9 = vshll.u32 %v4259_v6, 16  ;;  %v2101_v12 = vsel %vm494_vm1, %v2096_v59, %v2100_v36 }
  0xb4   : > { %4097 = vmatprep.mubr.msk.bf16.mxu1 %vm696_vm2, %v2021_v15 }
  0xb5   : > { %v2104_v13 = vor.u32 %v2102_v8, %v2100_v36  ;;  %v2108_v15 = vrot.slane %v2106_v9, 1 }
  0xb7   : > { %v2109_v18 = vsel %vm494_vm1, %v2104_v13, %v2108_v15 }
  0xba   : > { %4064 = vmatmul.mubr.msk.bf16.gmra.mrb[80].mxu0 %vm696_vm2, %v4246_v22 }
  0xbb   : > { %4067 = vmatprep.mubr.msk.bf16.mxu0 %vm696_vm2, %v4248_v27  ;;  %4098 = vmatmul.mubr.msk.bf16.gmra.mrb[80].mxu1 %vm696_vm2, %v2029_v4 }
  0xbc   : > { %4101 = vmatprep.mubr.msk.bf16.mxu1 %vm696_vm2, %v2037_v32 }
  0xc2   : > { %4068 = vmatmul.mubr.msk.bf16.gmra.mrb[84].mxu0 %vm696_vm2, %v4250_v39 }
  0xc3   : > { %4102 = vmatmul.mubr.msk.bf16.gmra.mrb[84].mxu1 %vm696_vm2, %v2045_v42 }
  0xc4   : > { %4105 = vmatprep.mubr.msk.bf16.mxu1 %vm696_vm2, %v2053_v44 }
  0xcb   : > { %4106 = vmatmul.mubr.msk.bf16.gmra.mrb[88].mxu1 %vm696_vm2, %v2061_v10 }
  0xcc   : > { %4109 = vmatprep.mubr.msk.bf16.mxu1 %vm696_vm2, %v2069_v53 }
  0xd3   : > { %4110 = vmatmul.mubr.msk.bf16.gmra.mrb[92].mxu1 %vm696_vm2, %v2077_v61 }
  0xd4   : > { %4113 = vmatprep.mubr.msk.bf16.mxu1 %vm696_vm2, %v2085_v0 }
  0xdb   : > { %4114 = vmatmul.mubr.msk.bf16.gmra.mrb[96].mxu1 %vm696_vm2, %v2093_v7 }
  0xdc   : > { %4117 = vmatprep.mubr.msk.bf16.mxu1 %vm696_vm2, %v2101_v12 }
  0xe3   : > { %4118 = vmatmul.mubr.msk.bf16.gmra.mrb[100].mxu1 %vm696_vm2, %v2109_v18 }
  0xed   : > { %v3925_v21 = vpop.f32.mrb[0].mxu0 }
  0xee   : > { %v807_v63 = vpop.f32.mrb[1].mxu0  ;;  %v4750_v14 = vpop.f32.mrb[0].mxu1 }
  0xef   : > { %v3926_v22 = vpop.f32.mrb[2].mxu0  ;;  %v4752_v23 = vpop.f32.mrb[1].mxu1 }
  0xf0   : > { %v810_v24 = vpop.f32.mrb[3].mxu0  ;;  %v4754_v25 = vpop.f32.mrb[2].mxu1 }
  0xf1   : > { %v957_v27 = vpop.f32.mrb[3].mxu1 }
  0xf5   : > { %v3929_v29 = vpop.f32.mrb[4].mxu0 }
  0xf6   : > { %v822_v4 = vpop.f32.mrb[5].mxu0  ;;  %v4756_v31 = vpop.f32.mrb[4].mxu1 }
  0xf7   : > { %v3930_v32 = vpop.f32.mrb[6].mxu0  ;;  %v969_v20 = vpop.f32.mrb[5].mxu1 }
  0xf8   : > { %v825_v33 = vpop.f32.mrb[7].mxu0  ;;  %v3970_v30 = vpop.f32.mrb[6].mxu1 }
  0xf9   : > { %v4758_v35 = vpop.f32.mrb[7].mxu1 }
  0xfd   : > { %v3933_v37 = vpop.f32.mrb[8].mxu0 }
  0xfe   : > { %v837_v39 = vpop.f32.mrb[9].mxu0  ;;  %v3975_v40 = vpop.f32.mrb[8].mxu1 }
  0xff   : > { %v3934_v34 = vpop.f32.mrb[10].mxu0  ;;  %v1072_v41 = vpop.f32.mrb[9].mxu1 }
 0x100   : > { %v839_v5 = vpop.f32.mrb[11].mxu0  ;;  %v4760_v42 = vadd.f32 %v1072_v41, %v807_v63  ;;  %v3976_v26 = vpop.f32.mrb[10].mxu1 }
 0x101   : > { %v4762_v44 = vadd.f32 %v3976_v26, %v3926_v22  ;;  %v1075_v16 = vpop.f32.mrb[11].mxu1 }
 0x102   : > { %v4764_v45 = vadd.f32 %v1075_v16, %v810_v24 }
 0x105   : > { %v3937_v46 = vpop.f32.mrb[12].mxu0 }
 0x106   : > { %v851_v47 = vpop.f32.mrb[13].mxu0  ;;  %v3979_v48 = vpop.f32.mrb[12].mxu1 }
 0x107   : > { %v3938_v49 = vpop.f32.mrb[14].mxu0  ;;  %v4766_v50 = vadd.f32 %v3979_v48, %v3929_v29  ;;  %v1087_v51 = vpop.f32.mrb[13].mxu1 }
 0x108   : > { %v854_v52 = vpop.f32.mrb[15].mxu0  ;;  %v4768_v10 = vadd.f32 %v1087_v51, %v822_v4  ;;  %v3980_v28 = vpop.f32.mrb[14].mxu1 }
 0x109   : > { %v4770_v53 = vadd.f32 %v3980_v28, %v3930_v32  ;;  %v1090_v54 = vpop.f32.mrb[15].mxu1 }
 0x10d   : > { %v3941_v38 = vpop.f32.mrb[16].mxu0 }
 0x10e   : > { %v866_v55 = vpop.f32.mrb[17].mxu0  ;;  %v3983_v56 = vpop.f32.mrb[16].mxu1 }
 0x10f   : > { %v3942_v57 = vpop.f32.mrb[18].mxu0  ;;  %v4772_v11 = vadd.f32 %v3983_v56, %v3933_v37  ;;  %v1102_v58 = vpop.f32.mrb[17].mxu1 }
 0x110   : > { %v869_v17 = vpop.f32.mrb[19].mxu0  ;;  %v3984_v60 = vpop.f32.mrb[18].mxu1 }
 0x111   : > { %v1104_v61 = vpop.f32.mrb[19].mxu1 }
 0x112   : > { %v4774_v62 = vadd.f32 %v1104_v61, %v839_v5 }
 0x115   : > { %v3945_v0 = vpop.f32.mrb[20].mxu0 }
 0x116   : > { %v881_v1 = vpop.f32.mrb[21].mxu0  ;;  %v3987_v2 = vpop.f32.mrb[20].mxu1 }
 0x117   : > { %v3946_v43 = vpop.f32.mrb[22].mxu0  ;;  %v1116_v3 = vpop.f32.mrb[21].mxu1 }
 0x118   : > { %v883_v6 = vpop.f32.mrb[23].mxu0  ;;  %v4776_v59 = vadd.f32 %v1116_v3, %v851_v47  ;;  %v3988_v36 = vpop.f32.mrb[22].mxu1 }
 0x119   : > { %v4778_v7 = vadd.f32 %v3988_v36, %v3938_v49  ;;  %v1119_v8 = vpop.f32.mrb[23].mxu1 }
 0x11a   : > { %v4780_v9 = vadd.f32 %v1119_v8, %v854_v52 }
 0x11d   : > { %v3949_v12 = vpop.f32.mrb[24].mxu0 }
 0x11e   : > { %v895_v13 = vpop.f32.mrb[25].mxu0  ;;  %v3991_v15 = vpop.f32.mrb[24].mxu1 }
 0x11f   : > { %v3950_v18 = vpop.f32.mrb[26].mxu0  ;;  %v4782_v19 = vadd.f32 %v3991_v15, %v3941_v38  ;;  %v1131_v21 = vpop.f32.mrb[25].mxu1 }
 0x120   : > { %v898_v63 = vpop.f32.mrb[27].mxu0  ;;  %v4784_v22 = vadd.f32 %v1131_v21, %v866_v55  ;;  %v3992_v24 = vpop.f32.mrb[26].mxu1 }
 0x121   : > { %v4786_v27 = vadd.f32 %v3992_v24, %v3942_v57  ;;  %v1134_v29 = vpop.f32.mrb[27].mxu1 }
 0x125   : > { %v3953_v4 = vpop.f32.mrb[28].mxu0 }
 0x126   : > { %v910_v32 = vpop.f32.mrb[29].mxu0  ;;  %v3995_v20 = vpop.f32.mrb[28].mxu1 }
 0x127   : > { %v3954_v33 = vpop.f32.mrb[30].mxu0  ;;  %v4788_v30 = vadd.f32 %v3995_v20, %v3945_v0  ;;  %v1146_v37 = vpop.f32.mrb[29].mxu1 }
 0x128   : > { %v913_v39 = vpop.f32.mrb[31].mxu0  ;;  %v3996_v40 = vpop.f32.mrb[30].mxu1 }
 0x129   : > { %v1148_v34 = vpop.f32.mrb[31].mxu1 }
 0x12a   : > { %v4790_v41 = vadd.f32 %v1148_v34, %v883_v6 }
 0x12d   : > { %v3957_v5 = vpop.f32.mrb[32].mxu0 }
 0x12e   : > { %v925_v26 = vpop.f32.mrb[33].mxu0  ;;  %v3999_v16 = vpop.f32.mrb[32].mxu1 }
 0x12f   : > { %v3958_v46 = vpop.f32.mrb[34].mxu0  ;;  %v1160_v47 = vpop.f32.mrb[33].mxu1 }
 0x130   : > { %v927_v48 = vpop.f32.mrb[35].mxu0  ;;  %v4792_v49 = vadd.f32 %v1160_v47, %v895_v13  ;;  %v4000_v51 = vpop.f32.mrb[34].mxu1  ;;  %v5409_v46 = vmov 1065369472   ;;  %v5410_v47 = vmov 0.0  }
 0x131   : > { %v4794_v52 = vadd.f32 %v4000_v51, %v3950_v18  ;;  %v1163_v28 = vpop.f32.mrb[35].mxu1  ;;  %3128 = vmatprep.mubr.bf16.mxu0 %v5409_v46  ;;  %4121 = vmatprep.subr.bf16.mxu1 %v5410_v47  ;;  %v4261_v51 = vld [vmem:[%s5403_s3 + $0x8] sm:$0xff]  }
 0x132   : > { %v4796_v54 = vadd.f32 %v1163_v28, %v898_v63 }
 0x135   : > { %v3961_v38 = vpop.f32.mrb[36].mxu0 }
 0x136   : > { %v939_v55 = vpop.f32.mrb[37].mxu0  ;;  %v4003_v56 = vpop.f32.mrb[36].mxu1 }
 0x137   : > { %v3962_v57 = vpop.f32.mrb[38].mxu0  ;;  %v4798_v58 = vadd.f32 %v4003_v56, %v3953_v4  ;;  %v1175_v17 = vpop.f32.mrb[37].mxu1 }
 0x138   : > { %v942_v60 = vpop.f32.mrb[39].mxu0  ;;  %v4800_v61 = vadd.f32 %v1175_v17, %v910_v32  ;;  %v4004_v0 = vpop.f32.mrb[38].mxu1 }
 0x139   : > { %v4802_v1 = vadd.f32 %v4004_v0, %v3954_v33  ;;  %v1178_v2 = vpop.f32.mrb[39].mxu1 }
 0x13d   : > { %v4025_v43 = vpop.f32.mrb[40].mxu0 }
 0x13e   : > { %v1532_v3 = vpop.f32.mrb[41].mxu0  ;;  %v4007_v6 = vpop.f32.mrb[40].mxu1  ;;  %v4262_v43 = vld [vmem:[%s5403_s3 + $0x10] sm:$0xff]  }
 0x13f   : > { %v4805_v36 = vadd.f32 %v1532_v3, %v4760_v42  ;;  %v4026_v8 = vpop.f32.mrb[42].mxu0  ;;  %v4807_v12 = vadd.f32 %v4007_v6, %v3957_v5  ;;  %v1190_v13 = vpop.f32.mrb[41].mxu1 }
 0x140   : > { %v4810_v15 = vadd.f32 %v4026_v8, %v4762_v44  ;;  %v1535_v18 = vpop.f32.mrb[43].mxu0  ;;  %v4008_v21 = vpop.f32.mrb[42].mxu1 }
 0x141   : > { %v4813_v63 = vadd.f32 %v1535_v18, %v4764_v45  ;;  %v1192_v24 = vpop.f32.mrb[43].mxu1 }
 0x142   : > { %v4815_v29 = vadd.f32 %v1192_v24, %v927_v48 }
 0x145   : > { %v4029_v4 = vpop.f32.mrb[44].mxu0 }
 0x146   : > { %v4818_v32 = vadd.f32 %v4029_v4, %v4766_v50  ;;  %v1547_v42 = vpop.f32.mrb[45].mxu0  ;;  %v4011_v20 = vpop.f32.mrb[44].mxu1  ;;  %v4260_v50 = vld [vmem:[%s5403_s3] sm:$0xff]  }
 0x147   : > { %v4821_v33 = vadd.f32 %v1547_v42, %v4768_v10  ;;  %v4030_v37 = vpop.f32.mrb[46].mxu0  ;;  %v1204_v44 = vpop.f32.mrb[45].mxu1  ;;  %4122 = vmatpush3.bf16.msra.mxu1 %v4260_v50 }
 0x148   : > { %v4824_v39 = vadd.f32 %v4030_v37, %v4770_v53  ;;  %v1550_v40 = vpop.f32.mrb[47].mxu0  ;;  %v4826_v45 = vadd.f32 %v1204_v44, %v939_v55  ;;  %v4012_v34 = vpop.f32.mrb[46].mxu1  ;;  %4123 = vmatprep.subr.bf16.mxu1 %v5410_v47 }
 0x149   : > { %v4828_v5 = vadd.f32 %v4012_v34, %v3962_v57  ;;  %v1207_v26 = vpop.f32.mrb[47].mxu1 }
 0x14a   : > { %v4830_v16 = vadd.f32 %v1207_v26, %v942_v60  ;;  %v4896_v26 = vld [vmem:[%s5402_s2] ss:$0 sm:$0xff] }
 0x14b   : > { %4124 = vmatpush3.bf16.msra.mxu1 %v4261_v51 }
 0x14c   : > { %4125 = vmatprep.subr.bf16.mxu1 %v5410_v47 }
 0x14d   : > { %v4033_v10 = vpop.f32.mrb[48].mxu0 }
 0x14e   : > { %v4838_v53 = vadd.f32 %v4033_v10, %v4772_v11  ;;  %v1562_v48 = vpop.f32.mrb[49].mxu0  ;;  %v4015_v28 = vpop.f32.mrb[48].mxu1 }
 0x14f   : > { %v4034_v38 = vpop.f32.mrb[50].mxu0  ;;  %v4845_v55 = vadd.f32 %v4015_v28, %v4750_v14  ;;  %v1219_v56 = vpop.f32.mrb[49].mxu1  ;;  %4126 = vmatpush3.bf16.msra.mxu1 %v4262_v43  ;;  %v4266_v28 = vld [vmem:[%s5403_s3 + $0x30] sm:$0xff]  }
 0x150   : > { %v1564_v57 = vpop.f32.mrb[51].mxu0  ;;  %v4848_v17 = vadd.f32 %v1219_v56, %v4752_v23  ;;  %v4016_v11 = vpop.f32.mrb[50].mxu1  ;;  %v4263_v23 = vld [vmem:[%s5403_s3 + $0x18] sm:$0xff]   ;;  %4127 = vmatprep.subr.bf16.mxu1 %v5410_v47 }
 0x151   : > { %v4851_v60 = vadd.f32 %v1564_v57, %v4774_v62  ;;  %v4854_v0 = vadd.f32 %v4016_v11, %v4754_v25  ;;  %v1222_v2 = vpop.f32.mrb[51].mxu1 }
 0x153   : > { %4128 = vmatpush3.bf16.msra.mxu1 %v4263_v23 }
 0x154   : > { %4129 = vmatprep.subr.bf16.mxu1 %v5410_v47 }
 0x155   : > { %v4037_v14 = vpop.f32.mrb[52].mxu0 }
 0x156   : > { %v1576_v3 = vpop.f32.mrb[53].mxu0  ;;  %v4019_v62 = vpop.f32.mrb[52].mxu1 }
 0x157   : > { %v4864_v6 = vadd.f32 %v1576_v3, %v4776_v59  ;;  %v4038_v25 = vpop.f32.mrb[54].mxu0  ;;  %v4868_v8 = vadd.f32 %v4019_v62, %v4756_v31  ;;  %v1234_v13 = vpop.f32.mrb[53].mxu1  ;;  %v4264_v59 = vld [vmem:[%s5403_s3 + $0x20] sm:$0xff]  }
 0x158   : > { %v4871_v18 = vadd.f32 %v4038_v25, %v4778_v7  ;;  %v1579_v21 = vpop.f32.mrb[55].mxu0  ;;  %v4020_v24 = vpop.f32.mrb[54].mxu1  ;;  %4130 = vmatpush3.bf16.msra.mxu1 %v4264_v59 }
 0x159   : > { %v4874_v4 = vadd.f32 %v1579_v21, %v4780_v9  ;;  %v1236_v42 = vpop.f32.mrb[55].mxu1  ;;  %v4265_v9 = vld [vmem:[%s5403_s3 + $0x28] sm:$0xff]   ;;  %4131 = vmatprep.subr.bf16.mxu1 %v5410_v47 }
 0x15a   : > { %v4880_v20 = vadd.f32 %v1236_v42, %v4758_v35 }
 0x15c   : > { %4132 = vmatpush3.bf16.msra.mxu1 %v4265_v9 }
 0x15d   : > { %v4041_v31 = vpop.f32.mrb[56].mxu0  ;;  %4133 = vmatprep.subr.bf16.mxu1 %v5410_v47 }
 0x15e   : > { %v4884_v7 = vadd.f32 %v4041_v31, %v4782_v19  ;;  %v1591_v37 = vpop.f32.mrb[57].mxu0  ;;  %v4075_v44 = vpop.f32.mrb[56].mxu1 }
 0x15f   : > { %v4890_v40 = vadd.f32 %v1591_v37, %v4784_v22  ;;  %v4042_v34 = vpop.f32.mrb[58].mxu0  ;;  %v2224_v35 = vpop.f32.mrb[57].mxu1 }
 0x160   : > { %v4899_v19 = vadd.f32 %v4042_v34, %v4786_v27  ;;  %v1594_v50 = vpop.f32.mrb[59].mxu0  ;;  %v2399_v10 = vadd.f32 %v2224_v35, %v4805_v36  ;;  %v4076_v48 = vpop.f32.mrb[58].mxu1  ;;  %4134 = vmatpush3.bf16.msra.mxu1 %v4266_v28 }
 0x161   : > { %v2401_v51 = vadd.f32 %v4076_v48, %v4810_v15  ;;  %v2227_v22 = vpop.f32.mrb[59].mxu1  ;;  %4135 = vmatprep.subr.bf16.mxu1 %v5410_v47  ;;  %v3679_v47 = vld [vmem:[%s4690_s22 + $0x50] sm:$0x1]  ;;  %v4269_v48 = vld [vmem:[%s5405_s5 + $0x8] sm:$0xff]  }
 0x162   : > { %v2438_v38 = vadd.f32 %v4896_v26, %v2399_v10  ;;  %v2400_v56 = vadd.f32 %v2227_v22, %v4813_v63 }
 0x163   : > { %v2440_v27 = vadd.f32 %v4896_v26, %v2401_v51  ;;  %v3651_v51 = vld [vmem:[%s4690_s22 + $0xc] sm:$0xf] }
 0x164   : > { %v4910_v57 = vmax.f32 %v2438_v38, 0.0  ;;  %v2439_v36 = vadd.f32 %v4896_v26, %v2400_v56 }
 0x165   : > { %v4045_v11 = vpop.f32.mrb[60].mxu0  ;;  %v4913_v15 = vmax.f32 %v2440_v27, 0.0  ;;  %v3656_v27 = vld [vmem:[%s4690_s22 + $0x18] sm:$0xf] }
 0x166   : > { %v4916_v2 = vadd.f32 %v4045_v11, %v4788_v30  ;;  %v1606_v43 = vpop.f32.mrb[61].mxu0  ;;  %v3749_v14 = vpack.c.bf16 %v4910_v57, %v4910_v57  ;;  %v4920_v63 = vmax.f32 %v2439_v36, 0.0  ;;  %v4079_v3 = vpop.f32.mrb[60].mxu1 }
 0x167   : > { %v4046_v23 = vpop.f32.mrb[62].mxu0  ;;  %v3751_v62 = vpack.c.bf16 %v4913_v15, %v4913_v15  ;;  %v2403_v30 = vadd.f32 %v4079_v3, %v4818_v32  ;;  %v2239_v25 = vpop.f32.mrb[61].mxu1 }
 0x168   : > { %v1608_v13 = vpop.f32.mrb[63].mxu0  ;;  %v2659_v21 = vshrl.u32 %v3749_v14, 16  ;;  %v2502_v24 = vpack.c.bf16 %v4920_v63, %v4910_v57  ;;  %v3750_v42 = vpack.c.bf16 %v4920_v63, %v4920_v63  ;;  %v4080_v59 = vpop.f32.mrb[62].mxu1  ;;  %v2662_v31 = vshll.u32 %v3749_v14, 16 }
 0x169   : > { %v2676_v37 = vshrl.u32 %v3751_v62, 16  ;;  %v2442_v9 = vadd.f32 %v4896_v26, %v2403_v30  ;;  %v2402_v44 = vadd.f32 %v2239_v25, %v4821_v33  ;;  %v2242_v32 = vpop.f32.mrb[63].mxu1  ;;  %v2679_v35 = vshll.u32 %v3751_v62, 16  ;;  %v3654_v62 = vld [vmem:[%s4690_s22 + $0x14] sm:$0x1] }
 0x16a   : > { %v2661_v34 = vrot.slane %v2659_v21, 7  ;;  %v2667_v50 = vshrl.u32 %v3750_v42, 16  ;;  %v2404_v10 = vadd.f32 %v4080_v59, %v4824_v39  ;;  %v4946_v38 = vadd.f32 %v1608_v13, %v4790_v41  ;;  %v4268_v39 = vld [vmem:[%s5405_s5] sm:$0xff]  }
 0x16b   : > { %v4940_v22 = vrot.slane %v2676_v37, 7  ;;  %v4942_v28 = vmax.f32 %v2442_v9, 0.0  ;;  %v2441_v33 = vadd.f32 %v4896_v26, %v2402_v44  ;;  %v2670_v11 = vshll.u32 %v3750_v42, 16 }
 0x16c   : > { %v2664_v56 = vor.u32 %v2662_v31, %v2661_v34  ;;  %v2669_v36 = vrot.slane %v2667_v50, 7  ;;  %v2443_v43 = vadd.f32 %v4896_v26, %v2404_v10  ;;  %v2665_v3 = vrot.slane %v2661_v34, 4 }
 0x16d   : > { %v4049_v14 = vpop.f32.mrb[64].mxu0  ;;  %v2681_v23 = vor.u32 %v2679_v35, %v4940_v22  ;;  %v3753_v30 = vpack.c.bf16 %v4942_v28, %v4942_v28  ;;  %v4966_v25 = vmax.f32 %v2441_v33, 0.0 }
 0x16e   : > { %v1620_v13 = vpop.f32.mrb[65].mxu0  ;;  %v2983_v21 = vsel %vm4935_vm8, %v2664_v56, %v3651_v51  ;;  %v2672_v42 = vor.u32 %v2670_v11, %v2669_v36  ;;  %v2674_v59 = vrot.slane %v2669_v36, 4  ;;  %v4970_v31 = vmax.f32 %v2443_v43, 0.0  ;;  %v4083_v37 = vpop.f32.mrb[64].mxu1 }
 0x16f   : > { %v4050_v9 = vpop.f32.mrb[66].mxu0  ;;  %3652 = vst [vmem:[%s4690_s22 + $0xc] sm:$0xf] %v2983_v21  ;;  %v2992_v44 = vsel %vm4935_vm8, %v2681_v23, %v3656_v27  ;;  %v2693_v32 = vshrl.u32 %v3753_v30, 16  ;;  %v2696_v34 = vshll.u32 %v3753_v30, 16  ;;  %v2503_v35 = vpack.c.bf16 %v4966_v25, %v4913_v15  ;;  %v2254_v50 = vpop.f32.mrb[65].mxu1 }
 0x170   : > { %v1623_v10 = vpop.f32.mrb[67].mxu0  ;;  %3657 = vst [vmem:[%s4690_s22 + $0x18] sm:$0xf] %v2992_v44  ;;  %v2673_v51 = vsel %vm4951_vm9, %v2665_v3, %v2672_v42  ;;  %v2989_v33 = vsel %vm4959_vm10, %v2674_v59, %v3654_v62  ;;  %v3752_v56 = vpack.c.bf16 %v4966_v25, %v4966_v25  ;;  %v2504_v27 = vpack.c.bf16 %v4970_v31, %v4942_v28  ;;  %v4084_v36 = vpop.f32.mrb[66].mxu1  ;;  %v3661_v62 = vld [vmem:[%s4690_s22 + $0x24] sm:$0xf] }
 0x171   : > { %3653 = vst [vmem:[%s4690_s22 + $0x10] sm:$0xf] %v2673_v51  ;;  %3655 = vst [vmem:[%s4690_s22 + $0x14] sm:$0x1] %v2989_v33  ;;  %v2695_v11 = vrot.slane %v2693_v32, 7  ;;  %v3754_v43 = vpack.c.bf16 %v4970_v31, %v4970_v31  ;;  %v2406_v14 = vadd.f32 %v4083_v37, %v4838_v53  ;;  %v4992_v3 = vadd.f32 %v1620_v13, %v4792_v49  ;;  %v2256_v23 = vpop.f32.mrb[67].mxu1 }
 0x172   : > { %v2684_v30 = vshrl.u32 %v3752_v56, 16  ;;  %v4996_v21 = vadd.f32 %v4050_v9, %v4794_v52  ;;  %v4999_v42 = vadd.f32 %v1623_v10, %v4796_v54  ;;  %v2682_v59 = vrot.slane %v4940_v22, 4  ;;  %v3659_v9 = vld [vmem:[%s4690_s22 + $0x20] sm:$0x1]  ;;  %v3664_v36 = vld [vmem:[%s4690_s22 + $0x2c] sm:$0x1] }
 0x173   : > { %v2698_v44 = vor.u32 %v2696_v34, %v2695_v11  ;;  %v2687_v32 = vshll.u32 %v3752_v56, 16  ;;  %v2701_v53 = vshrl.u32 %v3754_v43, 16  ;;  %v2699_v37 = vrot.slane %v2695_v11, 4 }
 0x174   : > { %v2686_v49 = vrot.slane %v2684_v30, 7  ;;  %v2445_v13 = vadd.f32 %v4896_v26, %v2406_v14  ;;  %v2405_v50 = vadd.f32 %v2256_v23, %v4851_v60  ;;  %v2704_v10 = vshll.u32 %v3754_v43, 16 }
 0x175   : > { %v4053_v51 = vpop.f32.mrb[68].mxu0  ;;  %v2999_v52 = vsel %vm4935_vm8, %v2698_v44, %v3661_v62  ;;  %v2703_v54 = vrot.slane %v2701_v53, 7 }
 0x176   : > { %v5008_v33 = vadd.f32 %v4053_v51, %v4798_v58  ;;  %v1635_v22 = vpop.f32.mrb[69].mxu0  ;;  %3662 = vst [vmem:[%s4690_s22 + $0x24] sm:$0xf] %v2999_v52  ;;  %v2689_v34 = vor.u32 %v2687_v32, %v2686_v49  ;;  %v2691_v56 = vrot.slane %v2686_v49, 4  ;;  %v5012_v11 = vmax.f32 %v2445_v13, 0.0  ;;  %v4087_v14 = vpop.f32.mrb[68].mxu1 }
 0x177   : > { %v2444_v60 = vadd.f32 %v4896_v26, %v2405_v50  ;;  %v4054_v23 = vpop.f32.mrb[70].mxu0  ;;  %v2706_v62 = vor.u32 %v2704_v10, %v2703_v54  ;;  %v2708_v30 = vrot.slane %v2703_v54, 4  ;;  %v5016_v43 = vadd.f32 %v1635_v22, %v4800_v61  ;;  %v2268_v58 = vpop.f32.mrb[69].mxu1  ;;  %v3669_v14 = vld [vmem:[%s4690_s22 + $0x38] sm:$0x1] }
 0x178   : > { %v5019_v44 = vadd.f32 %v4054_v23, %v4802_v1  ;;  %v1638_v32 = vpop.f32.mrb[71].mxu0  ;;  %v2690_v53 = vsel %vm4951_vm9, %v2682_v59, %v2689_v34  ;;  %v2996_v49 = vsel %vm4959_vm10, %v2691_v56, %v3659_v9  ;;  %v3756_v13 = vpack.c.bf16 %v5012_v11, %v5012_v11  ;;  %v4088_v61 = vpop.f32.mrb[70].mxu1 }
 0x179   : > { %v5027_v50 = vmax.f32 %v2444_v60, 0.0  ;;  %3658 = vst [vmem:[%s4690_s22 + $0x1c] sm:$0xf] %v2690_v53  ;;  %3660 = vst [vmem:[%s4690_s22 + $0x20] sm:$0x1] %v2996_v49  ;;  %v2707_v51 = vsel %vm4951_vm9, %v2699_v37, %v2706_v62  ;;  %v3003_v1 = vsel %vm4959_vm10, %v2708_v30, %v3664_v36  ;;  %v2407_v59 = vadd.f32 %v2268_v58, %v4864_v6  ;;  %v2271_v9 = vpop.f32.mrb[71].mxu1 }
 0x17a   : > { %v2409_v52 = vadd.f32 %v4088_v61, %v4871_v18  ;;  %3663 = vst [vmem:[%s4690_s22 + $0x28] sm:$0xf] %v2707_v51  ;;  %3665 = vst [vmem:[%s4690_s22 + $0x2c] sm:$0x1] %v3003_v1  ;;  %v2718_v54 = vshrl.u32 %v3756_v13, 16  ;;  %v2408_v56 = vadd.f32 %v2271_v9, %v4874_v4  ;;  %v2721_v6 = vshll.u32 %v3756_v13, 16 }
 0x17b   : > { %v3755_v22 = vpack.c.bf16 %v5027_v50, %v5027_v50  ;;  %v2446_v37 = vadd.f32 %v4896_v26, %v2407_v59  ;;  %v3666_v1 = vld [vmem:[%s4690_s22 + $0x30] sm:$0xf] }
 0x17c   : > { %v2448_v34 = vadd.f32 %v4896_v26, %v2409_v52  ;;  %v2720_v36 = vrot.slane %v2718_v54, 7  ;;  %v2447_v30 = vadd.f32 %v4896_v26, %v2408_v56 }
 0x17d   : > { %v2710_v18 = vshrl.u32 %v3755_v22, 16  ;;  %v4057_v60 = vpop.f32.mrb[72].mxu0  ;;  %v5047_v23 = vmax.f32 %v2446_v37, 0.0  ;;  %v2713_v4 = vshll.u32 %v3755_v22, 16 }
 0x17e   : > { %v5049_v62 = vmax.f32 %v2448_v34, 0.0  ;;  %v5053_v58 = vadd.f32 %v4057_v60, %v4807_v12  ;;  %v1650_v32 = vpop.f32.mrb[73].mxu0  ;;  %v2723_v53 = vor.u32 %v2721_v6, %v2720_v36  ;;  %v2725_v49 = vrot.slane %v2720_v36, 4  ;;  %v4091_v51 = vpop.f32.mrb[72].mxu1 }
 0x17f   : > { %v2712_v61 = vrot.slane %v2710_v18, 7  ;;  %v4058_v13 = vpop.f32.mrb[74].mxu0  ;;  %v3757_v59 = vpack.c.bf16 %v5047_v23, %v5047_v23  ;;  %v5060_v9 = vmax.f32 %v2447_v30, 0.0  ;;  %v2411_v12 = vadd.f32 %v4091_v51, %v4884_v7  ;;  %v2283_v54 = vpop.f32.mrb[73].mxu1 }
 0x180   : > { %v3759_v52 = vpack.c.bf16 %v5049_v62, %v5049_v62  ;;  %v1652_v37 = vpop.f32.mrb[75].mxu0  ;;  %v3010_v34 = vsel %vm4959_vm10, %v2725_v49, %v3669_v14  ;;  %v2410_v36 = vadd.f32 %v2283_v54, %v4890_v40  ;;  %v4092_v6 = vpop.f32.mrb[74].mxu1 }
 0x181   : > { %v2715_v22 = vor.u32 %v2713_v4, %v2712_v61  ;;  %v2716_v56 = vrot.slane %v2712_v61, 4  ;;  %3670 = vst [vmem:[%s4690_s22 + $0x38] sm:$0x1] %v3010_v34  ;;  %v2727_v18 = vshrl.u32 %v3757_v59, 16  ;;  %v2730_v60 = vshll.u32 %v3757_v59, 16  ;;  %v2286_v7 = vpop.f32.mrb[75].mxu1 }
 0x182   : > { %v2744_v30 = vshrl.u32 %v3759_v52, 16  ;;  %v2747_v32 = vshll.u32 %v3759_v52, 16  ;;  %v3758_v40 = vpack.c.bf16 %v5060_v9, %v5060_v9  ;;  %v2450_v13 = vadd.f32 %v4896_v26, %v2411_v12  ;;  %v3671_v52 = vld [vmem:[%s4690_s22 + $0x3c] sm:$0xf] }
 0x183   : > { %v2724_v51 = vsel %vm4951_vm9, %v2716_v56, %v2723_v53  ;;  %v3006_v14 = vsel %vm4935_vm8, %v2715_v22, %v3666_v1  ;;  %v2729_v61 = vrot.slane %v2727_v18, 7  ;;  %v2449_v59 = vadd.f32 %v4896_v26, %v2410_v36  ;;  %v3676_v53 = vld [vmem:[%s4690_s22 + $0x48] sm:$0xf] }
 0x184   : > { %3667 = vst [vmem:[%s4690_s22 + $0x30] sm:$0xf] %v3006_v14  ;;  %3668 = vst [vmem:[%s4690_s22 + $0x34] sm:$0xf] %v2724_v51  ;;  %v5077_v4 = vrot.slane %v2744_v30, 7  ;;  %v2735_v54 = vshrl.u32 %v3758_v40, 16  ;;  %v2412_v1 = vadd.f32 %v4092_v6, %v4899_v19  ;;  %v5085_v34 = vadd.f32 %v1652_v37, %v4815_v29 }
 0x185   : > { %v4061_v22 = vpop.f32.mrb[76].mxu0  ;;  %v2732_v56 = vor.u32 %v2730_v60, %v2729_v61  ;;  %v2733_v7 = vrot.slane %v2729_v61, 4  ;;  %v2738_v30 = vshll.u32 %v3758_v40, 16  ;;  %v5088_v36 = vmax.f32 %v2450_v13, 0.0  ;;  %v3674_v60 = vld [vmem:[%s4690_s22 + $0x44] sm:$0x1] }
 0x186   : > { %v2749_v18 = vor.u32 %v2747_v32, %v5077_v4  ;;  %v1664_v12 = vpop.f32.mrb[77].mxu0  ;;  %v2737_v51 = vrot.slane %v2735_v54, 7  ;;  %v5090_v14 = vmax.f32 %v2449_v59, 0.0  ;;  %v2451_v19 = vadd.f32 %v4896_v26, %v2412_v1  ;;  %v4095_v6 = vpop.f32.mrb[76].mxu1 }
 0x187   : > { %v4062_v46 = vpop.f32.mrb[78].mxu0  ;;  %v3013_v29 = vsel %vm4935_vm8, %v2732_v56, %v3671_v52  ;;  %v2414_v32 = vadd.f32 %v4095_v6, %v4916_v2  ;;  %v5100_v40 = vadd.f32 %v1664_v12, %v4826_v45  ;;  %v2298_v61 = vpop.f32.mrb[77].mxu1  ;;  %v3761_v52 = vpack.c.bf16 %v5088_v36, %v5088_v36 }
 0x188   : > { %v3020_v37 = vsel %vm4935_vm8, %v2749_v18, %v3676_v53  ;;  %v1667_v13 = vpop.f32.mrb[79].mxu0  ;;  %3672 = vst [vmem:[%s4690_s22 + $0x3c] sm:$0xf] %v3013_v29  ;;  %v2740_v59 = vor.u32 %v2738_v30, %v2737_v51  ;;  %v2742_v54 = vrot.slane %v2737_v51, 4  ;;  %v4096_v1 = vpop.f32.mrb[78].mxu1  ;;  %v3760_v2 = vpack.c.bf16 %v5090_v14, %v5090_v14 }
 0x189   : > { %3677 = vst [vmem:[%s4690_s22 + $0x48] sm:$0xf] %v3020_v37  ;;  %v5110_v45 = vmax.f32 %v2451_v19, 0.0  ;;  %v2453_v22 = vadd.f32 %v4896_v26, %v2414_v32  ;;  %v5114_v56 = vadd.f32 %v4062_v46, %v4828_v5  ;;  %v2300_v18 = vpop.f32.mrb[79].mxu1  ;;  %v2750_v30 = vrot.slane %v5077_v4, 4 }
 0x18a   : > { %v2741_v12 = vsel %vm4951_vm9, %v2733_v7, %v2740_v59  ;;  %v3017_v51 = vsel %vm4959_vm10, %v2742_v54, %v3674_v60  ;;  %v2761_v6 = vshrl.u32 %v3761_v52, 16  ;;  %v2764_v19 = vshll.u32 %v3761_v52, 16  ;;  %v3681_v61 = vld [vmem:[%s4690_s22 + $0x54] sm:$0xf]  ;;  %v3684_v53 = vld [vmem:[%s4690_s22 + $0x5c] sm:$0x1] }
 0x18b   : > { %3673 = vst [vmem:[%s4690_s22 + $0x40] sm:$0xf] %v2741_v12  ;;  %3675 = vst [vmem:[%s4690_s22 + $0x44] sm:$0x1] %v3017_v51  ;;  %v2752_v29 = vshrl.u32 %v3760_v2, 16  ;;  %v3762_v46 = vpack.c.bf16 %v5110_v45, %v5110_v45  ;;  %v5127_v4 = vmax.f32 %v2453_v22, 0.0  ;;  %v5130_v7 = vadd.f32 %v1667_v13, %v4830_v16 }
 0x18c   : > { %v2763_v37 = vrot.slane %v2761_v6, 7  ;;  %v2413_v60 = vadd.f32 %v2300_v18, %v4946_v38  ;;  %v2755_v54 = vshll.u32 %v3760_v2, 16 }
 0x18d   : > { %v4065_v32 = vpop.f32.mrb[80].mxu0  ;;  %v2754_v59 = vrot.slane %v2752_v29, 7  ;;  %v2769_v52 = vshrl.u32 %v3762_v46, 16  ;;  %v2772_v6 = vshll.u32 %v3762_v46, 16  ;;  %v3764_v22 = vpack.c.bf16 %v5127_v4, %v5127_v4 }
 0x18e   : > { %v5135_v1 = vadd.f32 %v4065_v32, %v4845_v55  ;;  %v1679_v12 = vpop.f32.mrb[81].mxu0  ;;  %v2766_v51 = vor.u32 %v2764_v19, %v2763_v37  ;;  %v2452_v16 = vadd.f32 %v4896_v26, %v2413_v60  ;;  %v4099_v38 = vpop.f32.mrb[80].mxu1  ;;  %v2767_v5 = vrot.slane %v2763_v37, 4 }
 0x18f   : > { %v4066_v13 = vpop.f32.mrb[82].mxu0  ;;  %v2757_v18 = vor.u32 %v2755_v54, %v2754_v59  ;;  %v2759_v29 = vrot.slane %v2754_v59, 4  ;;  %v2771_v2 = vrot.slane %v2769_v52, 7  ;;  %v5142_v55 = vadd.f32 %v1679_v12, %v4848_v17  ;;  %v2312_v32 = vpop.f32.mrb[81].mxu1 }
 0x190   : > { %v1682_v19 = vpop.f32.mrb[83].mxu0  ;;  %v3027_v46 = vsel %vm4935_vm8, %v2766_v51, %v3681_v61  ;;  %v2786_v49 = vshrl.u32 %v3764_v22, 16  ;;  %v5147_v10 = vmax.f32 %v2452_v16, 0.0  ;;  %v4100_v60 = vpop.f32.mrb[82].mxu1  ;;  %v2415_v16 = vadd.f32 %v2312_v32, %v4992_v3 }
 0x191   : > { %3682 = vst [vmem:[%s4690_s22 + $0x54] sm:$0xf] %v3027_v46  ;;  %v2758_v59 = vsel %vm4951_vm9, %v2750_v30, %v2757_v18  ;;  %v3024_v17 = vsel %vm4959_vm10, %v2759_v29, %v3679_v47  ;;  %v2774_v54 = vor.u32 %v2772_v6, %v2771_v2  ;;  %v2776_v37 = vrot.slane %v2771_v2, 4  ;;  %v2315_v52 = vpop.f32.mrb[83].mxu1  ;;  %v3689_v6 = vld [vmem:[%s4690_s22 + $0x68] sm:$0x1] }
 0x192   : > { %3678 = vst [vmem:[%s4690_s22 + $0x4c] sm:$0xf] %v2758_v59  ;;  %3680 = vst [vmem:[%s4690_s22 + $0x50] sm:$0x1] %v3024_v17  ;;  %v2788_v61 = vrot.slane %v2786_v49, 7  ;;  %v2509_v12 = vpack.c.bf16 %v5127_v4, %v5147_v10  ;;  %v3763_v51 = vpack.c.bf16 %v5147_v10, %v5147_v10  ;;  %v5167_v38 = vadd.f32 %v4066_v13, %v4854_v0  ;;  %v4267_v10 = vld [vmem:[%s5403_s3 + $0x38] sm:$0xff]  }
 0x193   : > { %v2775_v30 = vsel %vm4951_vm9, %v2767_v5, %v2774_v54  ;;  %v3031_v47 = vsel %vm4959_vm10, %v2776_v37, %v3684_v53  ;;  %v2417_v49 = vadd.f32 %v4100_v60, %v4996_v21  ;;  %v2789_v18 = vshll.u32 %v3764_v22, 16  ;;  %v3686_v17 = vld [vmem:[%s4690_s22 + $0x60] sm:$0xf]  ;;  %4136 = vmatpush3.bf16.msra.mxu1 %v4267_v10  ;;  %v4270_v4 = vld [vmem:[%s5405_s5 + $0x10] sm:$0xff]  }
 0x194   : > { %3683 = vst [vmem:[%s4690_s22 + $0x58] sm:$0xf] %v2775_v30  ;;  %3685 = vst [vmem:[%s4690_s22 + $0x5c] sm:$0x1] %v3031_v47  ;;  %v2793_v29 = vrot.slane %v2788_v61, 4  ;;  %v2778_v2 = vshrl.u32 %v3763_v51, 16  ;;  %v2454_v32 = vadd.f32 %v4896_v26, %v2415_v16  ;;  %v2416_v53 = vadd.f32 %v2315_v52, %v4999_v42 }
 0x195   : > { %v4069_v3 = vpop.f32.mrb[84].mxu0  ;;  %v2456_v5 = vadd.f32 %v4896_v26, %v2417_v49  ;;  %v2791_v13 = vor.u32 %v2789_v18, %v2788_v61  ;;  %v2781_v22 = vshll.u32 %v3763_v51, 16 }
 0x196   : > { %v5176_v19 = vadd.f32 %v4069_v3, %v4868_v8  ;;  %v1694_v0 = vpop.f32.mrb[85].mxu0  ;;  %v3038_v21 = vsel %vm4959_vm10, %v2793_v29, %v3689_v6  ;;  %v2780_v46 = vrot.slane %v2778_v2, 7  ;;  %v4103_v60 = vpop.f32.mrb[84].mxu1  ;;  %v2486_v54 = vmax.f32 %v2454_v32, 0.0 }
 0x197   : > { %v4070_v59 = vpop.f32.mrb[86].mxu0  ;;  %3690 = vst [vmem:[%s4690_s22 + $0x68] sm:$0x1] %v3038_v21  ;;  %v5182_v37 = vmax.f32 %v2456_v5, 0.0  ;;  %v2455_v16 = vadd.f32 %v4896_v26, %v2416_v53  ;;  %v2419_v42 = vadd.f32 %v4103_v60, %v5008_v33  ;;  %v2327_v8 = vpop.f32.mrb[85].mxu1 }
 0x198   : > { %v1696_v52 = vpop.f32.mrb[87].mxu0  ;;  %v2783_v61 = vor.u32 %v2781_v22, %v2780_v46  ;;  %v2784_v30 = vrot.slane %v2780_v46, 4  ;;  %v2418_v47 = vadd.f32 %v2327_v8, %v5016_v43  ;;  %v4104_v51 = vpop.f32.mrb[86].mxu1  ;;  %v3765_v49 = vpack.c.bf16 %v2486_v54, %v2486_v54  ;;  %v3696_v8 = vld [vmem:[%s4690_s22 + $0x78] sm:$0xf] }
 0x199   : > { %v5188_v6 = vadd.f32 %v1696_v52, %v4880_v20  ;;  %v3767_v18 = vpack.c.bf16 %v5182_v37, %v5182_v37  ;;  %v2487_v29 = vmax.f32 %v2455_v16, 0.0  ;;  %v2458_v2 = vadd.f32 %v4896_v26, %v2419_v42  ;;  %v2330_v33 = vpop.f32.mrb[87].mxu1  ;;  %v3691_v42 = vld [vmem:[%s4690_s22 + $0x6c] sm:$0xf] }
 0x19a   : > { %v2792_v3 = vsel %vm4951_vm9, %v2784_v30, %v2791_v13  ;;  %v3034_v32 = vsel %vm4935_vm8, %v2783_v61, %v3686_v17  ;;  %v2457_v43 = vadd.f32 %v4896_v26, %v2418_v47  ;;  %v2420_v20 = vadd.f32 %v4104_v51, %v5019_v44 }
 0x19b   : > { %3687 = vst [vmem:[%s4690_s22 + $0x60] sm:$0xf] %v3034_v32  ;;  %3688 = vst [vmem:[%s4690_s22 + $0x64] sm:$0xf] %v2792_v3  ;;  %v2795_v5 = vshrl.u32 %v3765_v49, 16  ;;  %v2798_v53 = vshll.u32 %v3765_v49, 16  ;;  %v3766_v46 = vpack.c.bf16 %v2487_v29, %v2487_v29  ;;  %v2510_v16 = vpack.c.bf16 %v2487_v29, %v2486_v54 }
 0x19c   : > { %v2812_v0 = vshrl.u32 %v3767_v18, 16  ;;  %v2815_v21 = vshll.u32 %v3767_v18, 16  ;;  %v5201_v22 = vmax.f32 %v2458_v2, 0.0  ;;  %v2489_v60 = vmax.f32 %v2457_v43, 0.0 }
 0x19d   : > { %v2797_v13 = vrot.slane %v2795_v5, 7  ;;  %v2459_v17 = vadd.f32 %v4896_v26, %v2420_v20  ;;  %v2803_v52 = vshrl.u32 %v3766_v46, 16  ;;  %v2806_v18 = vshll.u32 %v3766_v46, 16  ;;  %3881 = vmatprep.subr.bf16.mxu0 %v2510_v16  ;;  %v3694_v5 = vld [vmem:[%s4690_s22 + $0x74] sm:$0x1] }
 0x19e   : > { %v2814_v59 = vrot.slane %v2812_v0, 7  ;;  %v3769_v44 = vpack.c.bf16 %v5201_v22, %v5201_v22  ;;  %v3768_v61 = vpack.c.bf16 %v2489_v60, %v2489_v60  ;;  %v4107_v30 = vpop.f32.mrb[88].mxu1  ;;  %3882 = vmatpush3.bf16.msra.mxu0 %v2502_v24  ;;  %v3701_v24 = vld [vmem:[%s4690_s22 + $0x84] sm:$0xf] }
 0x19f   : > { %v2800_v47 = vor.u32 %v2798_v53, %v2797_v13  ;;  %v2801_v51 = vrot.slane %v2797_v13, 4  ;;  %v2342_v2 = vpop.f32.mrb[89].mxu1  ;;  %v2805_v33 = vrot.slane %v2803_v52, 7  ;;  %v2491_v0 = vmax.f32 %v2459_v17, 0.0 }
 0x1a0   : > { %v2817_v49 = vor.u32 %v2815_v21, %v2814_v59  ;;  %v2829_v3 = vshrl.u32 %v3769_v44, 16  ;;  %v2832_v54 = vshll.u32 %v3769_v44, 16  ;;  %v2820_v29 = vshrl.u32 %v3768_v61, 16  ;;  %v4108_v32 = vpop.f32.mrb[90].mxu1 }
 0x1a1   : > { %v3041_v43 = vsel %vm4935_vm8, %v2800_v47, %v3691_v42  ;;  %v2823_v53 = vshll.u32 %v3768_v61, 16  ;;  %v2344_v21 = vpop.f32.mrb[91].mxu1  ;;  %v2808_v46 = vor.u32 %v2806_v18, %v2805_v33  ;;  %v2810_v13 = vrot.slane %v2805_v33, 4  ;;  %v3699_v47 = vld [vmem:[%s4690_s22 + $0x80] sm:$0x1] }
 0x1a2   : > { %v3048_v20 = vsel %vm4935_vm8, %v2817_v49, %v3696_v8  ;;  %3692 = vst [vmem:[%s4690_s22 + $0x6c] sm:$0xf] %v3041_v43  ;;  %v2831_v57 = vrot.slane %v2829_v3, 7  ;;  %v2822_v63 = vrot.slane %v2820_v29, 7  ;;  %v3770_v16 = vpack.c.bf16 %v2491_v0, %v2491_v0  ;;  %v3704_v32 = vld [vmem:[%s4690_s22 + $0x8c] sm:$0x1] }
 0x1a3   : > { %3697 = vst [vmem:[%s4690_s22 + $0x78] sm:$0xf] %v3048_v20  ;;  %v2422_v42 = vadd.f32 %v4107_v30, %v5053_v58  ;;  %v2511_v52 = vpack.c.bf16 %v2489_v60, %v5182_v37  ;;  %v2421_v8 = vadd.f32 %v2344_v21, %v5085_v34  ;;  %v2809_v17 = vsel %vm4951_vm9, %v2801_v51, %v2808_v46 }
 0x1a4   : > { %v3045_v44 = vsel %vm4959_vm10, %v2810_v13, %v3694_v5  ;;  %v2834_v61 = vor.u32 %v2832_v54, %v2831_v57  ;;  %v2818_v49 = vrot.slane %v2814_v59, 4  ;;  %3693 = vst [vmem:[%s4690_s22 + $0x70] sm:$0xf] %v2809_v17  ;;  %v2825_v18 = vor.u32 %v2823_v53, %v2822_v63 }
 0x1a5   : > { %3695 = vst [vmem:[%s4690_s22 + $0x74] sm:$0x1] %v3045_v44  ;;  %v2827_v2 = vrot.slane %v2822_v63, 4  ;;  %v2837_v58 = vshrl.u32 %v3770_v16, 16  ;;  %3883 = vmatprep.subr.bf16.mxu0 %v2511_v52  ;;  %v2461_v37 = vadd.f32 %v4896_v26, %v2422_v42  ;;  %v2460_v60 = vadd.f32 %v4896_v26, %v2421_v8 }
 0x1a6   : > { %v3055_v34 = vsel %vm4935_vm8, %v2834_v61, %v3701_v24  ;;  %3884 = vmatpush3.bf16.msra.mxu0 %v2503_v35  ;;  %v2512_v59 = vpack.c.bf16 %v2491_v0, %v5201_v22  ;;  %v4111_v30 = vpop.f32.mrb[92].mxu1  ;;  %v2826_v51 = vsel %vm4951_vm9, %v2818_v49, %v2825_v18  ;;  %v2840_v54 = vshll.u32 %v3770_v16, 16  ;;  %v3706_v49 = vld [vmem:[%s4690_s22 + $0x90] sm:$0xf] }
 0x1a7   : > { %3702 = vst [vmem:[%s4690_s22 + $0x84] sm:$0xf] %v3055_v34  ;;  %v3052_v33 = vsel %vm4959_vm10, %v2827_v2, %v3699_v47  ;;  %v2839_v3 = vrot.slane %v2837_v58, 7  ;;  %v2356_v29 = vpop.f32.mrb[93].mxu1  ;;  %3698 = vst [vmem:[%s4690_s22 + $0x7c] sm:$0xf] %v2826_v51  ;;  %v5418_v44 = vpack.c.bf16 %v5012_v11, %v5027_v50 }
 0x1a8   : > { %3700 = vst [vmem:[%s4690_s22 + $0x80] sm:$0x1] %v3052_v33  ;;  %v2493_v43 = vmax.f32 %v2461_v37, 0.0  ;;  %v2492_v20 = vmax.f32 %v2460_v60, 0.0  ;;  %3885 = vmatprep.subr.bf16.mxu0 %v2512_v59  ;;  %v2423_v15 = vadd.f32 %v2356_v29, %v5100_v40  ;;  %v4112_v25 = vpop.f32.mrb[94].mxu1  ;;  %v2835_v35 = vrot.slane %v2831_v57, 4 }
 0x1a9   : > { %v2842_v22 = vor.u32 %v2840_v54, %v2839_v3  ;;  %v2844_v5 = vrot.slane %v2839_v3, 4  ;;  %v2425_v53 = vadd.f32 %v4112_v25, %v5114_v56  ;;  %v2359_v0 = vpop.f32.mrb[95].mxu1  ;;  %v3709_v47 = vld [vmem:[%s4690_s22 + $0x98] sm:$0x1] }
 0x1aa   : > { %v3772_v21 = vpack.c.bf16 %v2493_v43, %v2493_v43  ;;  %v3771_v46 = vpack.c.bf16 %v2492_v20, %v2492_v20  ;;  %3886 = vmatpush3.bf16.msra.mxu0 %v2504_v27  ;;  %v2462_v13 = vadd.f32 %v4896_v26, %v2423_v15  ;;  %v2424_v63 = vadd.f32 %v2359_v0, %v5130_v7 }
 0x1ab   : > { %v2843_v40 = vsel %vm4951_vm9, %v2835_v35, %v2842_v22  ;;  %v3059_v57 = vsel %vm4959_vm10, %v2844_v5, %v3704_v32  ;;  %v2464_v24 = vadd.f32 %v4896_v26, %v2425_v53  ;;  %v2513_v56 = vpack.c.bf16 %v2493_v43, %v2492_v20  ;;  %v3711_v5 = vld [vmem:[%s4690_s22 + $0x9c] sm:$0xf]  ;;  %v3716_v53 = vld [vmem:[%s4690_s22 + $0xa8] sm:$0xf] }
 0x1ac   : > { %3703 = vst [vmem:[%s4690_s22 + $0x88] sm:$0xf] %v2843_v40  ;;  %3705 = vst [vmem:[%s4690_s22 + $0x8c] sm:$0x1] %v3059_v57  ;;  %v2854_v16 = vshrl.u32 %v3772_v21, 16  ;;  %v2846_v28 = vshrl.u32 %v3771_v46, 16  ;;  %v2463_v7 = vadd.f32 %v4896_v26, %v2424_v63 }
 0x1ad   : > { %v2494_v31 = vmax.f32 %v2462_v13, 0.0  ;;  %v5259_v27 = vmax.f32 %v2464_v24, 0.0  ;;  %3887 = vmatprep.subr.bf16.mxu0 %v2513_v56  ;;  %v2857_v52 = vshll.u32 %v3772_v21, 16  ;;  %v2849_v17 = vshll.u32 %v3771_v46, 16 }
 0x1ae   : > { %v2856_v42 = vrot.slane %v2854_v16, 7  ;;  %v2848_v8 = vrot.slane %v2846_v28, 7  ;;  %3888 = vmatpush3.bf16.msra.mxu0 %v5418_v44  ;;  %v4115_v61 = vpop.f32.mrb[96].mxu1  ;;  %v2495_v58 = vmax.f32 %v2463_v7, 0.0 }
 0x1af   : > { %v3773_v18 = vpack.c.bf16 %v2494_v31, %v2494_v31  ;;  %v3775_v2 = vpack.c.bf16 %v5259_v27, %v5259_v27  ;;  %v2427_v34 = vadd.f32 %v4115_v61, %v5135_v1  ;;  %v2371_v37 = vpop.f32.mrb[97].mxu1 }
 0x1b0   : > { %v2859_v60 = vor.u32 %v2857_v52, %v2856_v42  ;;  %v2861_v59 = vrot.slane %v2856_v42, 4  ;;  %v2851_v30 = vor.u32 %v2849_v17, %v2848_v8  ;;  %v2852_v51 = vrot.slane %v2848_v8, 4  ;;  %v4116_v11 = vpop.f32.mrb[98].mxu1 }
 0x1b1   : > { %v2863_v50 = vshrl.u32 %v3773_v18, 16  ;;  %v2866_v33 = vshll.u32 %v3773_v18, 16  ;;  %v2880_v3 = vshrl.u32 %v3775_v2, 16  ;;  %v2883_v54 = vshll.u32 %v3775_v2, 16  ;;  %v2374_v29 = vpop.f32.mrb[99].mxu1 }
 0x1b2   : > { %v3066_v32 = vsel %vm4959_vm10, %v2861_v59, %v3709_v47  ;;  %v2860_v1 = vsel %vm4951_vm9, %v2852_v51, %v2859_v60  ;;  %v3062_v43 = vsel %vm4935_vm8, %v2851_v30, %v3706_v49  ;;  %v3774_v20 = vpack.c.bf16 %v2495_v58, %v2495_v58 }
 0x1b3   : > { %3710 = vst [vmem:[%s4690_s22 + $0x98] sm:$0x1] %v3066_v32  ;;  %3707 = vst [vmem:[%s4690_s22 + $0x90] sm:$0xf] %v3062_v43  ;;  %v2865_v15 = vrot.slane %v2863_v50, 7  ;;  %v5279_v25 = vrot.slane %v2880_v3, 7  ;;  %v2466_v35 = vadd.f32 %v4896_v26, %v2427_v34  ;;  %v2426_v22 = vadd.f32 %v2371_v37, %v5142_v55 }
 0x1b4   : > { %3708 = vst [vmem:[%s4690_s22 + $0x94] sm:$0xf] %v2860_v1  ;;  %v2871_v0 = vshrl.u32 %v3774_v20, 16  ;;  %v2428_v21 = vadd.f32 %v4116_v11, %v5167_v38  ;;  %v2514_v46 = vpack.c.bf16 %v2495_v58, %v2494_v31  ;;  %v2874_v40 = vshll.u32 %v3774_v20, 16  ;;  %v3714_v31 = vld [vmem:[%s4690_s22 + $0xa4] sm:$0x1] }
 0x1b5   : > { %v2868_v13 = vor.u32 %v2866_v33, %v2865_v15  ;;  %v2885_v63 = vor.u32 %v2883_v54, %v5279_v25  ;;  %v2498_v24 = vmax.f32 %v2466_v35, 0.0  ;;  %v2465_v56 = vadd.f32 %v4896_v26, %v2426_v22  ;;  %v3721_v33 = vld [vmem:[%s4690_s22 + $0xb4] sm:$0xf] }
 0x1b6   : > { %v2873_v57 = vrot.slane %v2871_v0, 7  ;;  %v2467_v16 = vadd.f32 %v4896_v26, %v2428_v21  ;;  %3889 = vmatprep.subr.bf16.mxu0 %v2514_v46  ;;  %v4119_v55 = vpop.f32.mrb[100].mxu1  ;;  %v2869_v28 = vrot.slane %v2865_v15, 4  ;;  %v5419_v42 = vpack.c.bf16 %v5060_v9, %v5047_v23 }
 0x1b7   : > { %v3069_v7 = vsel %vm4935_vm8, %v2868_v13, %v3711_v5  ;;  %v3076_v38 = vsel %vm4935_vm8, %v2885_v63, %v3716_v53  ;;  %v2430_v52 = vadd.f32 %v4119_v55, %v5176_v19  ;;  %v2386_v8 = vpop.f32.mrb[101].mxu1  ;;  %v3777_v61 = vpack.c.bf16 %v2498_v24, %v2498_v24 }
 0x1b8   : > { %3890 = vmatpush3.bf16.msra.mxu0 %v5419_v42  ;;  %3712 = vst [vmem:[%s4690_s22 + $0x9c] sm:$0xf] %v3069_v7  ;;  %3717 = vst [vmem:[%s4690_s22 + $0xa8] sm:$0xf] %v3076_v38  ;;  %v2876_v17 = vor.u32 %v2874_v40, %v2873_v57  ;;  %v2878_v44 = vrot.slane %v2873_v57, 4  ;;  %v2497_v47 = vmax.f32 %v2465_v56, 0.0  ;;  %v5421_v40 = vpack.c.bf16 %v5110_v45, %v5088_v36 }
 0x1b9   : > { %v4120_v49 = vpop.f32.mrb[102].mxu1  ;;  %v2499_v18 = vmax.f32 %v2467_v16, 0.0  ;;  %v2469_v2 = vadd.f32 %v4896_v26, %v2430_v52  ;;  %v2897_v19 = vshrl.u32 %v3777_v61, 16  ;;  %v2900_v51 = vshll.u32 %v3777_v61, 16  ;;  %v3726_v52 = vld [vmem:[%s4690_s22 + $0xc0] sm:$0xf] }
 0x1ba   : > { %v2388_v58 = vpop.f32.mrb[103].mxu1  ;;  %v2877_v23 = vsel %vm4951_vm9, %v2869_v28, %v2876_v17  ;;  %v3073_v9 = vsel %vm4959_vm10, %v2878_v44, %v3714_v31  ;;  %v3776_v34 = vpack.c.bf16 %v2497_v47, %v2497_v47  ;;  %v2515_v59 = vpack.c.bf16 %v2497_v47, %v5259_v27  ;;  %v3729_v28 = vld [vmem:[%s4690_s22 + $0xc8] sm:$0x1] }
 0x1bb   : > { %3713 = vst [vmem:[%s4690_s22 + $0xa0] sm:$0xf] %v2877_v23  ;;  %3715 = vst [vmem:[%s4690_s22 + $0xa4] sm:$0x1] %v3073_v9  ;;  %v3778_v37 = vpack.c.bf16 %v2499_v18, %v2499_v18  ;;  %v2501_v60 = vmax.f32 %v2469_v2, 0.0  ;;  %v2899_v30 = vrot.slane %v2897_v19, 7  ;;  %v2429_v11 = vadd.f32 %v2388_v58, %v5188_v6 }
 0x1bc   : > { %v2516_v50 = vpack.c.bf16 %v2499_v18, %v2498_v24  ;;  %v2888_v3 = vshrl.u32 %v3776_v34, 16  ;;  %3891 = vmatprep.subr.bf16.mxu0 %v2515_v59  ;;  %v2886_v29 = vrot.slane %v5279_v25, 4  ;;  %v5420_v27 = vpack.c.bf16 %v5090_v14, %v5049_v62  ;;  %v3719_v6 = vld [vmem:[%s4690_s22 + $0xb0] sm:$0x1]  ;;  %v3724_v25 = vld [vmem:[%s4690_s22 + $0xbc] sm:$0x1] }
 0x1bd   : > { %v2905_v54 = vshrl.u32 %v3778_v37, 16  ;;  %v2902_v32 = vor.u32 %v2900_v51, %v2899_v30  ;;  %v3780_v1 = vpack.c.bf16 %v2501_v60, %v2501_v60  ;;  %v2468_v43 = vadd.f32 %v4896_v26, %v2429_v11  ;;  %v4272_v18 = vld [vmem:[%s5405_s5 + $0x20] sm:$0xff]   ;;  %v4273_v2 = vld [vmem:[%s5405_s5 + $0x28] sm:$0xff]   ;;  %v4274_v59 = vld [vmem:[%s5405_s5 + $0x30] sm:$0xff]  }
 0x1be   : > { %3892 = vmatpush3.bf16.msra.mxu0 %v5420_v27  ;;  %v2890_v20 = vrot.slane %v2888_v3, 7  ;;  %v2891_v15 = vshll.u32 %v3776_v34, 16  ;;  %v2908_v22 = vshll.u32 %v3778_v37, 16  ;;  %v2903_v5 = vrot.slane %v2899_v30, 4  ;;  %v4275_v30 = vld [vmem:[%s5405_s5 + $0x38] sm:$0xff]  }
 0x1bf   : > { %v2907_v35 = vrot.slane %v2905_v54, 7  ;;  %3893 = vmatprep.subr.bf16.mxu0 %v2516_v50  ;;  %v3083_v53 = vsel %vm4935_vm8, %v2902_v32, %v3721_v33  ;;  %v2922_v0 = vshrl.u32 %v3780_v1, 16  ;;  %v2500_v21 = vmax.f32 %v2468_v43, 0.0  ;;  %v3154_v51 = vld [vmem:[%s5404_s4] sm:$0x1] }
 0x1c0   : > { %3722 = vst [vmem:[%s4690_s22 + $0xb4] sm:$0xf] %v3083_v53  ;;  %v2893_v26 = vor.u32 %v2891_v15, %v2890_v20  ;;  %v2895_v62 = vrot.slane %v2890_v20, 4  ;;  %v2925_v7 = vshll.u32 %v3780_v1, 16  ;;  %v5422_v8 = vmov 0.0  }
 0x1c1   : > { %v2910_v14 = vor.u32 %v2908_v22, %v2907_v35  ;;  %v2912_v46 = vrot.slane %v2907_v35, 4  ;;  %v2924_v13 = vrot.slane %v2922_v0, 7  ;;  %v3779_v63 = vpack.c.bf16 %v2500_v21, %v2500_v21  ;;  %4137 = vmatprep.mubr.msk.bf16.mxu1 %vm4287_vm11, %v5422_v8  ;;  %v3261_v1 = vld [vmem:[%s5406_s6] sm:$0x1] }
 0x1c2   : > { %3894 = vmatpush3.bf16.msra.mxu0 %v5421_v40  ;;  %v2517_v57 = vpack.c.bf16 %v2501_v60, %v2500_v21  ;;  %v2894_v24 = vsel %vm4951_vm9, %v2886_v29, %v2893_v26  ;;  %v3080_v56 = vsel %vm4959_vm10, %v2895_v62, %v3719_v6  ;;  %v5423_v47 = vmov 1065369472  }
 0x1c3   : > { %v2911_v16 = vsel %vm4951_vm9, %v2903_v5, %v2910_v14  ;;  %v3087_v55 = vsel %vm4959_vm10, %v2912_v46, %v3724_v25  ;;  %3718 = vst [vmem:[%s4690_s22 + $0xac] sm:$0xf] %v2894_v24  ;;  %3720 = vst [vmem:[%s4690_s22 + $0xb0] sm:$0x1] %v3080_v56  ;;  %v2929_v36 = vrot.slane %v2924_v13, 4  ;;  %v2914_v45 = vshrl.u32 %v3779_v63, 16 }
 0x1c4   : > { %3723 = vst [vmem:[%s4690_s22 + $0xb8] sm:$0xf] %v2911_v16  ;;  %3725 = vst [vmem:[%s4690_s22 + $0xbc] sm:$0x1] %v3087_v55  ;;  %3895 = vmatprep.subr.bf16.mxu0 %v2517_v57  ;;  %v2917_v42 = vshll.u32 %v3779_v63, 16  ;;  %v2927_v17 = vor.u32 %v2925_v7, %v2924_v13 }
 0x1c5   : > { %v3094_v38 = vsel %vm4959_vm10, %v2929_v36, %v3729_v28  ;;  %v2916_v31 = vrot.slane %v2914_v45, 7 }
 0x1c6   : > { %3896 = vmatpush3.bf16.msra.mxu0 %v2509_v12  ;;  %3730 = vst [vmem:[%s4690_s22 + $0xc8] sm:$0x1] %v3094_v38  ;;  %v4271_v12 = vld [vmem:[%s5405_s5 + $0x18] sm:$0xff]  }
 0x1c7   : > { %4141 = vmatprep.subr.bf16.mxu0 %v5422_v8  ;;  %v2919_v44 = vor.u32 %v2917_v42, %v2916_v31  ;;  %v2920_v61 = vrot.slane %v2916_v31, 4 }
 0x1c9   : > { %3129 = vmatmul.mubr.bf16.vlgmr.msra.gmra.mrb[88].mxu0 %v5423_v47  ;;  %v2928_v49 = vsel %vm4951_vm9, %v2920_v61, %v2927_v17  ;;  %v3090_v41 = vsel %vm4935_vm8, %v2919_v44, %v3726_v52 }
 0x1ca   : > { %3727 = vst [vmem:[%s4690_s22 + $0xc0] sm:$0xf] %v3090_v41  ;;  %3728 = vst [vmem:[%s4690_s22 + $0xc4] sm:$0xf] %v2928_v49  ;;  %4157 = vmatprep.mubr.msk.bf16.mxu0 %vm4287_vm11, %v5422_v8  ;;  %4142 = vmatpush3.bf16.msra.mxu0 %v4268_v39 }
 0x1cb   : > { %4143 = vmatprep.subr.bf16.mxu0 %v5422_v8 }
 0x1ce   : > { %4144 = vmatpush3.bf16.msra.mxu0 %v4269_v48 }
 0x1cf   : > { %4145 = vmatprep.subr.bf16.mxu0 %v5422_v8 }
 0x1d2   : > { %4146 = vmatpush3.bf16.msra.mxu0 %v4270_v4 }
 0x1d3   : > { %4147 = vmatprep.subr.bf16.mxu0 %v5422_v8 }
 0x1d6   : > { %4148 = vmatpush3.bf16.msra.mxu0 %v4271_v12 }
 0x1d7   : > { %4149 = vmatprep.subr.bf16.mxu0 %v5422_v8 }
 0x1da   : > { %4150 = vmatpush3.bf16.msra.mxu0 %v4272_v18 }
 0x1db   : > { %4151 = vmatprep.subr.bf16.mxu0 %v5422_v8 }
 0x1de   : > { %4152 = vmatpush3.bf16.msra.mxu0 %v4273_v2 }
 0x1df   : > { %4153 = vmatprep.subr.bf16.mxu0 %v5422_v8 }
 0x1e2   : > { %4154 = vmatpush3.bf16.msra.mxu0 %v4274_v59 }
 0x1e3   : > { %4155 = vmatprep.subr.bf16.mxu0 %v5422_v8 }
 0x1e6   : > { %4156 = vmatpush3.bf16.msra.mxu0 %v4275_v30 }
 0x29c   : > { %v3897_v58 = vpop.f32.mrb[88].mxu0 }
 0x29d   : > { %v3898_v23 = vpop.f32.mrb[89].mxu0 }
 0x29e   : > { %v3899_v9 = vadd.f32 %v3898_v23, %v3897_v58  ;;  %v3900_v19 = vpop.f32.mrb[90].mxu0 }
 0x29f   : > { %v3901_v34 = vpop.f32.mrb[91].mxu0 }
 0x2a0   : > { %v3136_v37 = vmul.f32 0.00390625, %v3899_v9 }
 0x2a2   : > { %v3137_v60 = vpack.c.bf16 %v3136_v37, %v3136_v37 }
 0x2a4   : > { %4138 = vmatmul.mubr.bf16.vlgmr.msra.gmra.mrb[104].mxu1 %v3137_v60 }
 0x377   : > { %v3237_v11 = vpop.f32.mrb[104].mxu1 }
 0x378   : > { %v3238_v50 = vadd.f32 %v3237_v11, %v3154_v51  ;;  %v4139_v33 = vpop.f32.mrb[105].mxu1 }
 0x379   : > { %v3240_v3 = vpop.f32.mrb[106].mxu1 }
 0x37a   : > { %v3243_v54 = vmax.f32 %v3238_v50, 0.0  ;;  %v4140_v29 = vpop.f32.mrb[107].mxu1 }
 0x37c   : > { %v3244_v32 = vpack.c.bf16 %v3243_v54, %v3243_v54 }
 0x37e   : > { %4158 = vmatmul.mubr.bf16.vlgmr.msra.gmra.mrb[92].mxu0 %v3244_v32 }
 0x451   : > { %v3344_v43 = vpop.f32.mrb[92].mxu0 }
 0x452   : > { %v3345_v27 = vadd.f32 %v3344_v43, %v3261_v1  ;;  %v4159_v20 = vpop.f32.mrb[93].mxu0 }
 0x453   : > { %v3347_v15 = vpop.f32.mrb[94].mxu0 }
 0x454   : > { %3350 = vst [vmem:[%s314_s24] sm:$0x1] %v3345_v27  ;;  %v4160_v6 = vpop.f32.mrb[95].mxu0 }
 0x455 PF: > { %s19_s27 = sadd.s32 1, %s4282_s27  }
 0x456   : > { %p16_p4 = scmp.ge.s32.totalorder %s19_s27, 4  }
 0x458   :  { %18 = sbr.rel (!%p16_p4) target bundleno = 1 (0x1), region = 94 }

// kernel: generalized_rcnn_forward.3
= control target key start
LH: loop header
LB: loop body
LE: loop exit
PB: predicated region body
PF: predicated region fallthrough
CT: control target
= control target key end

     0   :  { %s9352_s27 = smov 0   ;;  %s10816_s0 = inlined_call_operand.vmem [shape: bf16[2,456,128], index: 0, kind: input, shape index: {}]   ;;  %s10817_s1 = inlined_call_operand.vmem [shape: f32[456,1], index: 1, kind: input, shape index: {}]   ;;  %s10818_s2 = inlined_call_operand.vmem [shape: f32[1,128], index: 2, kind: input, shape index: {}]   ;;  %s10819_s3 = inlined_call_operand.vmem [shape: f32[1,128], index: 3, kind: input, shape index: {}]   ;;  %s10820_s4 = inlined_call_operand.vmem [shape: bf16[9,128,128], index: 4, kind: input, shape index: {}]   ;;  %s10821_s5 = inlined_call_operand.vmem [shape: f32[1,128], index: 5, kind: input, shape index: {}]   ;;  %s10822_s6 = inlined_call_operand.vmem [shape: bf16[128,128], index: 6, kind: input, shape index: {}]   ;;  %s10823_s7 = inlined_call_operand.vmem [shape: f32[1,128], index: 7, kind: input, shape index: {}]   ;;  %s10824_s8 = inlined_call_operand.vmem [shape: bf16[2,384,128], index: 8, kind: output, shape index: {}]  }
   0x1 LB: > { %s6714_s28 = sadd.s32 4294967295, %s9304_s27   ;;  %p6718_p0 = scmp.ge.s32.totalorder %s9304_s27, 1  ;;  %s9304_s27 = sphi %s9352_s27, %s18_s27  }
   0x2   : > { %p262_p1 = scmp.lt.s32.totalorder %s9304_s27, 3 }
   0x4   : > { %p263_p2 = pnand %p6718_p0, %p262_p1 }
   0x6   : > { %266 = sbr.rel (%p263_p2) target bundleno = 1090 (0x442), region = 52 }
   0xd   : > { %v489_v0 = vld [vmem:[%s10817_s1 + $0x20] sm:$0xff]  ;;  %v487_v1 = vld [vmem:[%s10817_s1 + $0x10] sm:$0xff]  ;;  %v9306_v2 = vmov 0   ;;  %v490_v3 = vld [vmem:[%s10817_s1 + $0x28] sm:$0xff]  ;;  %p296_p3 = scmp.lt.s32.totalorder %s6714_s28, 1  ;;  %vm2251_vm0 = vcmask 1046528  }
   0xe   : > { %9076 = vset.pattern.permute.xlu1 %v9306_v2  ;;  %9075 = vset.pattern.permute.xlu0 %v9306_v2  ;;  %v488_v4 = vld [vmem:[%s10817_s1 + $0x18] sm:$0xff]  ;;  %v491_v6 = vld [vmem:[%s10817_s1 + $0x30] sm:$0xff]  ;;  %v494_v7 = vld [vmem:[%s10817_s1 + $0x48] sm:$0xff]  ;;  %vm1439_vm1 = vsmask.f32 7424 }
   0xf   : > { %565 = vperm.xlu1 %9076, %v489_v0   ;;  %555 = vperm.xlu0 %9075, %v487_v1   ;;  %v492_v5 = vld [vmem:[%s10817_s1 + $0x38] sm:$0xff]  ;;  %v493_v8 = vld [vmem:[%s10817_s1 + $0x40] sm:$0xff]  ;;  %v495_v10 = vld [vmem:[%s10817_s1 + $0x50] sm:$0xff]  ;;  %s10904_s28 = smov (!%p296_p3, %s6714_s28), 1 }
  0x10   : > { %v496_v9 = vld [vmem:[%s10817_s1 + $0x58] sm:$0xff]  ;;  %v498_v11 = vld [vmem:[%s10817_s1 + $0x68] sm:$0xff]  ;;  %v497_v12 = vld [vmem:[%s10817_s1 + $0x60] sm:$0xff]  ;;  %s9064_s11 = smul.u32 228, %s10904_s28 }
  0x11   : > { %v9077_v13 = vld [vmem:[%s10820_s4 + $0x100] sm:$0xff]   ;;  %v9078_v14 = vld [vmem:[%s10820_s4 + $0x108] sm:$0xff]   ;;  %v500_v15 = vld [vmem:[%s10817_s1 + $0x78] sm:$0xff]  ;;  %s9065_s20 = smul.u32 192, %s10904_s28 }
  0x12   : > { %v499_v16 = vld [vmem:[%s10817_s1 + $0x70] sm:$0xff]  ;;  %8296 = vmatprep.subr.bf16.mxu0 %v9077_v13  ;;  %v502_v18 = vld [vmem:[%s10817_s1 + $0x88] sm:$0xff]  ;;  %v501_v19 = vld [vmem:[%s10817_s1 + $0x80] sm:$0xff]  ;;  %s9595_s18 = scalar_lea.vmem %s10816_s0, %s9064_s11 }
  0x13   : > { %570 = vperm.xlu1 %9076, %v490_v3   ;;  %560 = vperm.xlu0 %9075, %v488_v4   ;;  %v9079_v17 = vld [vmem:[%s10820_s4 + $0x110] sm:$0xff]   ;;  %v504_v20 = vld [vmem:[%s10817_s1 + $0x98] sm:$0xff]  ;;  %v9081_v23 = vld [vmem:[%s10820_s4 + $0x120] sm:$0xff]   ;;  %s10742_s23 = scalar_lea.vmem %s10824_s8, %s9065_s20 }
  0x14   : > { %8297 = vmatpush3.bf16.msra.mxu0 %v9077_v13  ;;  %v9080_v21 = vld [vmem:[%s10820_s4 + $0x118] sm:$0xff]   ;;  %v503_v22 = vld [vmem:[%s10817_s1 + $0x90] sm:$0xff]  ;;  %v506_v24 = vld [vmem:[%s10817_s1 + $0xa8] sm:$0xff] }
  0x15   : > { %8298 = vmatprep.subr.bf16.mxu0 %v9078_v14  ;;  %v505_v25 = vld [vmem:[%s10817_s1 + $0xa0] sm:$0xff]  ;;  %v9082_v26 = vld [vmem:[%s10820_s4 + $0x128] sm:$0xff]   ;;  %v508_v27 = vld [vmem:[%s10817_s1 + $0xb8] sm:$0xff] }
  0x16   : > { %v507_v28 = vld [vmem:[%s10817_s1 + $0xb0] sm:$0xff]  ;;  %v510_v30 = vld [vmem:[%s10817_s1 + $0xc8] sm:$0xff]  ;;  %v509_v31 = vld [vmem:[%s10817_s1 + $0xc0] sm:$0xff] }
  0x17   : > { %580 = vperm.xlu1 %9076, %v492_v5   ;;  %575 = vperm.xlu0 %9075, %v491_v6   ;;  %v9083_v29 = vld [vmem:[%s10820_s4 + $0x130] sm:$0xff]   ;;  %v9084_v32 = vld [vmem:[%s10820_s4 + $0x138] sm:$0xff]   ;;  %v9465_v35 = vld [vmem:[%s10820_s4 + $0x140] sm:$0xff]  }
  0x18   : > { %8299 = vmatpush3.bf16.msra.mxu0 %v9078_v14  ;;  %v512_v33 = vld [vmem:[%s10817_s1 + $0xd8] sm:$0xff]  ;;  %v511_v34 = vld [vmem:[%s10817_s1 + $0xd0] sm:$0xff]  ;;  %v514_v36 = vld [vmem:[%s10817_s1 + $0xe8] sm:$0xff] }
  0x19   : > { %8300 = vmatprep.subr.bf16.mxu0 %v9079_v17  ;;  %v513_v37 = vld [vmem:[%s10817_s1 + $0xe0] sm:$0xff]  ;;  %v516_v38 = vld [vmem:[%s10817_s1 + $0xf8] sm:$0xff]  ;;  %v515_v39 = vld [vmem:[%s10817_s1 + $0xf0] sm:$0xff] }
  0x1a   : > { %v518_v40 = vld [vmem:[%s10817_s1 + $0x108] sm:$0xff]  ;;  %v517_v41 = vld [vmem:[%s10817_s1 + $0x100] sm:$0xff]  ;;  %v520_v42 = vld [vmem:[%s10817_s1 + $0x118] sm:$0xff] }
  0x1b   : > { %590 = vperm.xlu1 %9076, %v494_v7   ;;  %585 = vperm.xlu0 %9075, %v493_v8   ;;  %v519_v43 = vld [vmem:[%s10817_s1 + $0x110] sm:$0xff]  ;;  %v522_v44 = vld [vmem:[%s10817_s1 + $0x128] sm:$0xff]  ;;  %v521_v45 = vld [vmem:[%s10817_s1 + $0x120] sm:$0xff] }
  0x1c   : > { %8301 = vmatpush3.bf16.msra.mxu0 %v9079_v17  ;;  %v524_v46 = vld [vmem:[%s10817_s1 + $0x138] sm:$0xff]  ;;  %v523_v47 = vld [vmem:[%s10817_s1 + $0x130] sm:$0xff]  ;;  %v526_v48 = vld [vmem:[%s10817_s1 + $0x148] sm:$0xff] }
  0x1d   : > { %8302 = vmatprep.subr.bf16.mxu0 %v9080_v21  ;;  %v525_v49 = vld [vmem:[%s10817_s1 + $0x140] sm:$0xff]  ;;  %v528_v50 = vld [vmem:[%s10817_s1 + $0x158] sm:$0xff]  ;;  %v527_v51 = vld [vmem:[%s10817_s1 + $0x150] sm:$0xff] }
  0x1e   : > { %v530_v52 = vld [vmem:[%s10817_s1 + $0x168] sm:$0xff]  ;;  %v529_v53 = vld [vmem:[%s10817_s1 + $0x160] sm:$0xff]  ;;  %v532_v54 = vld [vmem:[%s10817_s1 + $0x178] sm:$0xff] }
  0x1f   : > { %600 = vperm.xlu1 %9076, %v496_v9   ;;  %595 = vperm.xlu0 %9075, %v495_v10   ;;  %v531_v55 = vld [vmem:[%s10817_s1 + $0x170] sm:$0xff]  ;;  %v534_v56 = vld [vmem:[%s10817_s1 + $0x188] sm:$0xff]  ;;  %v533_v57 = vld [vmem:[%s10817_s1 + $0x180] sm:$0xff] }
  0x20   : > { %8303 = vmatpush3.bf16.msra.mxu0 %v9080_v21  ;;  %v9107_v58 = vld [vmem:[%s10820_s4 + $0x40] sm:$0xff]   ;;  %v536_v59 = vld [vmem:[%s10817_s1 + $0x198] sm:$0xff]  ;;  %v535_v60 = vld [vmem:[%s10817_s1 + $0x190] sm:$0xff] }
  0x21   : > { %8304 = vmatprep.subr.bf16.mxu0 %v9081_v23  ;;  %8040 = vmatprep.subr.bf16.mxu1 %v9107_v58  ;;  %v9110_v61 = vld [vmem:[%s10820_s4 + $0x48] sm:$0xff]   ;;  %v485_v63 = vld [vmem:[%s10817_s1] sm:$0xff]  ;;  %v9112_v0 = vld [vmem:[%s10820_s4 + $0x50] sm:$0xff]  }
  0x22   : > { %8041 = vmatpush3.bf16.msra.mxu1 %v9107_v58  ;;  %v486_v62 = vld [vmem:[%s10817_s1 + $0x8] sm:$0xff]  ;;  %v537_v2 = vld [vmem:[%s10817_s1 + $0x1a0] sm:$0xff]  ;;  %v9114_v3 = vld [vmem:[%s10820_s4 + $0x58] sm:$0xff]  }
  0x23   : > { %610 = vperm.xlu1 %9076, %v498_v11   ;;  %605 = vperm.xlu0 %9075, %v497_v12   ;;  %v538_v1 = vld [vmem:[%s10817_s1 + $0x1a8] sm:$0xff]  ;;  %v540_v4 = vld [vmem:[%s10817_s1 + $0x1b8] sm:$0xff]  ;;  %v539_v5 = vld [vmem:[%s10817_s1 + $0x1b0] sm:$0xff] }
  0x24   : > { %8305 = vmatpush3.bf16.msra.mxu0 %v9081_v23  ;;  %8042 = vmatprep.subr.bf16.mxu1 %v9110_v61  ;;  %v9117_v6 = vld [vmem:[%s10820_s4 + $0x60] sm:$0xff]   ;;  %v9119_v8 = vld [vmem:[%s10820_s4 + $0x68] sm:$0xff]   ;;  %v9121_v9 = vld [vmem:[%s10820_s4 + $0x70] sm:$0xff]  }
  0x25   : > { %8306 = vmatprep.subr.bf16.mxu0 %v9082_v26  ;;  %v541_v7 = vld [vmem:[%s10817_s1 + $0x1c0] sm:$0xff]  ;;  %v9124_v10 = vld [vmem:[%s10820_s4 + $0x78] sm:$0xff]   ;;  %v7644_v11 = vld [vmem:[%s9595_s18 + $0x10] sm:$0xff]  }
  0x26   : > { %8043 = vmatpush3.bf16.msra.mxu1 %v9110_v61  ;;  %v7643_v12 = vld [vmem:[%s9595_s18 + $0x8] sm:$0xff]   ;;  %v7281_v13 = vunpack.c.l.bf16 %v7644_v11  ;;  %v7282_v14 = vunpack.c.h.bf16 %v7644_v11  ;;  %v7648_v58 = vld [vmem:[%s9595_s18 + $0x30] sm:$0xff]  }
  0x27   : > { %620 = vperm.xlu1 %9076, %v500_v15   ;;  %615 = vperm.xlu0 %9075, %v499_v16   ;;  %v9131_v15 = vld [vmem:[%s10820_s4] sm:$0xff]   ;;  %v7277_v17 = vunpack.c.l.bf16 %v7643_v12 }
  0x28   : > { %8307 = vmatpush3.bf16.msra.mxu0 %v9082_v26  ;;  %8044 = vmatprep.subr.bf16.mxu1 %v9112_v0  ;;  %v9605_v16 = vld [vmem:[%s10818_s2] ss:$0 sm:$0xff] }
  0x29   : > { %8308 = vmatprep.subr.bf16.mxu0 %v9083_v29  ;;  %v432_v23 = vmul.f32 %v7281_v13, %v9605_v16 }
  0x2a   : > { %8045 = vmatpush3.bf16.msra.mxu1 %v9112_v0  ;;  %v7298_v0 = vunpack.c.h.bf16 %v7648_v58 }
  0x2b   : > { %630 = vperm.xlu1 %9076, %v502_v18   ;;  %625 = vperm.xlu0 %9075, %v501_v19   ;;  %v7278_v18 = vunpack.c.h.bf16 %v7643_v12  ;;  %v7645_v19 = vld [vmem:[%s9595_s18 + $0x18] sm:$0xff]   ;;  %v7650_v12 = vld [vmem:[%s9595_s18 + $0x40] sm:$0xff]  }
  0x2c   : > { %8309 = vmatpush3.bf16.msra.mxu0 %v9083_v29  ;;  %8046 = vmatprep.subr.bf16.mxu1 %v9114_v3  ;;  %v7285_v26 = vunpack.c.l.bf16 %v7645_v19  ;;  %v441_v13 = vmul.f32 %v7298_v0, %v9605_v16 }
  0x2d   : > { %8310 = vmatprep.subr.bf16.mxu0 %v9084_v32 }
  0x2e   : > { %8047 = vmatpush3.bf16.msra.mxu1 %v9114_v3 }
  0x2f   : > { %640 = vperm.xlu1 %9076, %v504_v20   ;;  %635 = vperm.xlu0 %9075, %v503_v22   ;;  %v9611_v20 = vld [vmem:[%s10819_s3] ss:$0 sm:$0xff] }
  0x30   : > { %8311 = vmatpush3.bf16.msra.mxu0 %v9084_v32  ;;  %8048 = vmatprep.subr.bf16.mxu1 %v9117_v6 }
  0x31   : > { %8360 = vmatprep.subr.bf16.mxu0 %v9465_v35 }
  0x32   : > { %8049 = vmatpush3.bf16.msra.mxu1 %v9117_v6  ;;  %v7649_v6 = vld [vmem:[%s9595_s18 + $0x38] sm:$0xff]  }
  0x33   : > { %650 = vperm.xlu1 %9076, %v506_v24   ;;  %645 = vperm.xlu0 %9075, %v505_v25   ;;  %v433_v24 = vmul.f32 %v7282_v14, %v9605_v16  ;;  %v7286_v25 = vunpack.c.h.bf16 %v7645_v19  ;;  %v7302_v14 = vunpack.c.h.bf16 %v7649_v6 }
  0x34   : > { %8050 = vmatprep.subr.bf16.mxu1 %v9119_v8 }
  0x36   : > { %8051 = vmatpush3.bf16.msra.mxu1 %v9119_v8 }
  0x37   : > { %660 = vperm.xlu1 %9076, %v508_v27   ;;  %655 = vperm.xlu0 %9075, %v507_v28   ;;  %v430_v28 = vmul.f32 %v7277_v17, %v9605_v16 }
  0x38   : > { %8052 = vmatprep.subr.bf16.mxu1 %v9121_v9 }
  0x3a   : > { %8053 = vmatpush3.bf16.msra.mxu1 %v9121_v9 }
  0x3b   : > { %670 = vperm.xlu1 %9076, %v510_v30   ;;  %665 = vperm.xlu0 %9075, %v509_v31   ;;  %v431_v30 = vmul.f32 %v7278_v18, %v9605_v16  ;;  %v7646_v31 = vld [vmem:[%s9595_s18 + $0x20] sm:$0xff]  }
  0x3c   : > { %8054 = vmatprep.subr.bf16.mxu1 %v9124_v10 }
  0x3e   : > { %8055 = vmatpush3.bf16.msra.mxu1 %v9124_v10 }
  0x3f   : > { %680 = vperm.xlu1 %9076, %v512_v33   ;;  %675 = vperm.xlu0 %9075, %v511_v34  }
  0x40   : > { %8104 = vmatprep.subr.bf16.mxu1 %v9131_v15  ;;  %v7301_v15 = vunpack.c.l.bf16 %v7649_v6  ;;  %v7653_v6 = vld [vmem:[%s9595_s18 + $0x58] sm:$0xff]  }
  0x43   : > { %690 = vperm.xlu1 %9076, %v514_v36   ;;  %685 = vperm.xlu0 %9075, %v513_v37   ;;  %v435_v37 = vmul.f32 %v7286_v25, %v9605_v16 }
  0x47   : > { %700 = vperm.xlu1 %9076, %v516_v38   ;;  %695 = vperm.xlu0 %9075, %v515_v39   ;;  %v434_v38 = vmul.f32 %v7285_v26, %v9605_v16  ;;  %v7290_v39 = vunpack.c.h.bf16 %v7646_v31 }
  0x4b   : > { %710 = vperm.xlu1 %9076, %v518_v40   ;;  %705 = vperm.xlu0 %9075, %v517_v41   ;;  %v7289_v40 = vunpack.c.l.bf16 %v7646_v31  ;;  %v7306_v31 = vunpack.c.h.bf16 %v7650_v12 }
  0x4f   : > { %720 = vperm.xlu1 %9076, %v520_v42   ;;  %715 = vperm.xlu0 %9075, %v519_v43  }
  0x53   : > { %730 = vperm.xlu1 %9076, %v522_v44   ;;  %725 = vperm.xlu0 %9075, %v521_v45  }
  0x57   : > { %740 = vperm.xlu1 %9076, %v524_v46   ;;  %735 = vperm.xlu0 %9075, %v523_v47   ;;  %v7647_v47 = vld [vmem:[%s9595_s18 + $0x28] sm:$0xff]  }
  0x5b   : > { %750 = vperm.xlu1 %9076, %v526_v48   ;;  %745 = vperm.xlu0 %9075, %v525_v49  }
  0x5f   : > { %760 = vperm.xlu1 %9076, %v528_v50   ;;  %755 = vperm.xlu0 %9075, %v527_v51  }
  0x63   : > { %770 = vperm.xlu1 %9076, %v530_v52   ;;  %765 = vperm.xlu0 %9075, %v529_v53   ;;  %v437_v52 = vmul.f32 %v7290_v39, %v9605_v16  ;;  %v436_v53 = vmul.f32 %v7289_v40, %v9605_v16  ;;  %v7305_v39 = vunpack.c.l.bf16 %v7650_v12 }
  0x67   : > { %780 = vperm.xlu1 %9076, %v532_v54   ;;  %775 = vperm.xlu0 %9075, %v531_v55  }
  0x6b   : > { %790 = vperm.xlu1 %9076, %v534_v56   ;;  %785 = vperm.xlu0 %9075, %v533_v57   ;;  %v7294_v56 = vunpack.c.h.bf16 %v7647_v47  ;;  %v7293_v57 = vunpack.c.l.bf16 %v7647_v47 }
  0x6f   : > { %800 = vperm.xlu1 %9076, %v536_v59   ;;  %795 = vperm.xlu0 %9075, %v535_v60  }
  0x73   : > { %550 = vperm.xlu1 %9076, %v486_v62   ;;  %545 = vperm.xlu0 %9075, %v485_v63  }
  0x77   : > { %810 = vperm.xlu1 %9076, %v538_v1   ;;  %805 = vperm.xlu0 %9075, %v537_v2   ;;  %v7297_v1 = vunpack.c.l.bf16 %v7648_v58 }
  0x7b   : > { %820 = vperm.xlu1 %9076, %v540_v4   ;;  %815 = vperm.xlu0 %9075, %v539_v5   ;;  %v439_v4 = vmul.f32 %v7294_v56, %v9605_v16  ;;  %v438_v5 = vmul.f32 %v7293_v57, %v9605_v16 }
  0x7f   : > { %825 = vperm.xlu0 %9075, %v541_v7  }
  0x8e   : > { %v566_v21 = vpop.permute.xlu1 %565  ;;  %v556_v22 = vpop.permute.xlu0 %555 }
  0x8f   : > { %v838_v27 = vmul.f32 %v9611_v20, %v566_v21  ;;  %v836_v29 = vmul.f32 %v9611_v20, %v556_v22  ;;  %v440_v22 = vmul.f32 %v7297_v1, %v9605_v16 }
  0x91   : > { %v895_v41 = vadd.f32 %v838_v27, %v432_v23  ;;  %v893_v42 = vadd.f32 %v836_v29, %v430_v28 }
  0x92   : > { %v571_v32 = vpop.permute.xlu1 %570  ;;  %v561_v33 = vpop.permute.xlu0 %560 }
  0x93   : > { %v839_v34 = vmul.f32 %v9611_v20, %v571_v32  ;;  %v837_v36 = vmul.f32 %v9611_v20, %v561_v33  ;;  %v443_v32 = vmul.f32 %v7302_v14, %v9605_v16  ;;  %v442_v33 = vmul.f32 %v7301_v15, %v9605_v16 }
  0x95   : > { %v896_v43 = vadd.f32 %v839_v34, %v433_v24  ;;  %v894_v44 = vadd.f32 %v837_v36, %v431_v30 }
  0x96   : > { %v581_v45 = vpop.permute.xlu1 %580  ;;  %v576_v46 = vpop.permute.xlu0 %575 }
  0x97   : > { %v7396_v48 = vpack.c.bf16 %v896_v43, %v895_v41  ;;  %v7391_v49 = vpack.c.bf16 %v894_v44, %v893_v42  ;;  %v841_v50 = vmul.f32 %v9611_v20, %v581_v45  ;;  %v840_v51 = vmul.f32 %v9611_v20, %v576_v46  ;;  %v7651_v41 = vld [vmem:[%s9595_s18 + $0x48] sm:$0xff]  }
  0x99   : > { %7671 = vst [vmem:[#allocation2 + $0x10] sm:$0xff] %v7396_v48   ;;  %7670 = vst [vmem:[#allocation2 + $0x8] sm:$0xff] %v7391_v49   ;;  %v898_v54 = vadd.f32 %v841_v50, %v435_v37  ;;  %v897_v55 = vadd.f32 %v840_v51, %v434_v38  ;;  %v445_v51 = vmul.f32 %v7306_v31, %v9605_v16 }
  0x9a   : > { %v591_v59 = vpop.permute.xlu1 %590  ;;  %v586_v60 = vpop.permute.xlu0 %585 }
  0x9b   : > { %v7401_v61 = vpack.c.bf16 %v898_v54, %v897_v55  ;;  %v843_v62 = vmul.f32 %v9611_v20, %v591_v59  ;;  %v842_v63 = vmul.f32 %v9611_v20, %v586_v60  ;;  %v7310_v54 = vunpack.c.h.bf16 %v7651_v41 }
  0x9c   : > { %v444_v59 = vmul.f32 %v7305_v39, %v9605_v16  ;;  %v7309_v60 = vunpack.c.l.bf16 %v7651_v41  ;;  %v9095_v39 = vld [vmem:[%s10820_s4 + $0x150] sm:$0xff]  }
  0x9d   : > { %7672 = vst [vmem:[#allocation2 + $0x18] sm:$0xff] %v7401_v61   ;;  %v900_v2 = vadd.f32 %v843_v62, %v437_v52  ;;  %v899_v3 = vadd.f32 %v842_v63, %v436_v53  ;;  %v7652_v61 = vld [vmem:[%s9595_s18 + $0x50] sm:$0xff]  }
  0x9e   : > { %v601_v7 = vpop.permute.xlu1 %600  ;;  %v596_v8 = vpop.permute.xlu0 %595  ;;  %v446_v14 = vmul.f32 %v7309_v60, %v9605_v16  ;;  %v7313_v15 = vunpack.c.l.bf16 %v7652_v61 }
  0x9f   : > { %v7406_v9 = vpack.c.bf16 %v900_v2, %v899_v3  ;;  %v845_v10 = vmul.f32 %v9611_v20, %v601_v7  ;;  %v844_v11 = vmul.f32 %v9611_v20, %v596_v8  ;;  %v447_v7 = vmul.f32 %v7310_v54, %v9605_v16 }
  0xa0   : > { %v3176_v17 = vld [vmem:[#allocation2 + $0xc] sm:$0xf]  ;;  %v3177_v18 = vld [vmem:[#allocation2 + $0x10] sm:$0xf] }
  0xa1   : > { %7673 = vst [vmem:[#allocation2 + $0x20] sm:$0xff] %v7406_v9   ;;  %v902_v19 = vadd.f32 %v845_v10, %v439_v4  ;;  %v901_v21 = vadd.f32 %v844_v11, %v438_v5  ;;  %v6926_v23 = vcombine.low %v3176_v17, %v3177_v18  ;;  %v3906_v24 = vld [vmem:[#allocation2 + $0xc] sm:$0xe]  ;;  %v7314_v10 = vunpack.c.h.bf16 %v7652_v61  ;;  %v9099_v61 = vld [vmem:[%s10820_s4 + $0x158] sm:$0xff]  }
  0xa2   : > { %v611_v25 = vpop.permute.xlu1 %610  ;;  %v606_v26 = vpop.permute.xlu0 %605  ;;  %v6975_v27 = vcombine.low %v3906_v24, %v3177_v18  ;;  %v9091_v17 = vld [vmem:[%s10820_s4 + $0x148] sm:$0xff]   ;;  %v7318_v24 = vunpack.c.h.bf16 %v7653_v6 }
  0xa3   : > { %v7411_v28 = vpack.c.bf16 %v902_v19, %v901_v21  ;;  %v847_v29 = vmul.f32 %v9611_v20, %v611_v25  ;;  %v846_v30 = vmul.f32 %v9611_v20, %v606_v26  ;;  %v3368_v36 = vshll.u32 %v6926_v23, 16 }
  0xa4   : > { %v9644_v34 = vld [vmem:[#allocation2 + $0x14] sm:$0xff]   ;;  %v3366_v40 = vshrl.u32 %v6926_v23, 16  ;;  %v3927_v46 = vrot.slane %v6975_v27, 1 }
  0xa5   : > { %7674 = vst [vmem:[#allocation2 + $0x28] sm:$0xff] %v7411_v28   ;;  %v904_v37 = vadd.f32 %v847_v29, %v441_v13  ;;  %v903_v38 = vadd.f32 %v846_v30, %v440_v22  ;;  %v3370_v44 = vrot.slane %v3368_v36, 1  ;;  %v3373_v45 = vshll.u32 %v9644_v34, 16  ;;  %v7654_v29 = vld [vmem:[%s9595_s18 + $0x60] sm:$0xff]  }
  0xa6   : > { %v621_v42 = vpop.permute.xlu1 %620  ;;  %v616_v43 = vpop.permute.xlu0 %615  ;;  %v3928_v47 = vrot.slane %v9644_v34, 1  ;;  %v3377_v1 = vshrl.u32 %v9644_v34, 16  ;;  %v7317_v28 = vunpack.c.l.bf16 %v7653_v6  ;;  %v449_v30 = vmul.f32 %v7314_v10, %v9605_v16 }
  0xa7   : > { %v7416_v48 = vpack.c.bf16 %v904_v37, %v903_v38  ;;  %v849_v49 = vmul.f32 %v9611_v20, %v621_v42  ;;  %v848_v50 = vmul.f32 %v9611_v20, %v616_v43  ;;  %v3371_v52 = vor.u32 %v3370_v44, %v3366_v40 }
  0xa8   : > { %v3375_v53 = vrot.slane %v3373_v45, 1  ;;  %v9652_v55 = vld [vmem:[#allocation2 + $0x1c] sm:$0xff]   ;;  %v9657_v56 = vsel %vm2251_vm0, %v3927_v46, %v3928_v47  ;;  %v448_v38 = vmul.f32 %v7313_v15, %v9605_v16  ;;  %v451_v43 = vmul.f32 %v7318_v24, %v9605_v16 }
  0xa9   : > { %7675 = vst [vmem:[#allocation2 + $0x30] sm:$0xff] %v7416_v48   ;;  %v906_v57 = vadd.f32 %v849_v49, %v443_v32  ;;  %v905_v58 = vadd.f32 %v848_v50, %v442_v33  ;;  %v3381_v2 = vshll.u32 %v9652_v55, 16  ;;  %v3385_v22 = vshrl.u32 %v9652_v55, 16 }
  0xaa   : > { %v631_v62 = vpop.permute.xlu1 %630  ;;  %v626_v63 = vpop.permute.xlu0 %625  ;;  %v3376_v0 = vsel %vm1439_vm1, %v3371_v52, %v3375_v53  ;;  %v3379_v8 = vor.u32 %v3377_v1, %v3375_v53  ;;  %v3930_v40 = vrot.slane %v9652_v55, 1  ;;  %v450_v50 = vmul.f32 %v7317_v28, %v9605_v16 }
  0xab   : > { %v7421_v3 = vpack.c.bf16 %v906_v57, %v905_v58  ;;  %v851_v4 = vmul.f32 %v9611_v20, %v631_v62  ;;  %v850_v5 = vmul.f32 %v9611_v20, %v626_v63  ;;  %8312 = vmatprep.mubr.bf16.mxu0 %v3376_v0  ;;  %v3383_v9 = vrot.slane %v3381_v2, 1 }
  0xac   : > { %v9668_v11 = vld [vmem:[#allocation2 + $0x24] sm:$0xff]   ;;  %v7322_v54 = vunpack.c.h.bf16 %v7654_v29  ;;  %v9702_v57 = vsel %vm2251_vm0, %v3928_v47, %v3930_v40  ;;  %v7321_v60 = vunpack.c.l.bf16 %v7654_v29 }
  0xad   : > { %7676 = vst [vmem:[#allocation2 + $0x38] sm:$0xff] %v7421_v3   ;;  %v908_v12 = vadd.f32 %v851_v4, %v445_v51  ;;  %v907_v13 = vadd.f32 %v850_v5, %v444_v59  ;;  %v3384_v21 = vsel %vm1439_vm1, %v3379_v8, %v3383_v9  ;;  %v3389_v23 = vshll.u32 %v9668_v11, 16  ;;  %v7655_v51 = vld [vmem:[%s9595_s18 + $0x68] sm:$0xff]   ;;  %v7656_v5 = vld [vmem:[%s9595_s18 + $0x70] sm:$0xff]  }
  0xae   : > { %v641_v18 = vpop.permute.xlu1 %640  ;;  %v636_v19 = vpop.permute.xlu0 %635  ;;  %8313 = vmatmul.mubr.bf16.vlgmr.msra.gmra.mrb[0].mxu0 %v3384_v21  ;;  %v3387_v31 = vor.u32 %v3385_v22, %v3383_v9  ;;  %v3393_v44 = vshrl.u32 %v9668_v11, 16  ;;  %v3932_v62 = vrot.slane %v9668_v11, 1  ;;  %v7326_v10 = vunpack.c.h.bf16 %v7655_v51 }
  0xaf   : > { %v7426_v25 = vpack.c.bf16 %v908_v12, %v907_v13  ;;  %v853_v26 = vmul.f32 %v9611_v20, %v641_v18  ;;  %v852_v27 = vmul.f32 %v9611_v20, %v636_v19  ;;  %8361 = vmatpush3.bf16.msra.mxu0 %v9465_v35  ;;  %v3391_v32 = vrot.slane %v3389_v23, 1  ;;  %v9103_v18 = vld [vmem:[%s10820_s4 + $0x160] sm:$0xff]  }
  0xb0   : > { %v9682_v33 = vld [vmem:[#allocation2 + $0x2c] sm:$0xff]   ;;  %8362 = vmatprep.subr.bf16.mxu0 %v9091_v17  ;;  %v9717_v6 = vsel %vm2251_vm0, %v3930_v40, %v3932_v62  ;;  %v452_v15 = vmul.f32 %v7321_v60, %v9605_v16  ;;  %v455_v29 = vmul.f32 %v7326_v10, %v9605_v16  ;;  %v7329_v40 = vunpack.c.l.bf16 %v7656_v5 }
  0xb1   : > { %7677 = vst [vmem:[#allocation2 + $0x40] sm:$0xff] %v7426_v25   ;;  %v910_v36 = vadd.f32 %v853_v26, %v447_v7  ;;  %v909_v37 = vadd.f32 %v852_v27, %v446_v14  ;;  %v3392_v42 = vsel %vm1439_vm1, %v3387_v31, %v3391_v32  ;;  %v3397_v45 = vshll.u32 %v9682_v33, 16  ;;  %v7657_v25 = vld [vmem:[%s9595_s18 + $0x78] sm:$0xff]  }
  0xb2   : > { %v651_v35 = vpop.permute.xlu1 %650  ;;  %v646_v41 = vpop.permute.xlu0 %645  ;;  %8316 = vmatprep.mubr.bf16.mxu0 %v3392_v42  ;;  %v3395_v52 = vor.u32 %v3393_v44, %v3391_v32  ;;  %v3401_v34 = vshrl.u32 %v9682_v33, 16  ;;  %v453_v7 = vmul.f32 %v7322_v54, %v9605_v16  ;;  %v7330_v32 = vunpack.c.h.bf16 %v7656_v5 }
  0xb3   : > { %v7431_v46 = vpack.c.bf16 %v910_v36, %v909_v37  ;;  %v855_v48 = vmul.f32 %v9611_v20, %v651_v35  ;;  %v854_v49 = vmul.f32 %v9611_v20, %v646_v41  ;;  %v3399_v53 = vrot.slane %v3397_v45, 1  ;;  %8363 = vmatpush3.bf16.msra.mxu0 %v9091_v17  ;;  %v9108_v35 = vld [vmem:[%s10820_s4 + $0x168] sm:$0xff]  }
  0xb4   : > { %v9697_v55 = vld [vmem:[#allocation2 + $0x34] sm:$0xff]   ;;  %8364 = vmatprep.subr.bf16.mxu0 %v9095_v39  ;;  %v7325_v17 = vunpack.c.l.bf16 %v7655_v51  ;;  %v7333_v51 = vunpack.c.l.bf16 %v7657_v25 }
  0xb5   : > { %7678 = vst [vmem:[#allocation2 + $0x48] sm:$0xff] %v7431_v46   ;;  %v912_v58 = vadd.f32 %v855_v48, %v449_v30  ;;  %v911_v59 = vadd.f32 %v854_v49, %v448_v38  ;;  %v3400_v1 = vsel %vm1439_vm1, %v3395_v52, %v3399_v53  ;;  %v3405_v47 = vshll.u32 %v9697_v55, 16  ;;  %v7658_v52 = vld [vmem:[%s9595_s18 + $0x80] sm:$0xff]  }
  0xb6   : > { %v661_v63 = vpop.permute.xlu1 %660  ;;  %v656_v0 = vpop.permute.xlu0 %655  ;;  %8317 = vmatmul.mubr.bf16.gmra.mrb[4].mxu0 %v3400_v1  ;;  %v3403_v8 = vor.u32 %v3401_v34, %v3399_v53  ;;  %v3409_v23 = vshrl.u32 %v9697_v55, 16  ;;  %v7334_v46 = vunpack.c.h.bf16 %v7657_v25  ;;  %v457_v53 = vmul.f32 %v7330_v32, %v9605_v16 }
  0xb7   : > { %v7436_v2 = vpack.c.bf16 %v912_v58, %v911_v59  ;;  %v857_v3 = vmul.f32 %v9611_v20, %v661_v63  ;;  %v856_v4 = vmul.f32 %v9611_v20, %v656_v0  ;;  %v3407_v9 = vrot.slane %v3405_v47, 1  ;;  %8365 = vmatpush3.bf16.msra.mxu0 %v9095_v39  ;;  %v9115_v0 = vld [vmem:[%s10820_s4 + $0x170] sm:$0xff]  }
  0xb8   : > { %v9720_v12 = vld [vmem:[#allocation2 + $0x3c] sm:$0xff]   ;;  %8366 = vmatprep.subr.bf16.mxu0 %v9099_v61  ;;  %v454_v39 = vmul.f32 %v7325_v17, %v9605_v16  ;;  %v456_v63 = vmul.f32 %v7329_v40, %v9605_v16  ;;  %v3934_v1 = vrot.slane %v9682_v33, 1  ;;  %v458_v10 = vmul.f32 %v7333_v51, %v9605_v16 }
  0xb9   : > { %7679 = vst [vmem:[#allocation2 + $0x50] sm:$0xff] %v7436_v2   ;;  %v914_v13 = vadd.f32 %v857_v3, %v451_v43  ;;  %v913_v14 = vadd.f32 %v856_v4, %v450_v50  ;;  %v3408_v22 = vsel %vm1439_vm1, %v3403_v8, %v3407_v9  ;;  %v3413_v24 = vshll.u32 %v9720_v12, 16 }
  0xba   : > { %v671_v19 = vpop.permute.xlu1 %670  ;;  %v666_v21 = vpop.permute.xlu0 %665  ;;  %8320 = vmatprep.mubr.bf16.mxu0 %v3408_v22  ;;  %v3411_v30 = vor.u32 %v3409_v23, %v3407_v9  ;;  %v3417_v44 = vshrl.u32 %v9720_v12, 16  ;;  %v459_v3 = vmul.f32 %v7334_v46, %v9605_v16  ;;  %v7337_v22 = vunpack.c.l.bf16 %v7658_v52  ;;  %v9122_v23 = vld [vmem:[%s10820_s4 + $0x178] sm:$0xff]  }
  0xbb   : > { %v7441_v26 = vpack.c.bf16 %v914_v13, %v913_v14  ;;  %v859_v27 = vmul.f32 %v9611_v20, %v671_v19  ;;  %v858_v28 = vmul.f32 %v9611_v20, %v666_v21  ;;  %v3415_v31 = vrot.slane %v3413_v24, 1  ;;  %8367 = vmatpush3.bf16.msra.mxu0 %v9099_v61  ;;  %v7659_v13 = vld [vmem:[%s9595_s18 + $0x88] sm:$0xff]  }
  0xbc   : > { %v9733_v36 = vld [vmem:[#allocation2 + $0x44] sm:$0xff]   ;;  %8368 = vmatprep.subr.bf16.mxu0 %v9103_v18  ;;  %v3936_v24 = vrot.slane %v9697_v55, 1  ;;  %v7342_v40 = vunpack.c.h.bf16 %v7659_v13 }
  0xbd   : > { %7680 = vst [vmem:[#allocation2 + $0x58] sm:$0xff] %v7441_v26   ;;  %v916_v37 = vadd.f32 %v859_v27, %v453_v7  ;;  %v915_v38 = vadd.f32 %v858_v28, %v452_v15  ;;  %v3416_v43 = vsel %vm1439_vm1, %v3411_v30, %v3415_v31  ;;  %v3421_v45 = vshll.u32 %v9733_v36, 16 }
  0xbe   : > { %v681_v41 = vpop.permute.xlu1 %680  ;;  %v676_v42 = vpop.permute.xlu0 %675  ;;  %8321 = vmatmul.mubr.bf16.gmra.mrb[8].mxu0 %v3416_v43  ;;  %v3419_v54 = vor.u32 %v3417_v44, %v3415_v31  ;;  %v3425_v4 = vshrl.u32 %v9733_v36, 16  ;;  %v7338_v15 = vunpack.c.h.bf16 %v7658_v52  ;;  %v7660_v31 = vld [vmem:[%s9595_s18 + $0x90] sm:$0xff]   ;;  %v9781_v32 = vsel %vm2251_vm0, %v3934_v1, %v3936_v24 }
  0xbf   : > { %v7446_v48 = vpack.c.bf16 %v916_v37, %v915_v38  ;;  %v861_v49 = vmul.f32 %v9611_v20, %v681_v41  ;;  %v860_v50 = vmul.f32 %v9611_v20, %v676_v42  ;;  %v3423_v58 = vrot.slane %v3421_v45, 1  ;;  %8369 = vmatpush3.bf16.msra.mxu0 %v9103_v18  ;;  %v9790_v45 = vld [vmem:[%s10820_s4 + $0x180] sm:$0xff]  }
  0xc0   : > { %v9746_v59 = vld [vmem:[#allocation2 + $0x4c] sm:$0xff]   ;;  %8370 = vmatprep.subr.bf16.mxu0 %v9108_v35  ;;  %v9766_v18 = vsel %vm2251_vm0, %v3932_v62, %v3934_v1  ;;  %v461_v37 = vmul.f32 %v7338_v15, %v9605_v16  ;;  %v460_v43 = vmul.f32 %v7337_v22, %v9605_v16  ;;  %v7341_v44 = vunpack.c.l.bf16 %v7659_v13 }
  0xc1   : > { %7681 = vst [vmem:[#allocation2 + $0x60] sm:$0xff] %v7446_v48   ;;  %v918_v60 = vadd.f32 %v861_v49, %v455_v29  ;;  %v917_v61 = vadd.f32 %v860_v50, %v454_v39  ;;  %v3424_v2 = vsel %vm1439_vm1, %v3419_v54, %v3423_v58  ;;  %v3429_v5 = vshll.u32 %v9746_v59, 16 }
  0xc2   : > { %v691_v34 = vpop.permute.xlu1 %690  ;;  %v686_v47 = vpop.permute.xlu0 %685  ;;  %8324 = vmatprep.mubr.bf16.mxu0 %v3424_v2  ;;  %v3427_v33 = vor.u32 %v3425_v4, %v3423_v58  ;;  %v3433_v11 = vshrl.u32 %v9746_v59, 16  ;;  %v7661_v58 = vld [vmem:[%s9595_s18 + $0x98] sm:$0xff]   ;;  %v462_v2 = vmul.f32 %v7341_v44, %v9605_v16 }
  0xc3   : > { %v7451_v7 = vpack.c.bf16 %v918_v60, %v917_v61  ;;  %v863_v8 = vmul.f32 %v9611_v20, %v691_v34  ;;  %v862_v9 = vmul.f32 %v9611_v20, %v686_v47  ;;  %v3431_v14 = vrot.slane %v3429_v5, 1  ;;  %8371 = vmatpush3.bf16.msra.mxu0 %v9108_v35 }
  0xc4   : > { %v9761_v17 = vld [vmem:[#allocation2 + $0x54] sm:$0xff]   ;;  %8372 = vmatprep.subr.bf16.mxu0 %v9115_v0  ;;  %v463_v60 = vmul.f32 %v7342_v40, %v9605_v16  ;;  %v7349_v15 = vunpack.c.l.bf16 %v7661_v58 }
  0xc5   : > { %7682 = vst [vmem:[#allocation2 + $0x68] sm:$0xff] %v7451_v7   ;;  %v920_v19 = vadd.f32 %v863_v8, %v457_v53  ;;  %v919_v21 = vadd.f32 %v862_v9, %v456_v63  ;;  %v3432_v27 = vsel %vm1439_vm1, %v3427_v33, %v3431_v14  ;;  %v3437_v62 = vshll.u32 %v9761_v17, 16 }
  0xc6   : > { %v701_v25 = vpop.permute.xlu1 %700  ;;  %v696_v26 = vpop.permute.xlu0 %695  ;;  %8325 = vmatmul.mubr.bf16.gmra.mrb[12].mxu0 %v3432_v27  ;;  %v3435_v38 = vor.u32 %v3433_v11, %v3431_v14  ;;  %v3441_v50 = vshrl.u32 %v9761_v17, 16  ;;  %v7662_v11 = vld [vmem:[%s9595_s18 + $0xa0] sm:$0xff]  }
  0xc7   : > { %v7456_v28 = vpack.c.bf16 %v920_v19, %v919_v21  ;;  %v865_v29 = vmul.f32 %v9611_v20, %v701_v25  ;;  %v864_v30 = vmul.f32 %v9611_v20, %v696_v26  ;;  %v3439_v39 = vrot.slane %v3437_v62, 1  ;;  %8373 = vmatpush3.bf16.msra.mxu0 %v9115_v0 }
  0xc8   : > { %v9784_v35 = vld [vmem:[#allocation2 + $0x5c] sm:$0xff]   ;;  %8374 = vmatprep.subr.bf16.mxu0 %v9122_v23  ;;  %v7346_v0 = vunpack.c.h.bf16 %v7660_v31  ;;  %v3938_v62 = vrot.slane %v9720_v12, 1  ;;  %v7354_v44 = vunpack.c.h.bf16 %v7662_v11 }
  0xc9   : > { %7683 = vst [vmem:[#allocation2 + $0x70] sm:$0xff] %v7456_v28   ;;  %v922_v41 = vadd.f32 %v865_v29, %v459_v3  ;;  %v921_v42 = vadd.f32 %v864_v30, %v458_v10  ;;  %v3440_v49 = vsel %vm1439_vm1, %v3435_v38, %v3439_v39  ;;  %v3445_v51 = vshll.u32 %v9784_v35, 16 }
  0xca   : > { %v711_v46 = vpop.permute.xlu1 %710  ;;  %v706_v48 = vpop.permute.xlu0 %705  ;;  %8328 = vmatprep.mubr.bf16.mxu0 %v3440_v49  ;;  %v3443_v61 = vor.u32 %v3441_v50, %v3439_v39  ;;  %v7345_v3 = vunpack.c.l.bf16 %v7660_v31  ;;  %v3449_v8 = vshrl.u32 %v9784_v35, 16  ;;  %v7350_v10 = vunpack.c.h.bf16 %v7661_v58 }
  0xcb   : > { %v7461_v52 = vpack.c.bf16 %v922_v41, %v921_v42  ;;  %v867_v53 = vmul.f32 %v9611_v20, %v711_v46  ;;  %v866_v54 = vmul.f32 %v9611_v20, %v706_v48  ;;  %v3447_v63 = vrot.slane %v3445_v51, 1  ;;  %8375 = vmatpush3.bf16.msra.mxu0 %v9122_v23 }
  0xcc   : > { %v9799_v1 = vld [vmem:[#allocation2 + $0x64] sm:$0xff]   ;;  %8424 = vmatprep.subr.bf16.mxu0 %v9790_v45  ;;  %v465_v19 = vmul.f32 %v7346_v0, %v9605_v16  ;;  %v464_v27 = vmul.f32 %v7345_v3, %v9605_v16  ;;  %v467_v31 = vmul.f32 %v7350_v10, %v9605_v16  ;;  %v466_v42 = vmul.f32 %v7349_v15, %v9605_v16 }
  0xcd   : > { %7684 = vst [vmem:[#allocation2 + $0x78] sm:$0xff] %v7461_v52   ;;  %v924_v34 = vadd.f32 %v867_v53, %v461_v37  ;;  %v923_v47 = vadd.f32 %v866_v54, %v460_v43  ;;  %v3448_v7 = vsel %vm1439_vm1, %v3443_v61, %v3447_v63  ;;  %v3453_v9 = vshll.u32 %v9799_v1, 16  ;;  %v7663_v52 = vld [vmem:[%s9595_s18 + $0xa8] sm:$0xff]  }
  0xce   : > { %v721_v4 = vpop.permute.xlu1 %720  ;;  %v716_v5 = vpop.permute.xlu0 %715  ;;  %8329 = vmatmul.mubr.bf16.gmra.mrb[16].mxu0 %v3448_v7  ;;  %v3451_v21 = vor.u32 %v3449_v8, %v3447_v63  ;;  %v3457_v37 = vshrl.u32 %v9799_v1, 16  ;;  %v9826_v48 = vsel %vm2251_vm0, %v3936_v24, %v3938_v62  ;;  %v7353_v51 = vunpack.c.l.bf16 %v7662_v11 }
  0xcf   : > { %v7466_v13 = vpack.c.bf16 %v924_v34, %v923_v47  ;;  %v869_v33 = vmul.f32 %v9611_v20, %v721_v4  ;;  %v868_v14 = vmul.f32 %v9611_v20, %v716_v5  ;;  %v3455_v22 = vrot.slane %v3453_v9, 1 }
  0xd0   : > { %v9809_v23 = vld [vmem:[#allocation2 + $0x6c] sm:$0xff]   ;;  %v3940_v53 = vrot.slane %v9733_v36, 1  ;;  %v469_v47 = vmul.f32 %v7354_v44, %v9605_v16  ;;  %v7358_v4 = vunpack.c.h.bf16 %v7663_v52  ;;  %v468_v9 = vmul.f32 %v7353_v51, %v9605_v16 }
  0xd1   : > { %7685 = vst [vmem:[#allocation2 + $0x80] sm:$0xff] %v7466_v13   ;;  %v926_v25 = vadd.f32 %v869_v33, %v463_v60  ;;  %v925_v26 = vadd.f32 %v868_v14, %v462_v2  ;;  %v3456_v30 = vsel %vm1439_vm1, %v3451_v21, %v3455_v22  ;;  %v3461_v38 = vshll.u32 %v9809_v23, 16  ;;  %v7664_v13 = vld [vmem:[%s9595_s18 + $0xb0] sm:$0xff]  }
  0xd2   : > { %v731_v28 = vpop.permute.xlu1 %730  ;;  %v726_v29 = vpop.permute.xlu0 %725  ;;  %8332 = vmatprep.mubr.bf16.mxu0 %v3456_v30  ;;  %v3459_v12 = vor.u32 %v3457_v37, %v3455_v22  ;;  %v3465_v61 = vshrl.u32 %v9809_v23, 16  ;;  %v9838_v34 = vsel %vm2251_vm0, %v3938_v62, %v3940_v53  ;;  %v7357_v10 = vunpack.c.l.bf16 %v7663_v52 }
  0xd3   : > { %v7471_v39 = vpack.c.bf16 %v926_v25, %v925_v26  ;;  %v871_v40 = vmul.f32 %v9611_v20, %v731_v28  ;;  %v870_v41 = vmul.f32 %v9611_v20, %v726_v29  ;;  %v3463_v43 = vrot.slane %v3461_v38, 1  ;;  %v9857_v38 = vld [vmem:[%s10818_s2] ss:$0 sm:$0xff] }
  0xd4   : > { %v9821_v46 = vld [vmem:[#allocation2 + $0x74] sm:$0xff]   ;;  %v471_v11 = vmul.f32 %v7358_v4, %v9605_v16  ;;  %v7362_v29 = vunpack.c.h.bf16 %v7664_v13 }
  0xd5   : > { %7686 = vst [vmem:[#allocation2 + $0x88] sm:$0xff] %v7471_v39   ;;  %v928_v49 = vadd.f32 %v871_v40, %v465_v19  ;;  %v927_v50 = vadd.f32 %v870_v41, %v464_v27  ;;  %v3464_v60 = vsel %vm1439_vm1, %v3459_v12, %v3463_v43  ;;  %v3469_v63 = vshll.u32 %v9821_v46, 16  ;;  %v7665_v27 = vld [vmem:[%s9595_s18 + $0xb8] sm:$0xff]  }
  0xd6   : > { %v741_v54 = vpop.permute.xlu1 %740  ;;  %v736_v58 = vpop.permute.xlu0 %735  ;;  %8333 = vmatmul.mubr.bf16.gmra.mrb[20].mxu0 %v3464_v60  ;;  %v3467_v2 = vor.u32 %v3465_v61, %v3463_v43  ;;  %v3473_v19 = vshrl.u32 %v9821_v46, 16  ;;  %v470_v39 = vmul.f32 %v9857_v38, %v7357_v10  ;;  %v7366_v43 = vunpack.c.h.bf16 %v7665_v27 }
  0xd7   : > { %v7476_v55 = vpack.c.bf16 %v928_v49, %v927_v50  ;;  %v873_v24 = vmul.f32 %v9611_v20, %v741_v54  ;;  %v872_v0 = vmul.f32 %v9611_v20, %v736_v58  ;;  %v3471_v3 = vrot.slane %v3469_v63, 1  ;;  %v9866_v49 = vld [vmem:[%s10819_s3] ss:$0 sm:$0xff] }
  0xd8   : > { %v9841_v5 = vld [vmem:[#allocation2 + $0x7c] sm:$0xff]   ;;  %v7365_v52 = vunpack.c.l.bf16 %v7665_v27  ;;  %v473_v54 = vmul.f32 %v9857_v38, %v7362_v29 }
  0xd9   : > { %7687 = vst [vmem:[#allocation2 + $0x90] sm:$0xff] %v7476_v55   ;;  %v930_v7 = vadd.f32 %v873_v24, %v467_v31  ;;  %v929_v8 = vadd.f32 %v872_v0, %v466_v42  ;;  %v3472_v15 = vsel %vm1439_vm1, %v3467_v2, %v3471_v3  ;;  %v3477_v21 = vshll.u32 %v9841_v5, 16  ;;  %v7666_v0 = vld [vmem:[%s9595_s18 + $0xc0] sm:$0xff]  }
  0xda   : > { %v751_v33 = vpop.permute.xlu1 %750  ;;  %v746_v14 = vpop.permute.xlu0 %745  ;;  %8336 = vmatprep.mubr.bf16.mxu0 %v3472_v15  ;;  %v3475_v62 = vor.u32 %v3473_v19, %v3471_v3  ;;  %v3481_v42 = vshrl.u32 %v9841_v5, 16  ;;  %v7370_v19 = vunpack.c.h.bf16 %v7666_v0  ;;  %v7369_v27 = vunpack.c.l.bf16 %v7666_v0 }
  0xdb   : > { %v7481_v22 = vpack.c.bf16 %v930_v7, %v929_v8  ;;  %v875_v25 = vmul.f32 %v9611_v20, %v751_v33  ;;  %v874_v26 = vmul.f32 %v9611_v20, %v746_v14  ;;  %v3479_v28 = vrot.slane %v3477_v21, 1 }
  0xdc   : > { %v9852_v30 = vld [vmem:[#allocation2 + $0x84] sm:$0xff]   ;;  %v7361_v20 = vunpack.c.l.bf16 %v7664_v13  ;;  %v475_v7 = vmul.f32 %v9857_v38, %v7366_v43  ;;  %v474_v14 = vmul.f32 %v9857_v38, %v7365_v52 }
  0xdd   : > { %7688 = vst [vmem:[#allocation2 + $0x98] sm:$0xff] %v7481_v22   ;;  %v932_v31 = vadd.f32 %v875_v25, %v469_v47  ;;  %v931_v37 = vadd.f32 %v874_v26, %v468_v9  ;;  %v3480_v16 = vsel %vm1439_vm1, %v3475_v62, %v3479_v28  ;;  %v3485_v12 = vshll.u32 %v9852_v30, 16 }
  0xde   : > { %v761_v40 = vpop.permute.xlu1 %760  ;;  %v756_v41 = vpop.permute.xlu0 %755  ;;  %8337 = vmatmul.mubr.bf16.gmra.mrb[24].mxu0 %v3480_v16  ;;  %v3483_v58 = vor.u32 %v3481_v42, %v3479_v28  ;;  %v472_v24 = vmul.f32 %v9857_v38, %v7361_v20  ;;  %v3942_v47 = vrot.slane %v9746_v59, 1  ;;  %v3489_v8 = vshrl.u32 %v9852_v30, 16 }
  0xdf   : > { %v7486_v44 = vpack.c.bf16 %v932_v31, %v931_v37  ;;  %v877_v50 = vmul.f32 %v9866_v49, %v761_v40  ;;  %v876_v51 = vmul.f32 %v9866_v49, %v756_v41  ;;  %v3487_v60 = vrot.slane %v3485_v12, 1 }
  0xe0   : > { %v9871_v61 = vld [vmem:[#allocation2 + $0x8c] sm:$0xff]   ;;  %v9888_v22 = vsel %vm2251_vm0, %v3940_v53, %v3942_v47  ;;  %v3944_v62 = vrot.slane %v9761_v17, 1  ;;  %v477_v41 = vmul.f32 %v9857_v38, %v7370_v19 }
  0xe1   : > { %7689 = vst [vmem:[#allocation2 + $0xa0] sm:$0xff] %v7486_v44   ;;  %v934_v63 = vadd.f32 %v877_v50, %v471_v11  ;;  %v933_v55 = vadd.f32 %v876_v51, %v470_v39  ;;  %v3488_v4 = vsel %vm1439_vm1, %v3483_v58, %v3487_v60  ;;  %v3493_v9 = vshll.u32 %v9871_v61, 16  ;;  %v7667_v11 = vld [vmem:[%s9595_s18 + $0xc8] sm:$0xff]  }
  0xe2   : > { %v771_v2 = vpop.permute.xlu1 %770  ;;  %v766_v3 = vpop.permute.xlu0 %765  ;;  %8340 = vmatprep.mubr.bf16.mxu0 %v3488_v4  ;;  %v3491_v59 = vor.u32 %v3489_v8, %v3487_v60  ;;  %v3497_v37 = vshrl.u32 %v9871_v61, 16  ;;  %v9900_v40 = vsel %vm2251_vm0, %v3942_v47, %v3944_v62  ;;  %v7374_v12 = vunpack.c.h.bf16 %v7667_v11 }
  0xe3   : > { %v7491_v10 = vpack.c.bf16 %v934_v63, %v933_v55  ;;  %v879_v13 = vmul.f32 %v9866_v49, %v771_v2  ;;  %v878_v33 = vmul.f32 %v9866_v49, %v766_v3  ;;  %v3495_v15 = vrot.slane %v3493_v9, 1  ;;  %v7668_v3 = vld [vmem:[%s9595_s18 + $0xd0] sm:$0xff]  }
  0xe4   : > { %v9883_v21 = vld [vmem:[#allocation2 + $0x94] sm:$0xff]   ;;  %v476_v51 = vmul.f32 %v9857_v38, %v7369_v27  ;;  %v7373_v52 = vunpack.c.l.bf16 %v7667_v11  ;;  %v479_v4 = vmul.f32 %v9857_v38, %v7374_v12  ;;  %v7378_v11 = vunpack.c.h.bf16 %v7668_v3 }
  0xe5   : > { %7690 = vst [vmem:[#allocation2 + $0xa8] sm:$0xff] %v7491_v10   ;;  %v936_v25 = vadd.f32 %v879_v13, %v473_v54  ;;  %v935_v26 = vadd.f32 %v878_v33, %v472_v24  ;;  %v3496_v31 = vsel %vm1439_vm1, %v3491_v59, %v3495_v15  ;;  %v3501_v39 = vshll.u32 %v9883_v21, 16  ;;  %v7272_v54 = vld [vmem:[%s9595_s18] sm:$0xff]   ;;  %v7669_v12 = vld [vmem:[%s9595_s18 + $0xd8] sm:$0xff]  }
  0xe6   : > { %v781_v28 = vpop.permute.xlu1 %780  ;;  %v776_v29 = vpop.permute.xlu0 %775  ;;  %8341 = vmatmul.mubr.bf16.gmra.mrb[28].mxu0 %v3496_v31  ;;  %v3499_v16 = vor.u32 %v3497_v37, %v3495_v15  ;;  %v3505_v55 = vshrl.u32 %v9883_v21, 16  ;;  %v7274_v9 = vunpack.c.h.bf16 %v7272_v54  ;;  %v7273_v59 = vunpack.c.l.bf16 %v7272_v54 }
  0xe7   : > { %v7496_v36 = vpack.c.bf16 %v936_v25, %v935_v26  ;;  %v881_v53 = vmul.f32 %v9866_v49, %v781_v28  ;;  %v880_v20 = vmul.f32 %v9866_v49, %v776_v29  ;;  %v3503_v42 = vrot.slane %v3501_v39, 1 }
  0xe8   : > { %v9903_v43 = vld [vmem:[#allocation2 + $0x9c] sm:$0xff]   ;;  %v7377_v37 = vunpack.c.l.bf16 %v7668_v3  ;;  %v429_v39 = vmul.f32 %v9857_v38, %v7274_v9  ;;  %v481_v54 = vmul.f32 %v9857_v38, %v7378_v11  ;;  %v7381_v9 = vunpack.c.l.bf16 %v7669_v12 }
  0xe9   : > { %7691 = vst [vmem:[#allocation2 + $0xb0] sm:$0xff] %v7496_v36   ;;  %v938_v44 = vadd.f32 %v881_v53, %v475_v7  ;;  %v937_v50 = vadd.f32 %v880_v20, %v474_v14  ;;  %v3504_v63 = vsel %vm1439_vm1, %v3499_v16, %v3503_v42  ;;  %v3509_v24 = vshll.u32 %v9903_v43, 16 }
  0xea   : > { %v791_v58 = vpop.permute.xlu1 %790  ;;  %v786_v60 = vpop.permute.xlu0 %785  ;;  %8344 = vmatprep.mubr.bf16.mxu0 %v3504_v63  ;;  %v3507_v7 = vor.u32 %v3505_v55, %v3503_v42  ;;  %v478_v14 = vmul.f32 %v9857_v38, %v7373_v52  ;;  %v3513_v26 = vshrl.u32 %v9903_v43, 16  ;;  %v428_v42 = vmul.f32 %v9857_v38, %v7273_v59 }
  0xeb   : > { %v7501_v0 = vpack.c.bf16 %v938_v44, %v937_v50  ;;  %v883_v47 = vmul.f32 %v9866_v49, %v791_v58  ;;  %v882_v2 = vmul.f32 %v9866_v49, %v786_v60  ;;  %v3511_v8 = vrot.slane %v3509_v24, 1 }
  0xec   : > { %v9914_v10 = vld [vmem:[#allocation2 + $0xa4] sm:$0xff]   ;;  %v3946_v44 = vrot.slane %v9784_v35, 1 }
  0xed   : > { %7692 = vst [vmem:[#allocation2 + $0xb8] sm:$0xff] %v7501_v0   ;;  %v940_v13 = vadd.f32 %v883_v47, %v477_v41  ;;  %v939_v33 = vadd.f32 %v882_v2, %v476_v51  ;;  %v3512_v25 = vsel %vm1439_vm1, %v3507_v7, %v3511_v8  ;;  %v3517_v27 = vshll.u32 %v9914_v10, 16 }
  0xee   : > { %v801_v15 = vpop.permute.xlu1 %800  ;;  %v796_v19 = vpop.permute.xlu0 %795  ;;  %8345 = vmatmul.mubr.bf16.gmra.mrb[32].mxu0 %v3512_v25  ;;  %v3515_v36 = vor.u32 %v3513_v26, %v3511_v8  ;;  %v3521_v58 = vshrl.u32 %v9914_v10, 16  ;;  %v480_v0 = vmul.f32 %v9857_v38, %v7377_v37  ;;  %v7382_v2 = vunpack.c.h.bf16 %v7669_v12 }
  0xef   : > { %v7506_v28 = vpack.c.bf16 %v940_v13, %v939_v33  ;;  %v885_v29 = vmul.f32 %v9866_v49, %v801_v15  ;;  %v884_v31 = vmul.f32 %v9866_v49, %v796_v19  ;;  %v3519_v53 = vrot.slane %v3517_v27, 1 }
  0xf0   : > { %v9923_v20 = vld [vmem:[#allocation2 + $0xac] sm:$0xff]   ;;  %v3948_v13 = vrot.slane %v9799_v1, 1  ;;  %v483_v27 = vmul.f32 %v9857_v38, %v7382_v2  ;;  %v3954_v1 = vrot.slane %v9841_v5, 1 }
  0xf1   : > { %7693 = vst [vmem:[#allocation2 + $0xc0] sm:$0xff] %v7506_v28   ;;  %v942_v41 = vadd.f32 %v885_v29, %v479_v4  ;;  %v941_v16 = vadd.f32 %v884_v31, %v478_v14  ;;  %v3520_v52 = vsel %vm1439_vm1, %v3515_v36, %v3519_v53  ;;  %v3525_v60 = vshll.u32 %v9923_v20, 16  ;;  %v9957_v36 = vld [vmem:[#allocation2 + $0x8] sm:$0xff]  }
  0xf2   : > { %v551_v50 = vpop.permute.xlu1 %550  ;;  %v546_v51 = vpop.permute.xlu0 %545  ;;  %8348 = vmatprep.mubr.bf16.mxu0 %v3520_v52  ;;  %v3523_v47 = vor.u32 %v3521_v58, %v3519_v53  ;;  %v9940_v4 = vsel %vm2251_vm0, %v3944_v62, %v3946_v44  ;;  %v3529_v15 = vshrl.u32 %v9923_v20, 16  ;;  %v9951_v26 = vsel %vm2251_vm0, %v3946_v44, %v3948_v13 }
  0xf3   : > { %v7511_v63 = vpack.c.bf16 %v942_v41, %v941_v16  ;;  %v835_v55 = vmul.f32 %v9866_v49, %v551_v50  ;;  %v834_v24 = vmul.f32 %v9866_v49, %v546_v51  ;;  %v3527_v35 = vrot.slane %v3525_v60, 1 }
  0xf4   : > { %v9935_v3 = vld [vmem:[#allocation2 + $0xb4] sm:$0xff]  }
  0xf5   : > { %7694 = vst [vmem:[#allocation2 + $0xc8] sm:$0xff] %v7511_v63   ;;  %v892_v7 = vadd.f32 %v835_v55, %v429_v39  ;;  %v891_v8 = vadd.f32 %v834_v24, %v428_v42  ;;  %v3528_v59 = vsel %vm1439_vm1, %v3523_v47, %v3527_v35  ;;  %v3533_v19 = vshll.u32 %v9935_v3, 16  ;;  %v9969_v24 = vld [vmem:[#allocation2 + $0x10] sm:$0xff]  }
  0xf6   : > { %v811_v33 = vpop.permute.xlu1 %810  ;;  %v806_v14 = vpop.permute.xlu0 %805  ;;  %8349 = vmatmul.mubr.bf16.gmra.mrb[36].mxu0 %v3528_v59  ;;  %v3531_v11 = vor.u32 %v3529_v15, %v3527_v35  ;;  %v482_v39 = vmul.f32 %v9857_v38, %v7381_v9  ;;  %v3537_v42 = vshrl.u32 %v9935_v3, 16  ;;  %v1448_v55 = vshll.u32 %v9957_v36, 16 }
  0xf7   : > { %v7386_v25 = vpack.c.bf16 %v892_v7, %v891_v8  ;;  %v887_v17 = vmul.f32 %v9866_v49, %v811_v33  ;;  %v886_v62 = vmul.f32 %v9866_v49, %v806_v14  ;;  %v3535_v28 = vrot.slane %v3533_v19, 1  ;;  %v9975_v8 = vld [vmem:[#allocation2 + $0x18] sm:$0xff]  }
  0xf8   : > { %v9954_v29 = vld [vmem:[#allocation2 + $0xbc] sm:$0xff]  }
  0xf9   : > { %7387 = vst [vmem:[#allocation2] sm:$0xff] %v7386_v25   ;;  %v944_v31 = vadd.f32 %v887_v17, %v481_v54  ;;  %v943_v37 = vadd.f32 %v886_v62, %v480_v0  ;;  %v3536_v16 = vsel %vm1439_vm1, %v3531_v11, %v3535_v28  ;;  %v3541_v12 = vshll.u32 %v9954_v29, 16 }
  0xfa   : > { %v821_v53 = vpop.permute.xlu1 %820  ;;  %v816_v41 = vpop.permute.xlu0 %815  ;;  %8352 = vmatprep.mubr.bf16.mxu0 %v3536_v16  ;;  %v3539_v52 = vor.u32 %v3537_v42, %v3535_v28  ;;  %v3545_v35 = vshrl.u32 %v9954_v29, 16  ;;  %v1456_v25 = vshll.u32 %v9969_v24, 16  ;;  %v3950_v17 = vrot.slane %v9809_v23, 1  ;;  %v9992_v23 = vld [vmem:[#allocation2 + $0x20] sm:$0xff]  }
  0xfb   : > { %v7516_v44 = vpack.c.bf16 %v944_v31, %v943_v37  ;;  %v889_v50 = vmul.f32 %v9866_v49, %v821_v53  ;;  %v888_v51 = vmul.f32 %v9866_v49, %v816_v41  ;;  %v3543_v54 = vrot.slane %v3541_v12, 1 }
  0xfc   : > { %v9964_v58 = vld [vmem:[#allocation2 + $0xc4] sm:$0xff]   ;;  %v9966_v63 = vld [vmem:[#allocation2 + $0xcc] ss:$0 sps:$4 sm:$0x11]   ;;  %v1450_v11 = vrot.slane %v1448_v55, 1  ;;  %v3952_v28 = vrot.slane %v9821_v46, 1 }
  0xfd   : > { %7695 = vst [vmem:[#allocation2 + $0xd0] sm:$0xff] %v7516_v44   ;;  %v946_v38 = vadd.f32 %v889_v50, %v483_v27  ;;  %v945_v60 = vadd.f32 %v888_v51, %v482_v39  ;;  %v3544_v47 = vsel %vm1439_vm1, %v3539_v52, %v3543_v54  ;;  %v3549_v49 = vshll.u32 %v9964_v58, 16  ;;  %v9136_v55 = vld [vmem:[%s10820_s4 + $0x8] sm:$0xff]  }
  0xfe   : > { %v826_v0 = vpop.permute.xlu0 %825  ;;  %8353 = vmatmul.mubr.bf16.gmra.mrb[40].mxu0 %v3544_v47  ;;  %v3553_v7 = vshrl.u32 %v9964_v58, 16  ;;  %v3547_v9 = vor.u32 %v3545_v35, %v3543_v54  ;;  %v3557_v14 = vshll.u32 %v9966_v63, 16  ;;  %v1464_v37 = vshll.u32 %v9975_v8, 16 }
  0xff   : > { %v7521_v2 = vpack.c.bf16 %v946_v38, %v945_v60  ;;  %v3551_v33 = vrot.slane %v3549_v49, 1  ;;  %v9989_v39 = vsel %vm2251_vm0, %v3948_v13, %v3950_v17  ;;  %v1452_v41 = vshrl.u32 %v9957_v36, 16  ;;  %v10002_v38 = vld [vmem:[#allocation2 + $0x28] sm:$0xff]  }
 0x100   : > { %v1234_v59 = vld [vmem:[#allocation2] sm:$0xf]  ;;  %v1235_v15 = vld [vmem:[#allocation2 + $0x4] sm:$0xf]  ;;  %v3559_v53 = vrot.slane %v3557_v14, 1  ;;  %v9995_v16 = vsel %vm2251_vm0, %v3950_v17, %v3952_v28  ;;  %v1458_v12 = vrot.slane %v1456_v25, 1  ;;  %v10010_v0 = vsel %vm2251_vm0, %v3952_v28, %v3954_v1 }
 0x101   : > { %7696 = vst [vmem:[#allocation2 + $0xd8] sm:$0xff] %v7521_v2   ;;  %v9978_v19 = vcombine.low %v1234_v59, %v1235_v15  ;;  %v3552_v62 = vsel %vm1439_vm1, %v3547_v9, %v3551_v33  ;;  %v3555_v27 = vor.u32 %v3553_v7, %v3551_v33  ;;  %v1454_v50 = vor.u32 %v1452_v41, %v1450_v11  ;;  %v9137_v9 = vld [vmem:[%s10820_s4 + $0x188] sm:$0xff]   ;;  %v9285_v33 = vld [vmem:[%s10820_s4] sm:$0xff]   ;;  %v10027_v14 = vld [vmem:[#allocation2 + $0x30] sm:$0xff]  }
 0x102   : > { %8356 = vmatprep.mubr.bf16.mxu0 %v3552_v62  ;;  %v3956_v13 = vrot.slane %v9852_v30, 1  ;;  %v1460_v52 = vshrl.u32 %v9969_v24, 16  ;;  %v1466_v54 = vrot.slane %v1464_v37, 1  ;;  %v1472_v60 = vshll.u32 %v9992_v23, 16  ;;  %v10037_v17 = vld [vmem:[#allocation2 + $0x38] sm:$0xff]   ;;  %v9141_v62 = vld [vmem:[%s10820_s4 + $0x10] sm:$0xff]  }
 0x103   : > { %v1443_v31 = vshll.u32 %v9978_v19, 16  ;;  %v1441_v46 = vshrl.u32 %v9978_v19, 16  ;;  %v3560_v44 = vsel %vm1439_vm1, %v3555_v27, %v3559_v53  ;;  %v1459_v35 = vsel %vm1439_vm1, %v1454_v50, %v1458_v12 }
 0x104   : > { %v10013_v5 = vsel %vm2251_vm0, %v3954_v1, %v3956_v13  ;;  %v1462_v47 = vor.u32 %v1460_v52, %v1458_v12  ;;  %v3960_v49 = vrot.slane %v9883_v21, 1  ;;  %v1480_v7 = vshll.u32 %v10002_v38, 16  ;;  %v10072_v1 = vld [vmem:[#allocation2 + $0x40] sm:$0xff]  }
 0x105   : > { %v1445_v42 = vrot.slane %v1443_v31, 1  ;;  %v1474_v21 = vrot.slane %v1472_v60, 1  ;;  %v3962_v15 = vrot.slane %v9903_v43, 1  ;;  %v1468_v25 = vshrl.u32 %v9975_v8, 16 }
 0x106   : > { %8357 = vmatmul.mubr.bf16.gmra.mrb[44].mxu0 %v3560_v44  ;;  %v1467_v2 = vsel %vm1439_vm1, %v1462_v47, %v1466_v54  ;;  %v3964_v27 = vrot.slane %v9914_v10, 1  ;;  %v1482_v28 = vrot.slane %v1480_v7, 1  ;;  %v1488_v41 = vshll.u32 %v10027_v14, 16 }
 0x107   : > { %v1446_v51 = vor.u32 %v1445_v42, %v1441_v46  ;;  %8376 = vmatprep.mubr.bf16.mxu0 %v9657_v56  ;;  %v3958_v56 = vrot.slane %v9871_v61, 1  ;;  %v10046_v31 = vsel %vm2251_vm0, %v3960_v49, %v3962_v15  ;;  %v1470_v43 = vor.u32 %v1468_v25, %v1466_v54  ;;  %v9151_v54 = vld [vmem:[%s10820_s4 + $0x20] sm:$0xff]  }
 0x108   : > { %v10051_v37 = vsel %vm2251_vm0, %v3962_v15, %v3964_v27  ;;  %v3966_v10 = vrot.slane %v9923_v20, 1  ;;  %v3968_v46 = vrot.slane %v9935_v3, 1  ;;  %v1496_v12 = vshll.u32 %v10037_v17, 16  ;;  %v9157_v15 = vld [vmem:[%s10820_s4 + $0x1a8] sm:$0xff]  }
 0x109   : > { %v1451_v30 = vsel %vm1439_vm1, %v1446_v51, %v1450_v11  ;;  %v10030_v61 = vsel %vm2251_vm0, %v3956_v13, %v3958_v56  ;;  %v10033_v59 = vsel %vm2251_vm0, %v3958_v56, %v3960_v49  ;;  %v1476_v11 = vshrl.u32 %v9992_v23, 16  ;;  %v9147_v13 = vld [vmem:[%s10820_s4 + $0x198] sm:$0xff]  }
 0x10a   : > { %8056 = vmatprep.mubr.bf16.mxu1 %v1451_v30  ;;  %v10066_v44 = vsel %vm2251_vm0, %v3964_v27, %v3966_v10  ;;  %v10069_v50 = vsel %vm2251_vm0, %v3966_v10, %v3968_v46  ;;  %v3970_v20 = vrot.slane %v9954_v29, 1  ;;  %v1490_v3 = vrot.slane %v1488_v41, 1  ;;  %v10087_v30 = vld [vmem:[#allocation2 + $0x48] sm:$0xff]   ;;  %v9161_v27 = vld [vmem:[%s10820_s4 + $0x30] sm:$0xff]  }
 0x10b   : > { %8057 = vmatmul.mubr.bf16.vlgmr.msra.gmra.mrb[0].mxu1 %v1459_v35  ;;  %v1478_v53 = vor.u32 %v1476_v11, %v1474_v21  ;;  %v3972_v51 = vrot.slane %v9964_v58, 1  ;;  %v1484_v52 = vshrl.u32 %v10002_v38, 16  ;;  %v1492_v60 = vshrl.u32 %v10027_v14, 16 }
 0x10c   : > { %8060 = vmatprep.mubr.bf16.mxu1 %v1467_v2  ;;  %8105 = vmatpush3.bf16.msra.mxu1 %v9285_v33  ;;  %v10083_v29 = vsel %vm2251_vm0, %v3968_v46, %v3970_v20  ;;  %v3974_v58 = vrot.slane %v9966_v63, 1  ;;  %v1504_v49 = vshll.u32 %v10072_v1, 16  ;;  %v10107_v33 = vld [vmem:[#allocation2 + $0x50] sm:$0xff]   ;;  %v1500_v25 = vshrl.u32 %v10037_v17, 16 }
 0x10d   : > { %8106 = vmatprep.subr.bf16.mxu1 %v9136_v55  ;;  %v1483_v42 = vsel %vm1439_vm1, %v1478_v53, %v1482_v28  ;;  %v10090_v47 = vsel %vm2251_vm0, %v3970_v20, %v3972_v51  ;;  %v1486_v35 = vor.u32 %v1484_v52, %v1482_v28  ;;  %v1494_v56 = vor.u32 %v1492_v60, %v1490_v3  ;;  %v10140_v20 = vld [vmem:[%s10820_s4 + $0x80] sm:$0xff]  }
 0x10e   : > { %8377 = vmatmul.mubr.bf16.vlgmr.msra.gmra.mrb[0].mxu0 %v9702_v57  ;;  %v9142_v57 = vld [vmem:[%s10820_s4 + $0x190] sm:$0xff]   ;;  %v10099_v2 = vsel %vm2251_vm0, %v3972_v51, %v3974_v58  ;;  %v1508_v11 = vshrl.u32 %v10072_v1, 16  ;;  %v1520_v41 = vshll.u32 %v10107_v33, 16  ;;  %v10144_v51 = vld [vmem:[#allocation2 + $0x68] sm:$0xff]  }
 0x10f   : > { %8425 = vmatpush3.bf16.msra.mxu0 %v9790_v45  ;;  %8380 = vmatprep.mubr.bf16.mxu0 %v9717_v6  ;;  %v1475_v45 = vsel %vm1439_vm1, %v1470_v43, %v1474_v21  ;;  %v9146_v6 = vld [vmem:[%s10820_s4 + $0x18] sm:$0xff]   ;;  %v1491_v7 = vsel %vm1439_vm1, %v1486_v35, %v1490_v3  ;;  %v1506_v21 = vrot.slane %v1504_v49, 1  ;;  %v1524_v3 = vshrl.u32 %v10107_v33, 16 }
 0x110   : > { %8426 = vmatprep.subr.bf16.mxu0 %v9137_v9  ;;  %8107 = vmatpush3.bf16.msra.mxu1 %v9136_v55  ;;  %v1498_v55 = vrot.slane %v1496_v12, 1  ;;  %v1516_v12 = vshrl.u32 %v10087_v30, 16 }
 0x111   : > { %8108 = vmatprep.subr.bf16.mxu1 %v9141_v62  ;;  %v1510_v53 = vor.u32 %v1508_v11, %v1506_v21  ;;  %v10170_v11 = vld [vmem:[#allocation2 + $0x80] sm:$0xff]  }
 0x112   : > { %v1499_v63 = vsel %vm1439_vm1, %v1494_v56, %v1498_v55  ;;  %v1502_v43 = vor.u32 %v1500_v25, %v1498_v55  ;;  %v10151_v55 = vld [vmem:[%s10820_s4 + $0x1c0] sm:$0xff]   ;;  %v10157_v56 = vld [vmem:[#allocation2 + $0x70] sm:$0xff]  }
 0x113   : > { %8061 = vmatmul.mubr.bf16.gmra.mrb[4].mxu1 %v1475_v45  ;;  %8427 = vmatpush3.bf16.msra.mxu0 %v9137_v9  ;;  %v1512_v9 = vshll.u32 %v10087_v30, 16  ;;  %v1522_v45 = vrot.slane %v1520_v41, 1  ;;  %v10177_v41 = vld [vmem:[#allocation2 + $0x90] sm:$0xff]  }
 0x114   : > { %8064 = vmatprep.mubr.bf16.mxu1 %v1483_v42  ;;  %8428 = vmatprep.subr.bf16.mxu0 %v9142_v57  ;;  %v1507_v10 = vsel %vm1439_vm1, %v1502_v43, %v1506_v21  ;;  %v9167_v42 = vld [vmem:[%s10820_s4 + $0x1b8] sm:$0xff]   ;;  %v1552_v21 = vshll.u32 %v10157_v56, 16  ;;  %v1548_v43 = vshrl.u32 %v10144_v51, 16 }
 0x115   : > { %8109 = vmatpush3.bf16.msra.mxu1 %v9141_v62  ;;  %v10113_v62 = vld [vmem:[#allocation2 + $0x58] sm:$0xff]   ;;  %v1514_v28 = vrot.slane %v1512_v9, 1 }
 0x116   : > { %8110 = vmatprep.subr.bf16.mxu1 %v9146_v6  ;;  %8381 = vmatmul.mubr.bf16.gmra.mrb[4].mxu0 %v9766_v18  ;;  %v9152_v18 = vld [vmem:[%s10820_s4 + $0x1a0] sm:$0xff]   ;;  %v1528_v46 = vshll.u32 %v10113_v62, 16  ;;  %v1532_v49 = vshrl.u32 %v10113_v62, 16 }
 0x117   : > { %8384 = vmatprep.mubr.bf16.mxu0 %v9781_v32  ;;  %8429 = vmatpush3.bf16.msra.mxu0 %v9142_v57  ;;  %v9156_v32 = vld [vmem:[%s10820_s4 + $0x28] sm:$0xff]   ;;  %v9162_v57 = vld [vmem:[%s10820_s4 + $0x1b0] sm:$0xff]   ;;  %v1518_v52 = vor.u32 %v1516_v12, %v1514_v28 }
 0x118   : > { %8430 = vmatprep.subr.bf16.mxu0 %v9147_v13 }
 0x119   : > { %8111 = vmatpush3.bf16.msra.mxu1 %v9146_v6  ;;  %v10131_v6 = vld [vmem:[#allocation2 + $0x60] sm:$0xff]  }
 0x11a   : > { %8112 = vmatprep.subr.bf16.mxu1 %v9151_v54  ;;  %v1536_v60 = vshll.u32 %v10131_v6, 16 }
 0x11b   : > { %8065 = vmatmul.mubr.bf16.gmra.mrb[8].mxu1 %v1491_v7  ;;  %8431 = vmatpush3.bf16.msra.mxu0 %v9147_v13  ;;  %v1530_v13 = vrot.slane %v1528_v46, 1  ;;  %v1540_v7 = vshrl.u32 %v10131_v6, 16  ;;  %v10182_v46 = vld [vmem:[#allocation2 + $0x98] sm:$0xff]  }
 0x11c   : > { %8068 = vmatprep.mubr.bf16.mxu1 %v1499_v63  ;;  %8432 = vmatprep.subr.bf16.mxu0 %v9152_v18  ;;  %v1538_v35 = vrot.slane %v1536_v60, 1 }
 0x11d   : > { %8113 = vmatpush3.bf16.msra.mxu1 %v9151_v54  ;;  %v1526_v54 = vor.u32 %v1524_v3, %v1522_v45  ;;  %v1534_v63 = vor.u32 %v1532_v49, %v1530_v13 }
 0x11e   : > { %8114 = vmatprep.subr.bf16.mxu1 %v9156_v32  ;;  %8385 = vmatmul.mubr.bf16.gmra.mrb[8].mxu0 %v9826_v48  ;;  %v9166_v48 = vld [vmem:[%s10820_s4 + $0x38] sm:$0xff]   ;;  %v1542_v9 = vor.u32 %v1540_v7, %v1538_v35  ;;  %v10199_v7 = vld [vmem:[#allocation2 + $0xa8] sm:$0xff]  }
 0x11f   : > { %8388 = vmatprep.mubr.bf16.mxu0 %v9838_v34  ;;  %8433 = vmatpush3.bf16.msra.mxu0 %v9152_v18  ;;  %v1515_v34 = vsel %vm1439_vm1, %v1510_v53, %v1514_v28  ;;  %v1531_v58 = vsel %vm1439_vm1, %v1526_v54, %v1530_v13  ;;  %v10161_v18 = vld [vmem:[#allocation2 + $0x78] sm:$0xff]   ;;  %v10172_v28 = vld [vmem:[#allocation2 + $0x88] sm:$0xff]   ;;  %v10190_v54 = vld [vmem:[#allocation2 + $0xa0] sm:$0xff]  }
 0x120   : > { %8434 = vmatprep.subr.bf16.mxu0 %v9157_v15  ;;  %v1564_v13 = vshrl.u32 %v10161_v18, 16  ;;  %v1580_v60 = vshrl.u32 %v10172_v28, 16 }
 0x121   : > { %8115 = vmatpush3.bf16.msra.mxu1 %v9156_v32 }
 0x122   : > { %8116 = vmatprep.subr.bf16.mxu1 %v9161_v27 }
 0x123   : > { %8069 = vmatmul.mubr.bf16.gmra.mrb[12].mxu1 %v1507_v10  ;;  %8435 = vmatpush3.bf16.msra.mxu0 %v9157_v15  ;;  %v1539_v15 = vsel %vm1439_vm1, %v1534_v63, %v1538_v35  ;;  %v1568_v10 = vshll.u32 %v10170_v11, 16  ;;  %v10203_v63 = vld [vmem:[#allocation2 + $0x38] sm:$0xff]  }
 0x124   : > { %8072 = vmatprep.mubr.bf16.mxu1 %v1515_v34  ;;  %8436 = vmatprep.subr.bf16.mxu0 %v9162_v57  ;;  %v1576_v34 = vshll.u32 %v10172_v28, 16 }
 0x125   : > { %8117 = vmatpush3.bf16.msra.mxu1 %v9161_v27  ;;  %v1560_v27 = vshll.u32 %v10161_v18, 16  ;;  %v1570_v12 = vrot.slane %v1568_v10, 1  ;;  %v10219_v10 = vld [vmem:[#allocation2 + $0x58] sm:$0xff]  }
 0x126   : > { %8118 = vmatprep.subr.bf16.mxu1 %v9166_v48  ;;  %8389 = vmatmul.mubr.bf16.gmra.mrb[12].mxu0 %v9888_v22  ;;  %v1523_v22 = vsel %vm1439_vm1, %v1518_v52, %v1522_v45  ;;  %v1578_v3 = vrot.slane %v1576_v34, 1  ;;  %v1572_v52 = vshrl.u32 %v10170_v11, 16  ;;  %10847 = vst [vmem:[#allocation6_spill] sm:$0xff] %v10219_v10  ;;  %v10223_v34 = vld [vmem:[#allocation2 + $0x68] sm:$0xff]  }
 0x127   : > { %8392 = vmatprep.mubr.bf16.mxu0 %v9900_v40  ;;  %8437 = vmatpush3.bf16.msra.mxu0 %v9162_v57  ;;  %v1544_v40 = vshll.u32 %v10144_v51, 16  ;;  %v1562_v53 = vrot.slane %v1560_v27, 1  ;;  %10849 = vst [vmem:[#allocation8_spill] sm:$0xff] %v10223_v34 }
 0x128   : > { %8438 = vmatprep.subr.bf16.mxu0 %v9167_v42  ;;  %v1574_v49 = vor.u32 %v1572_v52, %v1570_v12  ;;  %v5609_v52 = vrot.slane %v10203_v63, 1 }
 0x129   : > { %8119 = vmatpush3.bf16.msra.mxu1 %v9166_v48  ;;  %v1546_v32 = vrot.slane %v1544_v40, 1  ;;  %v10196_v40 = vld [vmem:[#allocation2 + $0x28] sm:$0xff]   ;;  %v1566_v35 = vor.u32 %v1564_v13, %v1562_v53 }
 0x12a   : > { %8168 = vmatprep.subr.bf16.mxu1 %v10140_v20 }
 0x12b   : > { %8073 = vmatmul.mubr.bf16.gmra.mrb[16].mxu1 %v1523_v22  ;;  %8439 = vmatpush3.bf16.msra.mxu0 %v9167_v42  ;;  %v1547_v25 = vsel %vm1439_vm1, %v1542_v9, %v1546_v32  ;;  %v1550_v57 = vor.u32 %v1548_v43, %v1546_v32  ;;  %v1584_v42 = vshll.u32 %v10177_v41, 16  ;;  %v10201_v32 = vld [vmem:[#allocation2 + $0x30] sm:$0xff]   ;;  %v1582_v9 = vor.u32 %v1580_v60, %v1578_v3 }
 0x12c   : > { %8076 = vmatprep.mubr.bf16.mxu1 %v1531_v58  ;;  %8488 = vmatprep.subr.bf16.mxu0 %v10151_v55  ;;  %v10194_v58 = vld [vmem:[#allocation2 + $0x20] sm:$0xff]   ;;  %v1571_v27 = vsel %vm1439_vm1, %v1566_v35, %v1570_v12  ;;  %v1600_v43 = vshll.u32 %v10190_v54, 16  ;;  %v1608_v12 = vshll.u32 %v10199_v7, 16  ;;  %v5607_v13 = vrot.slane %v10201_v32, 1  ;;  %v10239_v35 = vld [vmem:[#allocation2 + $0x88] sm:$0xff]  }
 0x12d   : > { %v1586_v22 = vrot.slane %v1584_v42, 1 }
 0x12e   : > { %8393 = vmatmul.mubr.bf16.gmra.mrb[16].mxu0 %v9940_v4  ;;  %v1554_v4 = vrot.slane %v1552_v21, 1 }
 0x12f   : > { %8396 = vmatprep.mubr.bf16.mxu0 %v9951_v26  ;;  %v1556_v26 = vshrl.u32 %v10157_v56, 16 }
 0x130   : > { %v1555_v45 = vsel %vm1439_vm1, %v1550_v57, %v1554_v4 }
 0x131   : > { %v1558_v48 = vor.u32 %v1556_v26, %v1554_v4  ;;  %v10216_v26 = vld [vmem:[#allocation2 + $0x50] sm:$0xff]  }
 0x132   : > { %10846 = vst [vmem:[#allocation5_spill] sm:$0xff] %v10216_v26  ;;  %v5615_v4 = vrot.slane %v10216_v26, 1 }
 0x133   : > { %8077 = vmatmul.mubr.bf16.gmra.mrb[20].mxu1 %v1539_v15  ;;  %v10208_v15 = vld [vmem:[#allocation2 + $0x40] sm:$0xff]  }
 0x134   : > { %8080 = vmatprep.mubr.bf16.mxu1 %v1547_v25  ;;  %10844 = vst [vmem:[#allocation3_spill] sm:$0xff] %v10208_v15  ;;  %v10210_v25 = vld [vmem:[#allocation2 + $0x48] sm:$0xff]  }
 0x135   : > { %10845 = vst [vmem:[#allocation4_spill] sm:$0xff] %v10210_v25 }
 0x136   : > { %8397 = vmatmul.mubr.bf16.gmra.mrb[20].mxu0 %v9989_v39  ;;  %v1563_v39 = vsel %vm1439_vm1, %v1558_v48, %v1562_v53  ;;  %v1587_v53 = vsel %vm1439_vm1, %v1582_v9, %v1586_v22  ;;  %v10221_v48 = vld [vmem:[#allocation2 + $0x60] sm:$0xff]   ;;  %v5611_v9 = vrot.slane %v10208_v15, 1 }
 0x137   : > { %8400 = vmatprep.mubr.bf16.mxu0 %v9995_v16  ;;  %v1592_v16 = vshll.u32 %v10182_v46, 16  ;;  %10848 = vst [vmem:[#allocation7_spill] sm:$0xff] %v10221_v48 }
 0x139   : > { %v10206_v21 = vrot.slane %v1592_v16, 1  ;;  %v10231_v16 = vld [vmem:[#allocation2 + $0x78] sm:$0xff]  }
 0x13a   : > { %10851 = vst [vmem:[#allocation10_spill] sm:$0xff] %v10231_v16 }
 0x13b   : > { %8081 = vmatmul.mubr.bf16.gmra.mrb[24].mxu1 %v1555_v45  ;;  %v10825_v45 = vrot.slane %v10194_v58, 1 }
 0x13c   : > { %8084 = vmatprep.mubr.bf16.mxu1 %v1563_v39  ;;  %v5605_v39 = vrot.slane %v10196_v40, 1 }
 0x13e   : > { %8401 = vmatmul.mubr.bf16.gmra.mrb[24].mxu0 %v10010_v0  ;;  %v1588_v0 = vshrl.u32 %v10177_v41, 16  ;;  %v10253_v42 = vsel %vm2251_vm0, %v5605_v39, %v5607_v13 }
 0x13f   : > { %8404 = vmatprep.mubr.bf16.mxu0 %v10013_v5  ;;  %v1579_v5 = vsel %vm1439_vm1, %v1574_v49, %v1578_v3  ;;  %v10229_v3 = vld [vmem:[#allocation2 + $0x70] sm:$0xff]   ;;  %v10244_v49 = vsel %vm2251_vm0, %v10825_v45, %v5605_v39  ;;  %10853 = vst [vmem:[#allocation12_spill] sm:$0xff] %v10253_v42  ;;  %v10260_v45 = vld [vmem:[#allocation2 + $0x98] sm:$0xff]   ;;  %v5617_v39 = vrot.slane %v10219_v10, 1  ;;  %v5619_v42 = vrot.slane %v10221_v48, 1  ;;  %v10287_v48 = vld [vmem:[#allocation2 + $0xc8] sm:$0xff]  }
 0x140   : > { %v1590_v57 = vor.u32 %v1588_v0, %v1586_v22  ;;  %10850 = vst [vmem:[#allocation9_spill] sm:$0xff] %v10229_v3  ;;  %v10237_v22 = vld [vmem:[#allocation2 + $0x80] sm:$0xff]   ;;  %10852 = vst [vmem:[#allocation11_spill] sm:$0xff] %v10244_v49  ;;  %v5613_v0 = vrot.slane %v10210_v25, 1  ;;  %v10265_v25 = vsel %vm2251_vm0, %v5609_v52, %v5611_v9 }
 0x141   : > { %v10262_v49 = vld [vmem:[#allocation2 + $0xa0] sm:$0xff]   ;;  %10855 = vst [vmem:[#allocation14_spill] sm:$0xff] %v10265_v25  ;;  %v10293_v10 = vsel %vm2251_vm0, %v5617_v39, %v5619_v42  ;;  %v5627_v15 = vrot.slane %v10237_v22, 1 }
 0x142   : > { %v1595_v60 = vsel %vm1439_vm1, %v1590_v57, %v10206_v21  ;;  %v10256_v57 = vsel %vm2251_vm0, %v5607_v13, %v5609_v52  ;;  %v10273_v13 = vld [vmem:[#allocation2 + $0xa8] sm:$0xff]   ;;  %v10280_v26 = vsel %vm2251_vm0, %v5613_v0, %v5615_v4  ;;  %v5621_v52 = vrot.slane %v10223_v34, 1  ;;  %v10285_v25 = vld [vmem:[#allocation2 + $0xc0] sm:$0xff]   ;;  %10860 = vst [vmem:[#allocation19_spill] sm:$0xff] %v10293_v10 }
 0x143   : > { %8085 = vmatmul.mubr.bf16.gmra.mrb[28].mxu1 %v1571_v27  ;;  %v10248_v27 = vrot.slane %v1600_v43, 1  ;;  %10854 = vst [vmem:[#allocation13_spill] sm:$0xff] %v10256_v57  ;;  %v10268_v43 = vsel %vm2251_vm0, %v5611_v9, %v5613_v0  ;;  %v10275_v57 = vld [vmem:[#allocation2 + $0xb0] sm:$0xff]   ;;  %10858 = vst [vmem:[#allocation17_spill] sm:$0xff] %v10280_v26  ;;  %v5623_v9 = vrot.slane %v10229_v3, 1  ;;  %v5629_v0 = vrot.slane %v10239_v35, 1 }
 0x144   : > { %8088 = vmatprep.mubr.bf16.mxu1 %v1579_v5  ;;  %v10250_v5 = vld [vmem:[#allocation2 + $0x90] sm:$0xff]   ;;  %10856 = vst [vmem:[#allocation15_spill] sm:$0xff] %v10268_v43  ;;  %v5625_v43 = vrot.slane %v10231_v16, 1  ;;  %v10300_v3 = vsel %vm2251_vm0, %v5619_v42, %v5621_v52  ;;  %v5633_v42 = vrot.slane %v10260_v45, 1 }
 0x145   : > { %v10297_v26 = vld [vmem:[#allocation2 + $0xd0] sm:$0xff]   ;;  %10861 = vst [vmem:[#allocation20_spill] sm:$0xff] %v10300_v3  ;;  %v10303_v16 = vsel %vm2251_vm0, %v5621_v52, %v5623_v9  ;;  %v5635_v3 = vrot.slane %v10262_v49, 1 }
 0x146   : > { %8405 = vmatmul.mubr.bf16.gmra.mrb[28].mxu0 %v10030_v61  ;;  %v10277_v61 = vld [vmem:[#allocation2 + $0xb8] sm:$0xff]   ;;  %10862 = vst [vmem:[#allocation21_spill] sm:$0xff] %v10303_v16  ;;  %v10306_v34 = vsel %vm2251_vm0, %v5623_v9, %v5625_v43  ;;  %v10312_v10 = vsel %vm2251_vm0, %v5625_v43, %v5627_v15  ;;  %v5637_v9 = vrot.slane %v10273_v13, 1  ;;  %v10325_v16 = vld [vmem:[#allocation2 + $0xb0] sm:$0xff]  }
 0x147   : > { %8408 = vmatprep.mubr.bf16.mxu0 %v10033_v59  ;;  %10857 = vst [vmem:[#allocation16_spill] sm:$0xff] %v10277_v61  ;;  %v10290_v59 = vsel %vm2251_vm0, %v5615_v4, %v5617_v39  ;;  %10863 = vst [vmem:[#allocation22_spill] sm:$0xff] %v10306_v34  ;;  %v5631_v4 = vrot.slane %v10250_v5, 1  ;;  %v10309_v39 = vld [vmem:[#allocation2 + $0xd8] ss:$0 sps:$4 sm:$0x11]  }
 0x148   : > { %10859 = vst [vmem:[#allocation18_spill] sm:$0xff] %v10290_v59  ;;  %10864 = vst [vmem:[#allocation23_spill] sm:$0xff] %v10312_v10  ;;  %v10315_v59 = vsel %vm2251_vm0, %v5627_v15, %v5629_v0  ;;  %v5641_v34 = vrot.slane %v10277_v61, 1  ;;  %v10331_v15 = vsel %vm2251_vm0, %v5633_v42, %v5635_v3  ;;  %v5647_v61 = vrot.slane %v10297_v26, 1 }
 0x149   : > { %10865 = vst [vmem:[#allocation24_spill] sm:$0xff] %v10315_v59  ;;  %v10320_v52 = vsel %vm2251_vm0, %v5629_v0, %v5631_v4  ;;  %v10328_v43 = vsel %vm2251_vm0, %v5631_v4, %v5633_v42  ;;  %10868 = vst [vmem:[#allocation27_spill] sm:$0xff] %v10331_v15  ;;  %v5643_v59 = vrot.slane %v10285_v25, 1  ;;  %v10336_v0 = vsel %vm2251_vm0, %v5635_v3, %v5637_v9  ;;  %v10346_v42 = vld [vmem:[#allocation2 + $0xb8] sm:$0xff]  }
 0x14a   : > { %10866 = vst [vmem:[#allocation25_spill] sm:$0xff] %v10320_v52  ;;  %10867 = vst [vmem:[#allocation26_spill] sm:$0xff] %v10328_v43  ;;  %v1610_v4 = vrot.slane %v1608_v12, 1  ;;  %v5649_v3 = vrot.slane %v10309_v39, 1 }
 0x14b   : > { %8089 = vmatmul.mubr.bf16.gmra.mrb[32].mxu1 %v1587_v53  ;;  %v5639_v53 = vrot.slane %v10275_v57, 1  ;;  %v10349_v15 = vsel %vm2251_vm0, %v5641_v34, %v5643_v59 }
 0x14c   : > { %8092 = vmatprep.mubr.bf16.mxu1 %v1595_v60  ;;  %v5645_v60 = vrot.slane %v10287_v48, 1 }
 0x14d   : > { %v10339_v52 = vsel %vm2251_vm0, %v5637_v9, %v5639_v53  ;;  %v10342_v10 = vsel %vm2251_vm0, %v5639_v53, %v5641_v34  ;;  %v10871_v9 = vshrl.u32 %v10182_v46, 16  ;;  %v1616_v34 = vshll.u32 %v10325_v16, 16 }
 0x14e   : > { %10869 = vst [vmem:[#allocation28_spill] sm:$0xff] %v10342_v10  ;;  %8409 = vmatmul.mubr.bf16.gmra.mrb[32].mxu0 %v10046_v31  ;;  %v10352_v43 = vsel %vm2251_vm0, %v5643_v59, %v5645_v60  ;;  %v10360_v10 = vsel %vm2251_vm0, %v5645_v60, %v5647_v61  ;;  %v10873_v31 = vshrl.u32 %v10190_v54, 16  ;;  %v10367_v59 = vsel %vm2251_vm0, %v5647_v61, %v5649_v3 }
 0x14f   : > { %10870 = vst [vmem:[#allocation29_spill] sm:$0xff] %v10352_v43  ;;  %8412 = vmatprep.mubr.bf16.mxu0 %v10051_v37  ;;  %v1598_v53 = vor.u32 %v10871_v9, %v10206_v21  ;;  %10872 = vst [vmem:[#allocation30_spill] sm:$0xff] %v10360_v10  ;;  %v1624_v21 = vshll.u32 %v10346_v42, 16  ;;  %v1618_v60 = vrot.slane %v1616_v34, 1  ;;  %v1612_v9 = vshrl.u32 %v10199_v7, 16 }
 0x150   : > { %v1606_v12 = vor.u32 %v10873_v31, %v10248_v27  ;;  %v10374_v10 = vld [vmem:[#allocation2 + $0xc0] ss:$0 sps:$4 sm:$0x11]   ;;  %v1620_v31 = vshrl.u32 %v10325_v16, 16  ;;  %v1628_v34 = vshrl.u32 %v10346_v42, 16 }
 0x151   : > { %v1603_v43 = vsel %vm1439_vm1, %v1598_v53, %v10248_v27  ;;  %v1626_v61 = vrot.slane %v1624_v21, 1  ;;  %v1614_v3 = vor.u32 %v1612_v9, %v1610_v4  ;;  %v1632_v53 = vshll.u32 %v10374_v10, 16  ;;  %v9175_v21 = vld [vmem:[%s10820_s4 + $0x88] sm:$0xff]   ;;  %v9189_v9 = vld [vmem:[%s10820_s4 + $0xa0] sm:$0xff]  }
 0x152   : > { %v1611_v37 = vsel %vm1439_vm1, %v1606_v12, %v1610_v4  ;;  %v1622_v27 = vor.u32 %v1620_v31, %v1618_v60  ;;  %v9168_v4 = vld [vmem:[#allocation2 + $0x18] sm:$0xff]   ;;  %v9177_v31 = vld [vmem:[#allocation2 + $0x40] sm:$0xff]  }
 0x153   : > { %8093 = vmatmul.mubr.bf16.gmra.mrb[36].mxu1 %v1603_v43  ;;  %v1619_v43 = vsel %vm1439_vm1, %v1614_v3, %v1618_v60  ;;  %v9174_v60 = vld [vmem:[#allocation2 + $0x38] sm:$0xff]   ;;  %v9178_v3 = vld [vmem:[#allocation2 + $0x48] sm:$0xff]  }
 0x154   : > { %8096 = vmatprep.mubr.bf16.mxu1 %v1611_v37  ;;  %v1627_v12 = vsel %vm1439_vm1, %v1622_v27, %v1626_v61  ;;  %v1634_v37 = vrot.slane %v1632_v53, 1  ;;  %v9199_v27 = vld [vmem:[%s10820_s4 + $0xb0] sm:$0xff]   ;;  %v9206_v53 = vld [vmem:[%s10820_s4 + $0x1f8] sm:$0xff]  }
 0x156   : > { %8413 = vmatmul.mubr.bf16.gmra.mrb[36].mxu0 %v10066_v44  ;;  %v1630_v44 = vor.u32 %v1628_v34, %v1626_v61  ;;  %v9196_v61 = vld [vmem:[%s10820_s4 + $0x1e8] sm:$0xff]   ;;  %v10443_v34 = vld [vmem:[%s10820_s4 + $0xc0] sm:$0xff]  }
 0x157   : > { %8416 = vmatprep.mubr.bf16.mxu0 %v10069_v50 }
 0x158   : > { %v1635_v50 = vsel %vm1439_vm1, %v1630_v44, %v1634_v37  ;;  %v9184_v37 = vld [vmem:[#allocation2 + $0x68] sm:$0xff]   ;;  %v9187_v44 = vld [vmem:[#allocation2 + $0x70] sm:$0xff]  }
 0x15b   : > { %8097 = vmatmul.mubr.bf16.gmra.mrb[40].mxu1 %v1619_v43  ;;  %v9181_v43 = vld [vmem:[#allocation2 + $0x50] sm:$0xff]  }
 0x15c   : > { %8100 = vmatprep.mubr.bf16.mxu1 %v1627_v12  ;;  %v9182_v12 = vld [vmem:[#allocation2 + $0x58] sm:$0xff]  }
 0x15e   : > { %8417 = vmatmul.mubr.bf16.gmra.mrb[40].mxu0 %v10083_v29  ;;  %v9171_v29 = vld [vmem:[#allocation2 + $0x20] sm:$0xff]  }
 0x15f   : > { %8420 = vmatprep.mubr.bf16.mxu0 %v10090_v47  ;;  %v9172_v47 = vld [vmem:[#allocation2 + $0x28] sm:$0xff]  }
 0x163   : > { %8101 = vmatmul.mubr.bf16.gmra.mrb[44].mxu1 %v1635_v50  ;;  %v9188_v50 = vld [vmem:[#allocation2 + $0x78] sm:$0xff]  }
 0x164   : > { %8120 = vmatprep.mubr.bf16.mxu1 %v9978_v19  ;;  %v9176_v19 = vld [vmem:[%s10820_s4 + $0x1c8] sm:$0xff]  }
 0x166   : > { %8421 = vmatmul.mubr.bf16.gmra.mrb[44].mxu0 %v10099_v2  ;;  %v9179_v2 = vld [vmem:[%s10820_s4 + $0x90] sm:$0xff]  }
 0x167   : > { %8440 = vmatprep.mubr.bf16.mxu0 %v9168_v4  ;;  %v9193_v4 = vld [vmem:[#allocation2 + $0x90] sm:$0xff]  }
 0x16b   : > { %8121 = vmatmul.mubr.bf16.vlgmr.msra.gmra.mrb[0].mxu1 %v9957_v36  ;;  %v9180_v36 = vld [vmem:[%s10820_s4 + $0x1d0] sm:$0xff]  }
 0x16c   : > { %8124 = vmatprep.mubr.bf16.mxu1 %v9969_v24  ;;  %8169 = vmatpush3.bf16.msra.mxu1 %v10140_v20  ;;  %v9185_v24 = vld [vmem:[%s10820_s4 + $0x98] sm:$0xff]   ;;  %v9173_v20 = vld [vmem:[#allocation2 + $0x30] sm:$0xff]  }
 0x16d   : > { %8170 = vmatprep.subr.bf16.mxu1 %v9175_v21 }
 0x16e   : > { %8441 = vmatmul.mubr.bf16.vlgmr.msra.gmra.mrb[0].mxu0 %v9171_v29  ;;  %v9198_v29 = vld [vmem:[#allocation2 + $0xa8] sm:$0xff]  }
 0x16f   : > { %8489 = vmatpush3.bf16.msra.mxu0 %v10151_v55  ;;  %8444 = vmatprep.mubr.bf16.mxu0 %v9172_v47  ;;  %v9186_v55 = vld [vmem:[%s10820_s4 + $0x1d8] sm:$0xff]  }
 0x170   : > { %8490 = vmatprep.subr.bf16.mxu0 %v9176_v19  ;;  %8171 = vmatpush3.bf16.msra.mxu1 %v9175_v21  ;;  %v9197_v21 = vld [vmem:[#allocation2 + $0xa0] sm:$0xff]   ;;  %v10464_v47 = vld [vmem:[#allocation2 + $0x1c] sm:$0xf] }
 0x171   : > { %8172 = vmatprep.subr.bf16.mxu1 %v9179_v2 }
 0x173   : > { %8125 = vmatmul.mubr.bf16.gmra.mrb[4].mxu1 %v9975_v8  ;;  %8491 = vmatpush3.bf16.msra.mxu0 %v9176_v19  ;;  %v9190_v8 = vld [vmem:[%s10820_s4 + $0x1e0] sm:$0xff]   ;;  %v4851_v19 = vld [vmem:[#allocation2 + $0x18] sm:$0xf] }
 0x174   : > { %8128 = vmatprep.mubr.bf16.mxu1 %v9992_v23  ;;  %8492 = vmatprep.subr.bf16.mxu0 %v9180_v36  ;;  %v9195_v23 = vld [vmem:[%s10820_s4 + $0xa8] sm:$0xff]  }
 0x175   : > { %8173 = vmatpush3.bf16.msra.mxu1 %v9179_v2  ;;  %v9201_v2 = vld [vmem:[#allocation2 + $0xb0] sm:$0xff]  }
 0x176   : > { %8174 = vmatprep.subr.bf16.mxu1 %v9185_v24  ;;  %8445 = vmatmul.mubr.bf16.gmra.mrb[4].mxu0 %v9173_v20  ;;  %v2230_v20 = vld [vmem:[#allocation2] sm:$0xe] }
 0x177   : > { %8448 = vmatprep.mubr.bf16.mxu0 %v9174_v60  ;;  %8493 = vmatpush3.bf16.msra.mxu0 %v9180_v36  ;;  %v9202_v36 = vld [vmem:[#allocation2 + $0xb8] sm:$0xff]  }
 0x178   : > { %8494 = vmatprep.subr.bf16.mxu0 %v9186_v55 }
 0x179   : > { %8175 = vmatpush3.bf16.msra.mxu1 %v9185_v24  ;;  %v7048_v24 = vcombine.low %v4851_v19, %v10464_v47  ;;  %v5052_v19 = vshrl.u32 %v10194_v58, 16 }
 0x17a   : > { %8176 = vmatprep.subr.bf16.mxu1 %v9189_v9 }
 0x17b   : > { %8129 = vmatmul.mubr.bf16.gmra.mrb[8].mxu1 %v10002_v38  ;;  %8495 = vmatpush3.bf16.msra.mxu0 %v9186_v55  ;;  %v9200_v38 = vld [vmem:[%s10820_s4 + $0x1f0] sm:$0xff]   ;;  %v9286_v55 = vld [vmem:[#allocation2 + $0x4] sm:$0xf] }
 0x17c   : > { %8132 = vmatprep.mubr.bf16.mxu1 %v10027_v14  ;;  %8496 = vmatprep.subr.bf16.mxu0 %v9190_v8  ;;  %v9205_v14 = vld [vmem:[%s10820_s4 + $0xb8] sm:$0xff]   ;;  %v6853_v60 = vcombine.low %v2230_v20, %v9286_v55 }
 0x17d   : > { %8177 = vmatpush3.bf16.msra.mxu1 %v9189_v9  ;;  %v5043_v9 = vshll.u32 %v7048_v24, 16 }
 0x17e   : > { %8178 = vmatprep.subr.bf16.mxu1 %v9195_v23  ;;  %8449 = vmatmul.mubr.bf16.gmra.mrb[8].mxu0 %v9177_v31  ;;  %v2252_v31 = vrot.slane %v6853_v60, 1 }
 0x17f   : > { %8452 = vmatprep.mubr.bf16.mxu0 %v9178_v3  ;;  %8497 = vmatpush3.bf16.msra.mxu0 %v9190_v8  ;;  %v9203_v8 = vld [vmem:[#allocation2 + $0xc0] sm:$0xff]   ;;  %v5048_v3 = vshll.u32 %v10194_v58, 16 }
 0x180   : > { %8498 = vmatprep.subr.bf16.mxu0 %v9196_v61 }
 0x181   : > { %8179 = vmatpush3.bf16.msra.mxu1 %v9195_v23  ;;  %v9204_v23 = vld [vmem:[#allocation2 + $0xc8] sm:$0xff]  }
 0x182   : > { %8180 = vmatprep.subr.bf16.mxu1 %v9199_v27 }
 0x183   : > { %8133 = vmatmul.mubr.bf16.gmra.mrb[12].mxu1 %v10037_v17  ;;  %8499 = vmatpush3.bf16.msra.mxu0 %v9196_v61  ;;  %v10448_v17 = vld [vmem:[%s10820_s4 + $0x200] sm:$0xff]   ;;  %v5045_v61 = vrot.slane %v5043_v9, 1  ;;  %v5072_v9 = vshll.u32 %v10203_v63, 16 }
 0x184   : > { %8136 = vmatprep.mubr.bf16.mxu1 %v10072_v1  ;;  %8500 = vmatprep.subr.bf16.mxu0 %v9200_v38  ;;  %v9183_v1 = vld [vmem:[#allocation2 + $0x60] sm:$0xff]  }
 0x185   : > { %8181 = vmatpush3.bf16.msra.mxu1 %v9199_v27  ;;  %v9287_v27 = vld [vmem:[#allocation2 + $0x8] sm:$0xff]  }
 0x186   : > { %8182 = vmatprep.subr.bf16.mxu1 %v9205_v14  ;;  %8453 = vmatmul.mubr.bf16.gmra.mrb[12].mxu0 %v9181_v43 }
 0x187   : > { %8456 = vmatprep.mubr.bf16.mxu0 %v9182_v12  ;;  %8501 = vmatpush3.bf16.msra.mxu0 %v9200_v38  ;;  %v2253_v38 = vrot.slane %v9287_v27, 1  ;;  %v5050_v12 = vrot.slane %v5048_v3, 1 }
 0x188   : > { %8502 = vmatprep.subr.bf16.mxu0 %v9206_v53 }
 0x189   : > { %8183 = vmatpush3.bf16.msra.mxu1 %v9205_v14  ;;  %v5041_v14 = vshrl.u32 %v7048_v24, 16  ;;  %v2254_v43 = vsel %vm2251_vm0, %v2252_v31, %v2253_v38  ;;  %v5060_v24 = vshrl.u32 %v10196_v40, 16  ;;  %v5054_v55 = vor.u32 %v5052_v19, %v5050_v12  ;;  %v9290_v31 = vld [vmem:[#allocation2 + $0x20] sm:$0xff]  }
 0x18a   : > { %8232 = vmatprep.subr.bf16.mxu1 %v10443_v34 }
 0x18b   : > { %8137 = vmatmul.mubr.bf16.gmra.mrb[16].mxu1 %v10087_v30  ;;  %8503 = vmatpush3.bf16.msra.mxu0 %v9206_v53  ;;  %v9191_v30 = vld [vmem:[#allocation2 + $0x80] sm:$0xff]   ;;  %v5046_v53 = vor.u32 %v5045_v61, %v5041_v14  ;;  %v2259_v61 = vrot.slane %v9290_v31, 1  ;;  %v9237_v31 = vld [vmem:[%s10820_s4 + $0xe8] sm:$0xff]  }
 0x18c   : > { %8140 = vmatprep.mubr.bf16.mxu1 %v10107_v33  ;;  %8552 = vmatprep.subr.bf16.mxu0 %v10448_v17  ;;  %v9192_v33 = vld [vmem:[#allocation2 + $0x88] sm:$0xff]  }
 0x18e   : > { %8457 = vmatmul.mubr.bf16.gmra.mrb[16].mxu0 %v9183_v1  ;;  %v9208_v1 = vld [vmem:[#allocation2 + $0xd0] sm:$0xff]  }
 0x18f   : > { %8460 = vmatprep.mubr.bf16.mxu0 %v9184_v37  ;;  %v5056_v37 = vshll.u32 %v10196_v40, 16  ;;  %v9221_v40 = vld [vmem:[%s10820_s4 + $0xd0] sm:$0xff]  }
 0x193   : > { %8141 = vmatmul.mubr.bf16.gmra.mrb[20].mxu1 %v10113_v62  ;;  %v9194_v62 = vld [vmem:[#allocation2 + $0x98] sm:$0xff]  }
 0x194   : > { %8144 = vmatprep.mubr.bf16.mxu1 %v10131_v6 }
 0x196   : > { %8461 = vmatmul.mubr.bf16.gmra.mrb[20].mxu0 %v9187_v44  ;;  %v9288_v44 = vld [vmem:[#allocation2 + $0x10] sm:$0xff]  }
 0x197   : > { %8464 = vmatprep.mubr.bf16.mxu0 %v9188_v50  ;;  %v2255_v50 = vrot.slane %v9288_v44, 1  ;;  %v5076_v44 = vshrl.u32 %v10203_v63, 16  ;;  %v9231_v63 = vld [vmem:[%s10820_s4 + $0xe0] sm:$0xff]  }
 0x19b   : > { %8145 = vmatmul.mubr.bf16.gmra.mrb[24].mxu1 %v10144_v51 }
 0x19c   : > { %8148 = vmatprep.mubr.bf16.mxu1 %v10157_v56 }
 0x19e   : > { %8465 = vmatmul.mubr.bf16.gmra.mrb[24].mxu0 %v9191_v30  ;;  %v5051_v30 = vsel %vm1439_vm1, %v5046_v53, %v5050_v12  ;;  %v9222_v53 = vld [vmem:[%s10820_s4 + $0x210] sm:$0xff]  }
 0x19f   : > { %8468 = vmatprep.mubr.bf16.mxu0 %v9192_v33  ;;  %v9289_v33 = vld [vmem:[#allocation2 + $0x18] sm:$0xff]  }
 0x1a3   : > { %8149 = vmatmul.mubr.bf16.gmra.mrb[28].mxu1 %v10161_v18 }
 0x1a4   : > { %8152 = vmatprep.mubr.bf16.mxu1 %v10170_v11 }
 0x1a6   : > { %8469 = vmatmul.mubr.bf16.gmra.mrb[28].mxu0 %v9193_v4  ;;  %v2257_v4 = vrot.slane %v9289_v33, 1 }
 0x1a7   : > { %8472 = vmatprep.mubr.bf16.mxu0 %v9194_v62  ;;  %v5064_v62 = vshll.u32 %v10201_v32, 16 }
 0x1a8   : > { %v2260_v12 = vsel %vm2251_vm0, %v2257_v4, %v2259_v61 }
 0x1a9   : > { %v5066_v20 = vrot.slane %v5064_v62, 1  ;;  %v10875_v62 = vld [vmem:[#allocation4_spill] sm:$0xff] }
 0x1ab   : > { %8153 = vmatmul.mubr.bf16.gmra.mrb[32].mxu1 %v10172_v28 }
 0x1ac   : > { %8156 = vmatprep.mubr.bf16.mxu1 %v10177_v41 }
 0x1ae   : > { %8473 = vmatmul.mubr.bf16.gmra.mrb[32].mxu0 %v9197_v21  ;;  %v5058_v21 = vrot.slane %v5056_v37, 1  ;;  %v9227_v37 = vld [vmem:[%s10820_s4 + $0xd8] sm:$0xff]  }
 0x1af   : > { %8476 = vmatprep.mubr.bf16.mxu0 %v9198_v29  ;;  %v9217_v29 = vld [vmem:[%s10820_s4 + $0xc8] sm:$0xff]  }
 0x1b0   : > { %v5062_v60 = vor.u32 %v5060_v24, %v5058_v21 }
 0x1b2   : > { %v5067_v3 = vsel %vm1439_vm1, %v5062_v60, %v5066_v20 }
 0x1b3   : > { %8157 = vmatmul.mubr.bf16.gmra.mrb[36].mxu1 %v10182_v46 }
 0x1b4   : > { %8160 = vmatprep.mubr.bf16.mxu1 %v10190_v54 }
 0x1b6   : > { %8477 = vmatmul.mubr.bf16.gmra.mrb[36].mxu0 %v9201_v2  ;;  %v2256_v2 = vsel %vm2251_vm0, %v2253_v38, %v2255_v50  ;;  %v10874_v38 = vld [vmem:[#allocation3_spill] sm:$0xff] }
 0x1b7   : > { %8480 = vmatprep.mubr.bf16.mxu0 %v9202_v36  ;;  %v2258_v36 = vsel %vm2251_vm0, %v2255_v50, %v2257_v4  ;;  %v5080_v14 = vshll.u32 %v10874_v38, 16 }
 0x1b9   : > { %v5082_v50 = vrot.slane %v5080_v14, 1 }
 0x1bb   : > { %8161 = vmatmul.mubr.bf16.gmra.mrb[40].mxu1 %v10199_v7 }
 0x1bc   : > { %8164 = vmatprep.mubr.bf16.mxu1 %v10325_v16 }
 0x1be   : > { %8481 = vmatmul.mubr.bf16.gmra.mrb[40].mxu0 %v9203_v8  ;;  %v9218_v8 = vld [vmem:[%s10820_s4 + $0x208] sm:$0xff]  }
 0x1bf   : > { %8484 = vmatprep.mubr.bf16.mxu0 %v9204_v23  ;;  %v5059_v23 = vsel %vm1439_vm1, %v5054_v55, %v5058_v21  ;;  %v5088_v21 = vshll.u32 %v10875_v62, 16 }
 0x1c1   : > { %v5090_v60 = vrot.slane %v5088_v21, 1  ;;  %v9242_v21 = vld [vmem:[%s10820_s4 + $0x230] sm:$0xff]  }
 0x1c3   : > { %8165 = vmatmul.mubr.bf16.gmra.mrb[44].mxu1 %v10346_v42 }
 0x1c4   : > { %8184 = vmatprep.mubr.bf16.mxu1 %v2254_v43  ;;  %v5074_v43 = vrot.slane %v5072_v9, 1  ;;  %v9232_v9 = vld [vmem:[%s10820_s4 + $0x220] sm:$0xff]  }
 0x1c6   : > { %8485 = vmatmul.mubr.bf16.gmra.mrb[44].mxu0 %v9208_v1  ;;  %v5068_v1 = vshrl.u32 %v10201_v32, 16  ;;  %v5078_v33 = vor.u32 %v5076_v44, %v5074_v43  ;;  %v9228_v32 = vld [vmem:[%s10820_s4 + $0x218] sm:$0xff]   ;;  %v9295_v44 = vld [vmem:[#allocation2 + $0x48] sm:$0xff]  }
 0x1c7   : > { %8504 = vmatprep.mubr.bf16.mxu0 %v5051_v30 }
 0x1c8   : > { %v5070_v30 = vor.u32 %v5068_v1, %v5066_v20  ;;  %v10876_v20 = vld [vmem:[#allocation5_spill] sm:$0xff] }
 0x1c9   : > { %v5096_v55 = vshll.u32 %v10876_v20, 16 }
 0x1ca   : > { %v5075_v4 = vsel %vm1439_vm1, %v5070_v30, %v5074_v43  ;;  %v10877_v43 = vld [vmem:[#allocation6_spill] sm:$0xff]  ;;  %v10878_v30 = vld [vmem:[#allocation7_spill] sm:$0xff] }
 0x1cb   : > { %8185 = vmatmul.mubr.bf16.vlgmr.msra.gmra.mrb[0].mxu1 %v2256_v2  ;;  %v5083_v2 = vsel %vm1439_vm1, %v5078_v33, %v5082_v50  ;;  %v5112_v33 = vshll.u32 %v10878_v30, 16 }
 0x1cc   : > { %8188 = vmatprep.mubr.bf16.mxu1 %v2258_v36  ;;  %8233 = vmatpush3.bf16.msra.mxu1 %v10443_v34  ;;  %v9291_v34 = vld [vmem:[#allocation2 + $0x28] sm:$0xff]   ;;  %v9293_v36 = vld [vmem:[#allocation2 + $0x38] sm:$0xff]  }
 0x1cd   : > { %8234 = vmatprep.subr.bf16.mxu1 %v9217_v29  ;;  %v2261_v27 = vrot.slane %v9291_v34, 1  ;;  %v2265_v24 = vrot.slane %v9293_v36, 1 }
 0x1ce   : > { %8505 = vmatmul.mubr.bf16.vlgmr.msra.gmra.mrb[0].mxu0 %v5059_v23  ;;  %v5084_v23 = vshrl.u32 %v10874_v38, 16 }
 0x1cf   : > { %8553 = vmatpush3.bf16.msra.mxu0 %v10448_v17  ;;  %8508 = vmatprep.mubr.bf16.mxu0 %v5067_v3  ;;  %v2262_v17 = vsel %vm2251_vm0, %v2259_v61, %v2261_v27  ;;  %v5098_v3 = vrot.slane %v5096_v55, 1 }
 0x1d0   : > { %8554 = vmatprep.subr.bf16.mxu0 %v9218_v8  ;;  %8235 = vmatpush3.bf16.msra.mxu1 %v9217_v29  ;;  %v9292_v29 = vld [vmem:[#allocation2 + $0x30] sm:$0xff]   ;;  %v5086_v34 = vor.u32 %v5084_v23, %v5082_v50  ;;  %v2269_v50 = vrot.slane %v9295_v44, 1 }
 0x1d1   : > { %8236 = vmatprep.subr.bf16.mxu1 %v9221_v40  ;;  %v2263_v19 = vrot.slane %v9292_v29, 1  ;;  %v9247_v29 = vld [vmem:[%s10820_s4 + $0xf8] sm:$0xff]  }
 0x1d2   : > { %v5091_v38 = vsel %vm1439_vm1, %v5086_v34, %v5090_v60 }
 0x1d3   : > { %8189 = vmatmul.mubr.bf16.gmra.mrb[4].mxu1 %v2260_v12  ;;  %8555 = vmatpush3.bf16.msra.mxu0 %v9218_v8  ;;  %v2264_v8 = vsel %vm2251_vm0, %v2261_v27, %v2263_v19  ;;  %v2266_v61 = vsel %vm2251_vm0, %v2263_v19, %v2265_v24  ;;  %v9238_v27 = vld [vmem:[%s10820_s4 + $0x228] sm:$0xff]   ;;  %v9294_v12 = vld [vmem:[#allocation2 + $0x40] sm:$0xff]  }
 0x1d4   : > { %8192 = vmatprep.mubr.bf16.mxu1 %v2262_v17  ;;  %8556 = vmatprep.subr.bf16.mxu0 %v9222_v53  ;;  %v2267_v1 = vrot.slane %v9294_v12, 1 }
 0x1d5   : > { %8237 = vmatpush3.bf16.msra.mxu1 %v9221_v40  ;;  %v5092_v40 = vshrl.u32 %v10875_v62, 16 }
 0x1d6   : > { %8238 = vmatprep.subr.bf16.mxu1 %v9227_v37  ;;  %8509 = vmatmul.mubr.bf16.gmra.mrb[4].mxu0 %v5075_v4  ;;  %v5100_v4 = vshrl.u32 %v10876_v20, 16  ;;  %v2270_v19 = vsel %vm2251_vm0, %v2267_v1, %v2269_v50 }
 0x1d7   : > { %8512 = vmatprep.mubr.bf16.mxu0 %v5083_v2  ;;  %8557 = vmatpush3.bf16.msra.mxu0 %v9222_v53  ;;  %v5094_v14 = vor.u32 %v5092_v40, %v5090_v60  ;;  %v5104_v53 = vshll.u32 %v10877_v43, 16  ;;  %v5114_v2 = vrot.slane %v5112_v33, 1  ;;  %v10879_v60 = vld [vmem:[#allocation8_spill] sm:$0xff] }
 0x1d8   : > { %8558 = vmatprep.subr.bf16.mxu0 %v9228_v32  ;;  %v5102_v36 = vor.u32 %v5100_v4, %v5098_v3 }
 0x1d9   : > { %8239 = vmatpush3.bf16.msra.mxu1 %v9227_v37  ;;  %v9241_v37 = vld [vmem:[%s10820_s4 + $0xf0] sm:$0xff]   ;;  %v5099_v17 = vsel %vm1439_vm1, %v5094_v14, %v5098_v3  ;;  %v5106_v62 = vrot.slane %v5104_v53, 1  ;;  %v5116_v53 = vshrl.u32 %v10878_v30, 16  ;;  %v2277_v30 = vrot.slane %v10144_v51, 1 }
 0x1da   : > { %8240 = vmatprep.subr.bf16.mxu1 %v9231_v63  ;;  %v10880_v3 = vld [vmem:[#allocation9_spill] sm:$0xff] }
 0x1db   : > { %8193 = vmatmul.mubr.bf16.gmra.mrb[8].mxu1 %v2264_v8  ;;  %8559 = vmatpush3.bf16.msra.mxu0 %v9228_v32  ;;  %v2268_v32 = vsel %vm2251_vm0, %v2265_v24, %v2267_v1  ;;  %v9248_v24 = vld [vmem:[%s10820_s4 + $0x238] sm:$0xff]   ;;  %v5107_v20 = vsel %vm1439_vm1, %v5102_v36, %v5106_v62  ;;  %v9296_v8 = vld [vmem:[#allocation2 + $0x50] sm:$0xff]   ;;  %v5128_v34 = vshll.u32 %v10880_v3, 16  ;;  %v5118_v1 = vor.u32 %v5116_v53, %v5114_v2 }
 0x1dc   : > { %8196 = vmatprep.mubr.bf16.mxu1 %v2266_v61  ;;  %8560 = vmatprep.subr.bf16.mxu0 %v9232_v9  ;;  %v2271_v23 = vrot.slane %v9296_v8, 1  ;;  %v9297_v61 = vld [vmem:[#allocation2 + $0x58] sm:$0xff]  }
 0x1dd   : > { %8241 = vmatpush3.bf16.msra.mxu1 %v9231_v63  ;;  %v5108_v63 = vshrl.u32 %v10877_v43, 16  ;;  %v2273_v40 = vrot.slane %v9297_v61, 1  ;;  %v5130_v12 = vrot.slane %v5128_v34, 1 }
 0x1de   : > { %8242 = vmatprep.subr.bf16.mxu1 %v9237_v31  ;;  %8513 = vmatmul.mubr.bf16.gmra.mrb[8].mxu0 %v5091_v38  ;;  %v2272_v43 = vsel %vm2251_vm0, %v2269_v50, %v2271_v23  ;;  %v5124_v38 = vshrl.u32 %v10879_v60, 16 }
 0x1df   : > { %8516 = vmatprep.mubr.bf16.mxu0 %v5099_v17  ;;  %8561 = vmatpush3.bf16.msra.mxu0 %v9232_v9  ;;  %v5110_v55 = vor.u32 %v5108_v63, %v5106_v62  ;;  %v5120_v9 = vshll.u32 %v10879_v60, 16  ;;  %v10881_v17 = vld [vmem:[#allocation10_spill] sm:$0xff]  ;;  %v2275_v62 = vrot.slane %v10131_v6, 1  ;;  %v2279_v60 = vrot.slane %v10157_v56, 1 }
 0x1e0   : > { %8562 = vmatprep.subr.bf16.mxu0 %v9238_v27  ;;  %v5136_v44 = vshll.u32 %v10881_v17, 16  ;;  %v5140_v63 = vshrl.u32 %v10881_v17, 16 }
 0x1e1   : > { %8243 = vmatpush3.bf16.msra.mxu1 %v9237_v31  ;;  %v5115_v31 = vsel %vm1439_vm1, %v5110_v55, %v5114_v2  ;;  %v5122_v14 = vrot.slane %v5120_v9, 1  ;;  %v2276_v4 = vsel %vm2251_vm0, %v2273_v40, %v2275_v62  ;;  %v5152_v55 = vshll.u32 %v10239_v35, 16 }
 0x1e2   : > { %8244 = vmatprep.subr.bf16.mxu1 %v9241_v37 }
 0x1e3   : > { %8197 = vmatmul.mubr.bf16.gmra.mrb[12].mxu1 %v2268_v32  ;;  %8563 = vmatpush3.bf16.msra.mxu0 %v9238_v27  ;;  %v2274_v27 = vsel %vm2251_vm0, %v2271_v23, %v2273_v40  ;;  %v5123_v33 = vsel %vm1439_vm1, %v5118_v1, %v5122_v14  ;;  %v5138_v32 = vrot.slane %v5136_v44, 1  ;;  %v5154_v8 = vrot.slane %v5152_v55, 1 }
 0x1e4   : > { %8200 = vmatprep.mubr.bf16.mxu1 %v2270_v19  ;;  %8564 = vmatprep.subr.bf16.mxu0 %v9242_v21  ;;  %v2278_v19 = vsel %vm2251_vm0, %v2275_v62, %v2277_v30  ;;  %v2280_v23 = vsel %vm2251_vm0, %v2277_v30, %v2279_v60  ;;  %v5156_v40 = vshrl.u32 %v10239_v35, 16  ;;  %v2287_v62 = vrot.slane %v10177_v41, 1 }
 0x1e5   : > { %8245 = vmatpush3.bf16.msra.mxu1 %v9241_v37  ;;  %v5126_v37 = vor.u32 %v5124_v38, %v5122_v14  ;;  %v5142_v36 = vor.u32 %v5140_v63, %v5138_v32  ;;  %v5168_v14 = vshll.u32 %v10260_v45, 16  ;;  %v5192_v30 = vshll.u32 %v10275_v57, 16 }
 0x1e6   : > { %8246 = vmatprep.subr.bf16.mxu1 %v9247_v29  ;;  %8517 = vmatmul.mubr.bf16.gmra.mrb[12].mxu0 %v5107_v20  ;;  %v5160_v20 = vshll.u32 %v10250_v5, 16  ;;  %v5158_v34 = vor.u32 %v5156_v40, %v5154_v8  ;;  %v5180_v41 = vshrl.u32 %v10262_v49, 16  ;;  %v2291_v55 = vrot.slane %v10190_v54, 1 }
 0x1e7   : > { %8520 = vmatprep.mubr.bf16.mxu0 %v5115_v31  ;;  %8565 = vmatpush3.bf16.msra.mxu0 %v9242_v21  ;;  %v5131_v50 = vsel %vm1439_vm1, %v5126_v37, %v5130_v12  ;;  %v5144_v21 = vshll.u32 %v10237_v22, 16  ;;  %v5148_v31 = vshrl.u32 %v10237_v22, 16  ;;  %v2285_v22 = vrot.slane %v10172_v28, 1 }
 0x1e8   : > { %8566 = vmatprep.subr.bf16.mxu0 %v9248_v24  ;;  %v5170_v38 = vrot.slane %v5168_v14, 1  ;;  %v5172_v37 = vshrl.u32 %v10260_v45, 16  ;;  %v10594_v45 = vld [vmem:[%s10822_s6] sm:$0xff]   ;;  %v2295_v40 = vrot.slane %v10325_v16, 1 }
 0x1e9   : > { %8247 = vmatpush3.bf16.msra.mxu1 %v9247_v29  ;;  %v5132_v29 = vshrl.u32 %v10880_v3, 16  ;;  %v5146_v2 = vrot.slane %v5144_v21, 1  ;;  %v5162_v3 = vrot.slane %v5160_v20, 1 }
 0x1ea   : > { %v5174_v44 = vor.u32 %v5172_v37, %v5170_v38  ;;  %8616 = vmatprep.subr.bf16.mxu1 %v10594_v45 }
 0x1eb   : > { %8201 = vmatmul.mubr.bf16.gmra.mrb[16].mxu1 %v2272_v43  ;;  %8567 = vmatpush3.bf16.msra.mxu0 %v9248_v24  ;;  %v5134_v6 = vor.u32 %v5132_v29, %v5130_v12  ;;  %v5147_v9 = vsel %vm1439_vm1, %v5142_v36, %v5146_v2  ;;  %v2281_v24 = vrot.slane %v10161_v18, 1  ;;  %v5150_v56 = vor.u32 %v5148_v31, %v5146_v2  ;;  %v10882_v2 = vld [vmem:[#allocation16_spill] sm:$0xff] }
 0x1ec   : > { %8204 = vmatprep.mubr.bf16.mxu1 %v2274_v27  ;;  %v2283_v43 = vrot.slane %v10170_v11, 1  ;;  %v5163_v53 = vsel %vm1439_vm1, %v5158_v34, %v5162_v3  ;;  %v5176_v27 = vshll.u32 %v10262_v49, 16  ;;  %v5164_v12 = vshrl.u32 %v10250_v5, 16 }
 0x1ed   : > { %v5139_v51 = vsel %vm1439_vm1, %v5134_v6, %v5138_v32  ;;  %v2282_v61 = vsel %vm2251_vm0, %v2279_v60, %v2281_v24  ;;  %v5155_v18 = vsel %vm1439_vm1, %v5150_v56, %v5154_v8  ;;  %v2289_v5 = vrot.slane %v10182_v46, 1 }
 0x1ee   : > { %8521 = vmatmul.mubr.bf16.gmra.mrb[16].mxu0 %v5123_v33  ;;  %v2284_v35 = vsel %vm2251_vm0, %v2281_v24, %v2283_v43  ;;  %v2286_v1 = vsel %vm2251_vm0, %v2283_v43, %v2285_v22  ;;  %v5178_v17 = vrot.slane %v5176_v27, 1  ;;  %v5166_v11 = vor.u32 %v5164_v12, %v5162_v3  ;;  %v5581_v12 = vld [vmem:[#allocation2 + $0x18] sm:$0xe] }
 0x1ef   : > { %8524 = vmatprep.mubr.bf16.mxu0 %v5131_v50  ;;  %v5184_v33 = vshll.u32 %v10273_v13, 16  ;;  %v2288_v32 = vsel %vm2251_vm0, %v2285_v22, %v2287_v62  ;;  %v5188_v46 = vshrl.u32 %v10273_v13, 16  ;;  %v5194_v29 = vrot.slane %v5192_v30, 1  ;;  %v9254_v30 = vld [vmem:[#allocation2 + $0x24] sm:$0xff]  }
 0x1f0   : > { %v5171_v28 = vsel %vm1439_vm1, %v5166_v11, %v5170_v38  ;;  %v5179_v50 = vsel %vm1439_vm1, %v5174_v44, %v5178_v17  ;;  %v5200_v6 = vshll.u32 %v10882_v2, 16  ;;  %v2293_v49 = vrot.slane %v10199_v7, 1 }
 0x1f1   : > { %v5186_v21 = vrot.slane %v5184_v33, 1  ;;  %v5208_v60 = vshll.u32 %v10285_v25, 16  ;;  %v2292_v13 = vsel %vm2251_vm0, %v2289_v5, %v2291_v55  ;;  %v5196_v24 = vshrl.u32 %v10275_v57, 16 }
 0x1f2   : > { %v2294_v20 = vsel %vm2251_vm0, %v2291_v55, %v2293_v49  ;;  %v5204_v8 = vshrl.u32 %v10882_v2, 16  ;;  %v2297_v57 = vrot.slane %v10346_v42, 1  ;;  %v5224_v56 = vshll.u32 %v10297_v26, 16  ;;  %v10888_v2 = vld [vmem:[#allocation15_spill] sm:$0xff]  ;;  %v9259_v55 = vld [vmem:[#allocation2 + $0x4c] sm:$0xff]  }
 0x1f3   : > { %8205 = vmatmul.mubr.bf16.gmra.mrb[20].mxu1 %v2276_v4  ;;  %v2290_v4 = vsel %vm2251_vm0, %v2287_v62, %v2289_v5  ;;  %v5190_v63 = vor.u32 %v5188_v46, %v5186_v21  ;;  %v5198_v54 = vor.u32 %v5196_v24, %v5194_v29  ;;  %v2296_v14 = vsel %vm2251_vm0, %v2293_v49, %v2295_v40  ;;  %v9252_v62 = vld [vmem:[#allocation2 + $0x14] sm:$0xff]   ;;  %v10884_v5 = vld [vmem:[#allocation11_spill] sm:$0xff] }
 0x1f4   : > { %8208 = vmatprep.mubr.bf16.mxu1 %v2278_v19  ;;  %v5182_v19 = vor.u32 %v5180_v41, %v5178_v17  ;;  %v2298_v43 = vsel %vm2251_vm0, %v2295_v40, %v2297_v57  ;;  %v5226_v22 = vrot.slane %v5224_v56, 1  ;;  %v2299_v42 = vrot.slane %v10374_v10, 1  ;;  %v10886_v41 = vld [vmem:[#allocation13_spill] sm:$0xff]  ;;  %v10891_v49 = vld [vmem:[#allocation19_spill] sm:$0xff]  ;;  %v10898_v56 = vld [vmem:[#allocation26_spill] sm:$0xff] }
 0x1f5   : > { %v5228_v17 = vshrl.u32 %v10297_v26, 16  ;;  %v9277_v26 = vld [vmem:[%s10822_s6 + $0x10] sm:$0xff]  }
 0x1f6   : > { %8525 = vmatmul.mubr.bf16.gmra.mrb[20].mxu0 %v5139_v51  ;;  %v5187_v36 = vsel %vm1439_vm1, %v5182_v19, %v5186_v21  ;;  %v5195_v51 = vsel %vm1439_vm1, %v5190_v63, %v5194_v29  ;;  %v2300_v37 = vsel %vm2251_vm0, %v2297_v57, %v2299_v42  ;;  %v9278_v21 = vld [vmem:[%s10822_s6 + $0x18] sm:$0xff]   ;;  %v9280_v29 = vld [vmem:[%s10822_s6 + $0x28] sm:$0xff]   ;;  %v9281_v63 = vld [vmem:[%s10822_s6 + $0x30] sm:$0xff]  }
 0x1f7   : > { %8528 = vmatprep.mubr.bf16.mxu0 %v5147_v9  ;;  %v5202_v9 = vrot.slane %v5200_v6, 1  ;;  %v5230_v44 = vor.u32 %v5228_v17, %v5226_v22  ;;  %v9256_v46 = vld [vmem:[#allocation2 + $0x34] sm:$0xff]   ;;  %v9257_v19 = vld [vmem:[#allocation2 + $0x3c] sm:$0xff]   ;;  %v9267_v57 = vld [vmem:[#allocation2 + $0x8c] sm:$0xff]  }
 0x1f8   : > { %v10889_v6 = vld [vmem:[#allocation17_spill] sm:$0xff]  ;;  %v10902_v42 = vld [vmem:[#allocation30_spill] sm:$0xff] }
 0x1f9   : > { %v5206_v31 = vor.u32 %v5204_v8, %v5202_v9  ;;  %v5203_v7 = vsel %vm1439_vm1, %v5198_v54, %v5202_v9  ;;  %v9261_v9 = vld [vmem:[#allocation2 + $0x5c] sm:$0xff]   ;;  %v10893_v24 = vld [vmem:[#allocation21_spill] sm:$0xff]  ;;  %v9263_v8 = vld [vmem:[#allocation2 + $0x6c] sm:$0xff]  }
 0x1fa   : > { %v10895_v54 = vld [vmem:[#allocation23_spill] sm:$0xff]  ;;  %v10897_v40 = vld [vmem:[#allocation25_spill] sm:$0xff] }
 0x1fb   : > { %8209 = vmatmul.mubr.bf16.gmra.mrb[24].mxu1 %v2280_v23  ;;  %v5210_v23 = vrot.slane %v5208_v60, 1  ;;  %v9260_v60 = vld [vmem:[#allocation2 + $0x54] sm:$0xff]  }
 0x1fc   : > { %8212 = vmatprep.mubr.bf16.mxu1 %v2282_v61  ;;  %v5216_v61 = vshll.u32 %v10287_v48, 16 }
 0x1fd   : > { %v5211_v3 = vsel %vm1439_vm1, %v5206_v31, %v5210_v23  ;;  %v9264_v31 = vld [vmem:[#allocation2 + $0x74] sm:$0xff]  }
 0x1fe   : > { %8529 = vmatmul.mubr.bf16.gmra.mrb[24].mxu0 %v5155_v18  ;;  %v5218_v34 = vrot.slane %v5216_v61, 1  ;;  %v5212_v18 = vshrl.u32 %v10285_v25, 16  ;;  %v7097_v25 = vcombine.low %v5581_v12, %v10464_v47  ;;  %v9276_v47 = vld [vmem:[%s10822_s6 + $0x8] sm:$0xff]   ;;  %v9265_v61 = vld [vmem:[#allocation2 + $0x7c] sm:$0xff]  }
 0x1ff   : > { %8532 = vmatprep.mubr.bf16.mxu0 %v5163_v53  ;;  %v5220_v53 = vshrl.u32 %v10287_v48, 16  ;;  %v9249_v48 = vld [vmem:[#allocation2 + $0xc] sm:$0xff]  }
 0x200   : > { %v5214_v16 = vor.u32 %v5212_v18, %v5210_v23  ;;  %v5602_v33 = vrot.slane %v7097_v25, 1  ;;  %v10894_v23 = vld [vmem:[#allocation22_spill] sm:$0xff] }
 0x201   : > { %v5222_v27 = vor.u32 %v5220_v53, %v5218_v34  ;;  %v9269_v18 = vld [vmem:[#allocation2 + $0x9c] sm:$0xff]   ;;  %v9271_v53 = vld [vmem:[#allocation2 + $0xac] sm:$0xff]  }
 0x202   : > { %v5219_v38 = vsel %vm1439_vm1, %v5214_v16, %v5218_v34  ;;  %v10899_v34 = vld [vmem:[#allocation27_spill] sm:$0xff]  ;;  %v9272_v16 = vld [vmem:[#allocation2 + $0xb4] sm:$0xff]  }
 0x203   : > { %8213 = vmatmul.mubr.bf16.gmra.mrb[28].mxu1 %v2284_v35  ;;  %v5232_v35 = vshll.u32 %v10309_v39, 16  ;;  %v10883_v39 = vrot.slane %v10194_v58, 1  ;;  %v10885_v58 = vld [vmem:[#allocation12_spill] sm:$0xff] }
 0x204   : > { %8216 = vmatprep.mubr.bf16.mxu1 %v2286_v1  ;;  %v5227_v1 = vsel %vm1439_vm1, %v5222_v27, %v5226_v22  ;;  %v10900_v22 = vld [vmem:[#allocation28_spill] sm:$0xff]  ;;  %v9273_v27 = vld [vmem:[#allocation2 + $0xbc] sm:$0xff]  }
 0x205   : > { %v5234_v11 = vrot.slane %v5232_v35, 1  ;;  %v9274_v35 = vld [vmem:[#allocation2 + $0xc4] sm:$0xff]  }
 0x206   : > { %8533 = vmatmul.mubr.bf16.gmra.mrb[28].mxu0 %v5171_v28  ;;  %v5604_v28 = vsel %vm2251_vm0, %v5602_v33, %v10883_v39 }
 0x207   : > { %8536 = vmatprep.mubr.bf16.mxu0 %v5179_v50  ;;  %v5235_v10 = vsel %vm1439_vm1, %v5230_v44, %v5234_v11  ;;  %v9253_v50 = vld [vmem:[#allocation2 + $0x1c] sm:$0xff]  }
 0x20b   : > { %8217 = vmatmul.mubr.bf16.gmra.mrb[32].mxu1 %v2288_v32  ;;  %v9255_v32 = vld [vmem:[#allocation2 + $0x2c] sm:$0xff]  }
 0x20c   : > { %8220 = vmatprep.mubr.bf16.mxu1 %v2290_v4  ;;  %v10887_v4 = vld [vmem:[#allocation14_spill] sm:$0xff] }
 0x20e   : > { %8537 = vmatmul.mubr.bf16.gmra.mrb[32].mxu0 %v5187_v36  ;;  %v9258_v36 = vld [vmem:[#allocation2 + $0x44] sm:$0xff]  }
 0x20f   : > { %8540 = vmatprep.mubr.bf16.mxu0 %v5195_v51  ;;  %v10890_v51 = vld [vmem:[#allocation18_spill] sm:$0xff] }
 0x213   : > { %8221 = vmatmul.mubr.bf16.gmra.mrb[36].mxu1 %v2292_v13  ;;  %v10892_v13 = vld [vmem:[#allocation20_spill] sm:$0xff] }
 0x214   : > { %8224 = vmatprep.mubr.bf16.mxu1 %v2294_v20  ;;  %v9262_v20 = vld [vmem:[#allocation2 + $0x64] sm:$0xff]  }
 0x216   : > { %8541 = vmatmul.mubr.bf16.gmra.mrb[36].mxu0 %v5203_v7  ;;  %v10896_v7 = vld [vmem:[#allocation24_spill] sm:$0xff] }
 0x217   : > { %8544 = vmatprep.mubr.bf16.mxu0 %v5211_v3  ;;  %v9266_v3 = vld [vmem:[#allocation2 + $0x84] sm:$0xff]  }
 0x21b   : > { %8225 = vmatmul.mubr.bf16.gmra.mrb[40].mxu1 %v2296_v14  ;;  %v9268_v14 = vld [vmem:[#allocation2 + $0x94] sm:$0xff]  }
 0x21c   : > { %8228 = vmatprep.mubr.bf16.mxu1 %v2298_v43  ;;  %v9270_v43 = vld [vmem:[#allocation2 + $0xa4] sm:$0xff]  }
 0x21e   : > { %8545 = vmatmul.mubr.bf16.gmra.mrb[40].mxu0 %v5219_v38  ;;  %v10901_v38 = vld [vmem:[#allocation29_spill] sm:$0xff] }
 0x21f   : > { %8548 = vmatprep.mubr.bf16.mxu0 %v5227_v1 }
 0x223   : > { %8229 = vmatmul.mubr.bf16.gmra.mrb[44].mxu1 %v2300_v37  ;;  %v10680_v37 = vld [vmem:[%s10821_s5] ss:$0 sm:$0xff] }
 0x224   : > { %8248 = vmatprep.mubr.bf16.mxu1 %v9249_v48 }
 0x226   : > { %8549 = vmatmul.mubr.bf16.gmra.mrb[44].mxu0 %v5235_v10 }
 0x227   : > { %8568 = vmatprep.mubr.bf16.mxu0 %v5604_v28 }
 0x22b   : > { %8249 = vmatmul.mubr.bf16.vlgmr.msra.gmra.mrb[0].mxu1 %v9252_v62 }
 0x22c   : > { %8252 = vmatprep.mubr.bf16.mxu1 %v9253_v50  ;;  %8617 = vmatpush3.bf16.msra.mxu1 %v10594_v45  ;;  %v9279_v45 = vld [vmem:[%s10822_s6 + $0x20] sm:$0xff]  }
 0x22d   : > { %8618 = vmatprep.subr.bf16.mxu1 %v9276_v47 }
 0x22e   : > { %8569 = vmatmul.mubr.bf16.vlgmr.msra.gmra.mrb[0].mxu0 %v10884_v5 }
 0x22f   : > { %8572 = vmatprep.mubr.bf16.mxu0 %v10885_v58 }
 0x230   : > { %8619 = vmatpush3.bf16.msra.mxu1 %v9276_v47 }
 0x231   : > { %8620 = vmatprep.subr.bf16.mxu1 %v9277_v26 }
 0x233   : > { %8253 = vmatmul.mubr.bf16.gmra.mrb[4].mxu1 %v9254_v30 }
 0x234   : > { %8256 = vmatprep.mubr.bf16.mxu1 %v9255_v32  ;;  %8621 = vmatpush3.bf16.msra.mxu1 %v9277_v26 }
 0x235   : > { %8622 = vmatprep.subr.bf16.mxu1 %v9278_v21 }
 0x236   : > { %8573 = vmatmul.mubr.bf16.gmra.mrb[4].mxu0 %v10886_v41 }
 0x237   : > { %8576 = vmatprep.mubr.bf16.mxu0 %v10887_v4 }
 0x238   : > { %8623 = vmatpush3.bf16.msra.mxu1 %v9278_v21 }
 0x239   : > { %8624 = vmatprep.subr.bf16.mxu1 %v9279_v45 }
 0x23b   : > { %8257 = vmatmul.mubr.bf16.gmra.mrb[8].mxu1 %v9256_v46 }
 0x23c   : > { %8260 = vmatprep.mubr.bf16.mxu1 %v9257_v19  ;;  %8625 = vmatpush3.bf16.msra.mxu1 %v9279_v45 }
 0x23d   : > { %8626 = vmatprep.subr.bf16.mxu1 %v9280_v29 }
 0x23e   : > { %8577 = vmatmul.mubr.bf16.gmra.mrb[8].mxu0 %v10888_v2 }
 0x23f   : > { %8580 = vmatprep.mubr.bf16.mxu0 %v10889_v6 }
 0x240   : > { %8627 = vmatpush3.bf16.msra.mxu1 %v9280_v29 }
 0x241   : > { %8628 = vmatprep.subr.bf16.mxu1 %v9281_v63 }
 0x243   : > { %8261 = vmatmul.mubr.bf16.gmra.mrb[12].mxu1 %v9258_v36 }
 0x244   : > { %8264 = vmatprep.mubr.bf16.mxu1 %v9259_v55  ;;  %8629 = vmatpush3.bf16.msra.mxu1 %v9281_v63 }
 0x246   : > { %8581 = vmatmul.mubr.bf16.gmra.mrb[12].mxu0 %v10890_v51 }
 0x247   : > { %8584 = vmatprep.mubr.bf16.mxu0 %v10891_v49 }
 0x24b   : > { %8265 = vmatmul.mubr.bf16.gmra.mrb[16].mxu1 %v9260_v60 }
 0x24c   : > { %8268 = vmatprep.mubr.bf16.mxu1 %v9261_v9 }
 0x24e   : > { %8585 = vmatmul.mubr.bf16.gmra.mrb[16].mxu0 %v10892_v13 }
 0x24f   : > { %8588 = vmatprep.mubr.bf16.mxu0 %v10893_v24 }
 0x253   : > { %8269 = vmatmul.mubr.bf16.gmra.mrb[20].mxu1 %v9262_v20 }
 0x254   : > { %8272 = vmatprep.mubr.bf16.mxu1 %v9263_v8 }
 0x256   : > { %8589 = vmatmul.mubr.bf16.gmra.mrb[20].mxu0 %v10894_v23 }
 0x257   : > { %8592 = vmatprep.mubr.bf16.mxu0 %v10895_v54 }
 0x25b   : > { %8273 = vmatmul.mubr.bf16.gmra.mrb[24].mxu1 %v9264_v31 }
 0x25c   : > { %8276 = vmatprep.mubr.bf16.mxu1 %v9265_v61 }
 0x25e   : > { %8593 = vmatmul.mubr.bf16.gmra.mrb[24].mxu0 %v10896_v7 }
 0x25f   : > { %8596 = vmatprep.mubr.bf16.mxu0 %v10897_v40 }
 0x263   : > { %8277 = vmatmul.mubr.bf16.gmra.mrb[28].mxu1 %v9266_v3 }
 0x264   : > { %8280 = vmatprep.mubr.bf16.mxu1 %v9267_v57 }
 0x266   : > { %8597 = vmatmul.mubr.bf16.gmra.mrb[28].mxu0 %v10898_v56 }
 0x267   : > { %8600 = vmatprep.mubr.bf16.mxu0 %v10899_v34 }
 0x26b   : > { %8281 = vmatmul.mubr.bf16.gmra.mrb[32].mxu1 %v9268_v14 }
 0x26c   : > { %8284 = vmatprep.mubr.bf16.mxu1 %v9269_v18 }
 0x26e   : > { %8601 = vmatmul.mubr.bf16.gmra.mrb[32].mxu0 %v10336_v0 }
 0x26f   : > { %8604 = vmatprep.mubr.bf16.mxu0 %v10339_v52  ;;  %v9282_v52 = vld [vmem:[%s10822_s6 + $0x38] sm:$0xff]  }
 0x270   : > { %8630 = vmatprep.subr.bf16.mxu1 %v9282_v52 }
 0x271   : > { %8631 = vmatpush3.bf16.msra.mxu1 %v9282_v52 }
 0x273   : > { %8285 = vmatmul.mubr.bf16.gmra.mrb[36].mxu1 %v9270_v43 }
 0x274   : > { %8288 = vmatprep.mubr.bf16.mxu1 %v9271_v53 }
 0x276   : > { %8605 = vmatmul.mubr.bf16.gmra.mrb[36].mxu0 %v10900_v22 }
 0x277   : > { %8608 = vmatprep.mubr.bf16.mxu0 %v10349_v15 }
 0x27b   : > { %8289 = vmatmul.mubr.bf16.gmra.mrb[40].mxu1 %v9272_v16 }
 0x27c   : > { %8292 = vmatprep.mubr.bf16.mxu1 %v9273_v27 }
 0x27e   : > { %8609 = vmatmul.mubr.bf16.gmra.mrb[40].mxu0 %v10901_v38 }
 0x27f   : > { %8612 = vmatprep.mubr.bf16.mxu0 %v10902_v42 }
 0x283   : > { %8293 = vmatmul.mubr.bf16.gmra.mrb[44].mxu1 %v9274_v35 }
 0x286   : > { %8613 = vmatmul.mubr.bf16.gmra.mrb[44].mxu0 %v10367_v59 }
 0x2fe   : > { %v8250_v0 = vpop.f32.mrb[0].mxu1 }
 0x2ff   : > { %v2937_v15 = vpop.f32.mrb[1].mxu1 }
 0x300   : > { %v8251_v12 = vpop.f32.mrb[2].mxu1 }
 0x301   : > { %v2940_v1 = vpop.f32.mrb[3].mxu1  ;;  %v8570_v25 = vpop.f32.mrb[0].mxu0 }
 0x302   : > { %v8680_v48 = vadd.f32 %v8570_v25, %v8250_v0  ;;  %v5757_v17 = vpop.f32.mrb[1].mxu0 }
 0x303   : > { %v8681_v11 = vadd.f32 %v5757_v17, %v2937_v15  ;;  %v8571_v59 = vpop.f32.mrb[2].mxu0 }
 0x304   : > { %v6005_v44 = vadd.f32 %v8680_v48, %v10680_v37  ;;  %v8682_v33 = vadd.f32 %v8571_v59, %v8251_v12  ;;  %v5760_v10 = vpop.f32.mrb[3].mxu0 }
 0x305   : > { %v6003_v39 = vadd.f32 %v8681_v11, %v10680_v37  ;;  %v8683_v62 = vadd.f32 %v5760_v10, %v2940_v1 }
 0x306   : > { %v8254_v28 = vpop.f32.mrb[4].mxu1  ;;  %v6006_v47 = vadd.f32 %v8682_v33, %v10680_v37  ;;  %v6053_v58 = vmax.f32 %v6005_v44, 0.0 }
 0x307   : > { %v2953_v50 = vpop.f32.mrb[5].mxu1  ;;  %v6004_v26 = vadd.f32 %v8683_v62, %v10680_v37  ;;  %v6051_v32 = vmax.f32 %v6003_v39, 0.0 }
 0x308   : > { %v8255_v5 = vpop.f32.mrb[6].mxu1  ;;  %v6054_v30 = vmax.f32 %v6006_v47, 0.0 }
 0x309   : > { %v2956_v21 = vpop.f32.mrb[7].mxu1  ;;  %v6052_v45 = vmax.f32 %v6004_v26, 0.0  ;;  %v8574_v41 = vpop.f32.mrb[4].mxu0 }
 0x30a   : > { %v6100_v4 = vpack.c.bf16 %v6054_v30, %v6053_v58  ;;  %v8684_v46 = vadd.f32 %v8574_v41, %v8254_v28  ;;  %v5773_v29 = vpop.f32.mrb[5].mxu0 }
 0x30b   : > { %v8685_v19 = vadd.f32 %v5773_v29, %v2953_v50  ;;  %v8575_v63 = vpop.f32.mrb[6].mxu0  ;;  %v6099_v2 = vpack.c.bf16 %v6052_v45, %v6051_v32 }
 0x30c   : > { %v6009_v6 = vadd.f32 %v8684_v46, %v10680_v37  ;;  %v8686_v36 = vadd.f32 %v8575_v63, %v8255_v5  ;;  %v5776_v55 = vpop.f32.mrb[7].mxu0 }
 0x30d   : > { %v6007_v51 = vadd.f32 %v8685_v19, %v10680_v37  ;;  %v8687_v60 = vadd.f32 %v5776_v55, %v2956_v21  ;;  %8632 = vmatprep.mubr.bf16.mxu1 %v6099_v2 }
 0x30e   : > { %v8258_v49 = vpop.f32.mrb[8].mxu1  ;;  %v6010_v9 = vadd.f32 %v8686_v36, %v10680_v37  ;;  %8633 = vmatmul.mubr.bf16.vlgmr.msra.gmra.mrb[48].mxu1 %v6100_v4  ;;  %v6057_v8 = vmax.f32 %v6009_v6, 0.0 }
 0x30f   : > { %v2969_v13 = vpop.f32.mrb[9].mxu1  ;;  %v6008_v24 = vadd.f32 %v8687_v60, %v10680_v37  ;;  %v6055_v31 = vmax.f32 %v6007_v51, 0.0 }
 0x310   : > { %v8259_v20 = vpop.f32.mrb[10].mxu1  ;;  %v6058_v23 = vmax.f32 %v6010_v9, 0.0 }
 0x311   : > { %v2972_v54 = vpop.f32.mrb[11].mxu1  ;;  %v6056_v61 = vmax.f32 %v6008_v24, 0.0  ;;  %v8578_v7 = vpop.f32.mrb[8].mxu0 }
 0x312   : > { %v8688_v40 = vadd.f32 %v8578_v7, %v8258_v49  ;;  %v5789_v3 = vpop.f32.mrb[9].mxu0  ;;  %v6102_v57 = vpack.c.bf16 %v6058_v23, %v6057_v8 }
 0x313   : > { %v8689_v56 = vadd.f32 %v5789_v3, %v2969_v13  ;;  %v8579_v34 = vpop.f32.mrb[10].mxu0  ;;  %v6101_v14 = vpack.c.bf16 %v6056_v61, %v6055_v31 }
 0x314   : > { %v6013_v18 = vadd.f32 %v8688_v40, %v10680_v37  ;;  %v8690_v43 = vadd.f32 %v8579_v34, %v8259_v20  ;;  %v5792_v53 = vpop.f32.mrb[11].mxu0 }
 0x315   : > { %v6011_v22 = vadd.f32 %v8689_v56, %v10680_v37  ;;  %v8691_v27 = vadd.f32 %v5792_v53, %v2972_v54  ;;  %8636 = vmatprep.mubr.bf16.mxu1 %v6101_v14 }
 0x316   : > { %v8262_v16 = vpop.f32.mrb[12].mxu1  ;;  %v6014_v38 = vadd.f32 %v8690_v43, %v10680_v37  ;;  %8637 = vmatmul.mubr.bf16.gmra.mrb[52].mxu1 %v6102_v57  ;;  %v6061_v0 = vmax.f32 %v6013_v18, 0.0 }
 0x317   : > { %v2985_v42 = vpop.f32.mrb[13].mxu1  ;;  %v6012_v35 = vadd.f32 %v8691_v27, %v10680_v37  ;;  %v6059_v1 = vmax.f32 %v6011_v22, 0.0 }
 0x318   : > { %v8263_v52 = vpop.f32.mrb[14].mxu1  ;;  %v6062_v15 = vmax.f32 %v6014_v38, 0.0 }
 0x319   : > { %v2988_v12 = vpop.f32.mrb[15].mxu1  ;;  %v6060_v25 = vmax.f32 %v6012_v35, 0.0  ;;  %v8582_v48 = vpop.f32.mrb[12].mxu0 }
 0x31a   : > { %v8692_v17 = vadd.f32 %v8582_v48, %v8262_v16  ;;  %v5805_v11 = vpop.f32.mrb[13].mxu0  ;;  %v6104_v59 = vpack.c.bf16 %v6062_v15, %v6061_v0 }
 0x31b   : > { %v8693_v44 = vadd.f32 %v5805_v11, %v2985_v42  ;;  %v8583_v33 = vpop.f32.mrb[14].mxu0  ;;  %v6103_v10 = vpack.c.bf16 %v6060_v25, %v6059_v1 }
 0x31c   : > { %v6017_v39 = vadd.f32 %v8692_v17, %v10680_v37  ;;  %v8694_v28 = vadd.f32 %v8583_v33, %v8263_v52  ;;  %v5808_v62 = vpop.f32.mrb[15].mxu0 }
 0x31d   : > { %v6015_v47 = vadd.f32 %v8693_v44, %v10680_v37  ;;  %v8695_v26 = vadd.f32 %v5808_v62, %v2988_v12  ;;  %8640 = vmatprep.mubr.bf16.mxu1 %v6103_v10 }
 0x31e   : > { %v8266_v50 = vpop.f32.mrb[16].mxu1  ;;  %v6018_v5 = vadd.f32 %v8694_v28, %v10680_v37  ;;  %8641 = vmatmul.mubr.bf16.gmra.mrb[56].mxu1 %v6104_v59  ;;  %v6065_v32 = vmax.f32 %v6017_v39, 0.0 }
 0x31f   : > { %v3001_v58 = vpop.f32.mrb[17].mxu1  ;;  %v6016_v30 = vadd.f32 %v8695_v26, %v10680_v37  ;;  %v6063_v4 = vmax.f32 %v6015_v47, 0.0 }
 0x320   : > { %v8267_v21 = vpop.f32.mrb[18].mxu1  ;;  %v6066_v45 = vmax.f32 %v6018_v5, 0.0 }
 0x321   : > { %v3004_v41 = vpop.f32.mrb[19].mxu1  ;;  %v6064_v46 = vmax.f32 %v6016_v30, 0.0  ;;  %v8586_v29 = vpop.f32.mrb[16].mxu0 }
 0x322   : > { %v8696_v19 = vadd.f32 %v8586_v29, %v8266_v50  ;;  %v5821_v63 = vpop.f32.mrb[17].mxu0  ;;  %v6106_v2 = vpack.c.bf16 %v6066_v45, %v6065_v32 }
 0x323   : > { %v8697_v6 = vadd.f32 %v5821_v63, %v3001_v58  ;;  %v8587_v36 = vpop.f32.mrb[18].mxu0  ;;  %v6105_v55 = vpack.c.bf16 %v6064_v46, %v6063_v4 }
 0x324   : > { %v6021_v51 = vadd.f32 %v8696_v19, %v10680_v37  ;;  %v8698_v49 = vadd.f32 %v8587_v36, %v8267_v21  ;;  %v5824_v60 = vpop.f32.mrb[19].mxu0 }
 0x325   : > { %v6019_v9 = vadd.f32 %v8697_v6, %v10680_v37  ;;  %v8699_v24 = vadd.f32 %v5824_v60, %v3004_v41  ;;  %8644 = vmatprep.mubr.bf16.mxu1 %v6105_v55 }
 0x326   : > { %v8270_v13 = vpop.f32.mrb[20].mxu1  ;;  %v6022_v20 = vadd.f32 %v8698_v49, %v10680_v37  ;;  %8645 = vmatmul.mubr.bf16.gmra.mrb[60].mxu1 %v6106_v2  ;;  %v6069_v31 = vmax.f32 %v6021_v51, 0.0 }
 0x327   : > { %v3017_v8 = vpop.f32.mrb[21].mxu1  ;;  %v6020_v23 = vadd.f32 %v8699_v24, %v10680_v37  ;;  %v6067_v40 = vmax.f32 %v6019_v9, 0.0 }
 0x328   : > { %v8271_v54 = vpop.f32.mrb[22].mxu1  ;;  %v6070_v61 = vmax.f32 %v6022_v20, 0.0 }
 0x329   : > { %v3020_v7 = vpop.f32.mrb[23].mxu1  ;;  %v6068_v3 = vmax.f32 %v6020_v23, 0.0  ;;  %v8590_v57 = vpop.f32.mrb[20].mxu0 }
 0x32a   : > { %v8700_v56 = vadd.f32 %v8590_v57, %v8270_v13  ;;  %v5837_v34 = vpop.f32.mrb[21].mxu0  ;;  %v6108_v14 = vpack.c.bf16 %v6070_v61, %v6069_v31 }
 0x32b   : > { %v8701_v18 = vadd.f32 %v5837_v34, %v3017_v8  ;;  %v8591_v43 = vpop.f32.mrb[22].mxu0  ;;  %v6107_v53 = vpack.c.bf16 %v6068_v3, %v6067_v40 }
 0x32c   : > { %v6025_v22 = vadd.f32 %v8700_v56, %v10680_v37  ;;  %v8702_v16 = vadd.f32 %v8591_v43, %v8271_v54  ;;  %v5840_v27 = vpop.f32.mrb[23].mxu0 }
 0x32d   : > { %v6023_v38 = vadd.f32 %v8701_v18, %v10680_v37  ;;  %v8703_v35 = vadd.f32 %v5840_v27, %v3020_v7  ;;  %8648 = vmatprep.mubr.bf16.mxu1 %v6107_v53 }
 0x32e   : > { %v8274_v42 = vpop.f32.mrb[24].mxu1  ;;  %v6026_v52 = vadd.f32 %v8702_v16, %v10680_v37  ;;  %8649 = vmatmul.mubr.bf16.gmra.mrb[64].mxu1 %v6108_v14  ;;  %v6073_v1 = vmax.f32 %v6025_v22, 0.0 }
 0x32f   : > { %v3033_v0 = vpop.f32.mrb[25].mxu1  ;;  %v6024_v15 = vadd.f32 %v8703_v35, %v10680_v37  ;;  %v6071_v17 = vmax.f32 %v6023_v38, 0.0 }
 0x330   : > { %v8275_v12 = vpop.f32.mrb[26].mxu1  ;;  %v6074_v25 = vmax.f32 %v6026_v52, 0.0 }
 0x331   : > { %v3036_v48 = vpop.f32.mrb[27].mxu1  ;;  %v6072_v11 = vmax.f32 %v6024_v15, 0.0  ;;  %v8594_v59 = vpop.f32.mrb[24].mxu0 }
 0x332   : > { %v8704_v44 = vadd.f32 %v8594_v59, %v8274_v42  ;;  %v5853_v33 = vpop.f32.mrb[25].mxu0  ;;  %v6110_v10 = vpack.c.bf16 %v6074_v25, %v6073_v1 }
 0x333   : > { %v8705_v39 = vadd.f32 %v5853_v33, %v3033_v0  ;;  %v8595_v28 = vpop.f32.mrb[26].mxu0  ;;  %v6109_v62 = vpack.c.bf16 %v6072_v11, %v6071_v17 }
 0x334   : > { %v6029_v47 = vadd.f32 %v8704_v44, %v10680_v37  ;;  %v8706_v50 = vadd.f32 %v8595_v28, %v8275_v12  ;;  %v5856_v26 = vpop.f32.mrb[27].mxu0 }
 0x335   : > { %v6027_v5 = vadd.f32 %v8705_v39, %v10680_v37  ;;  %v8707_v30 = vadd.f32 %v5856_v26, %v3036_v48  ;;  %8652 = vmatprep.mubr.bf16.mxu1 %v6109_v62 }
 0x336   : > { %v8278_v58 = vpop.f32.mrb[28].mxu1  ;;  %v6030_v21 = vadd.f32 %v8706_v50, %v10680_v37  ;;  %8653 = vmatmul.mubr.bf16.gmra.mrb[68].mxu1 %v6110_v10  ;;  %v6077_v4 = vmax.f32 %v6029_v47, 0.0 }
 0x337   : > { %v3049_v32 = vpop.f32.mrb[29].mxu1  ;;  %v6028_v45 = vadd.f32 %v8707_v30, %v10680_v37  ;;  %v6075_v19 = vmax.f32 %v6027_v5, 0.0 }
 0x338   : > { %v8279_v41 = vpop.f32.mrb[30].mxu1  ;;  %v6078_v46 = vmax.f32 %v6030_v21, 0.0 }
 0x339   : > { %v3052_v29 = vpop.f32.mrb[31].mxu1  ;;  %v6076_v63 = vmax.f32 %v6028_v45, 0.0  ;;  %v8598_v2 = vpop.f32.mrb[28].mxu0 }
 0x33a   : > { %v8708_v6 = vadd.f32 %v8598_v2, %v8278_v58  ;;  %v5869_v36 = vpop.f32.mrb[29].mxu0  ;;  %v6112_v55 = vpack.c.bf16 %v6078_v46, %v6077_v4 }
 0x33b   : > { %v8709_v51 = vadd.f32 %v5869_v36, %v3049_v32  ;;  %v8599_v49 = vpop.f32.mrb[30].mxu0  ;;  %v6111_v60 = vpack.c.bf16 %v6076_v63, %v6075_v19 }
 0x33c   : > { %v6033_v9 = vadd.f32 %v8708_v6, %v10680_v37  ;;  %v8710_v13 = vadd.f32 %v8599_v49, %v8279_v41  ;;  %v5872_v24 = vpop.f32.mrb[31].mxu0 }
 0x33d   : > { %v6031_v20 = vadd.f32 %v8709_v51, %v10680_v37  ;;  %v8711_v23 = vadd.f32 %v5872_v24, %v3052_v29  ;;  %8656 = vmatprep.mubr.bf16.mxu1 %v6111_v60 }
 0x33e   : > { %v8282_v8 = vpop.f32.mrb[32].mxu1  ;;  %v6034_v54 = vadd.f32 %v8710_v13, %v10680_v37  ;;  %8657 = vmatmul.mubr.bf16.gmra.mrb[72].mxu1 %v6112_v55  ;;  %v6081_v40 = vmax.f32 %v6033_v9, 0.0 }
 0x33f   : > { %v3065_v31 = vpop.f32.mrb[33].mxu1  ;;  %v6032_v61 = vadd.f32 %v8711_v23, %v10680_v37  ;;  %v6079_v56 = vmax.f32 %v6031_v20, 0.0 }
 0x340   : > { %v8283_v7 = vpop.f32.mrb[34].mxu1  ;;  %v6082_v3 = vmax.f32 %v6034_v54, 0.0 }
 0x341   : > { %v3068_v57 = vpop.f32.mrb[35].mxu1  ;;  %v6080_v34 = vmax.f32 %v6032_v61, 0.0  ;;  %v8602_v14 = vpop.f32.mrb[32].mxu0 }
 0x342   : > { %v8712_v18 = vadd.f32 %v8602_v14, %v8282_v8  ;;  %v5885_v43 = vpop.f32.mrb[33].mxu0  ;;  %v6114_v53 = vpack.c.bf16 %v6082_v3, %v6081_v40 }
 0x343   : > { %v8713_v22 = vadd.f32 %v5885_v43, %v3065_v31  ;;  %v8603_v16 = vpop.f32.mrb[34].mxu0  ;;  %v6113_v27 = vpack.c.bf16 %v6080_v34, %v6079_v56 }
 0x344   : > { %v6037_v38 = vadd.f32 %v8712_v18, %v10680_v37  ;;  %v8714_v42 = vadd.f32 %v8603_v16, %v8283_v7  ;;  %v5888_v35 = vpop.f32.mrb[35].mxu0 }
 0x345   : > { %v6035_v52 = vadd.f32 %v8713_v22, %v10680_v37  ;;  %v8715_v15 = vadd.f32 %v5888_v35, %v3068_v57  ;;  %8660 = vmatprep.mubr.bf16.mxu1 %v6113_v27 }
 0x346   : > { %v8286_v0 = vpop.f32.mrb[36].mxu1  ;;  %v6038_v12 = vadd.f32 %v8714_v42, %v10680_v37  ;;  %8661 = vmatmul.mubr.bf16.gmra.mrb[76].mxu1 %v6114_v53  ;;  %v6085_v17 = vmax.f32 %v6037_v38, 0.0 }
 0x347   : > { %v3081_v1 = vpop.f32.mrb[37].mxu1  ;;  %v6036_v25 = vadd.f32 %v8715_v15, %v10680_v37  ;;  %v6083_v44 = vmax.f32 %v6035_v52, 0.0 }
 0x348   : > { %v8287_v48 = vpop.f32.mrb[38].mxu1  ;;  %v6086_v11 = vmax.f32 %v6038_v12, 0.0 }
 0x349   : > { %v3084_v59 = vpop.f32.mrb[39].mxu1  ;;  %v6084_v33 = vmax.f32 %v6036_v25, 0.0  ;;  %v8606_v10 = vpop.f32.mrb[36].mxu0 }
 0x34a   : > { %v8716_v39 = vadd.f32 %v8606_v10, %v8286_v0  ;;  %v5901_v28 = vpop.f32.mrb[37].mxu0  ;;  %v6116_v62 = vpack.c.bf16 %v6086_v11, %v6085_v17 }
 0x34b   : > { %v8717_v47 = vadd.f32 %v5901_v28, %v3081_v1  ;;  %v8607_v50 = vpop.f32.mrb[38].mxu0  ;;  %v6115_v26 = vpack.c.bf16 %v6084_v33, %v6083_v44  ;;  %v10733_v28 = vld [vmem:[%s10823_s7] ss:$0 sm:$0xff] }
 0x34c   : > { %v6041_v5 = vadd.f32 %v8716_v39, %v10680_v37  ;;  %v8718_v58 = vadd.f32 %v8607_v50, %v8287_v48  ;;  %v5904_v30 = vpop.f32.mrb[39].mxu0 }
 0x34d   : > { %v6039_v21 = vadd.f32 %v8717_v47, %v10680_v37  ;;  %v8719_v45 = vadd.f32 %v5904_v30, %v3084_v59  ;;  %8664 = vmatprep.mubr.bf16.mxu1 %v6115_v26 }
 0x34e   : > { %v8290_v32 = vpop.f32.mrb[40].mxu1  ;;  %v6042_v41 = vadd.f32 %v8718_v58, %v10680_v37  ;;  %8665 = vmatmul.mubr.bf16.gmra.mrb[80].mxu1 %v6116_v62  ;;  %v6089_v19 = vmax.f32 %v6041_v5, 0.0 }
 0x34f   : > { %v3097_v4 = vpop.f32.mrb[41].mxu1  ;;  %v6040_v46 = vadd.f32 %v8719_v45, %v10680_v37  ;;  %v6087_v6 = vmax.f32 %v6039_v21, 0.0 }
 0x350   : > { %v8291_v29 = vpop.f32.mrb[42].mxu1  ;;  %v6090_v63 = vmax.f32 %v6042_v41, 0.0 }
 0x351   : > { %v3100_v2 = vpop.f32.mrb[43].mxu1  ;;  %v6088_v36 = vmax.f32 %v6040_v46, 0.0  ;;  %v8610_v55 = vpop.f32.mrb[40].mxu0 }
 0x352   : > { %v8720_v51 = vadd.f32 %v8610_v55, %v8290_v32  ;;  %v5917_v49 = vpop.f32.mrb[41].mxu0  ;;  %v6118_v60 = vpack.c.bf16 %v6090_v63, %v6089_v19 }
 0x353   : > { %v8721_v9 = vadd.f32 %v5917_v49, %v3097_v4  ;;  %v8611_v13 = vpop.f32.mrb[42].mxu0  ;;  %v6117_v24 = vpack.c.bf16 %v6088_v36, %v6087_v6 }
 0x354   : > { %v6045_v20 = vadd.f32 %v8720_v51, %v10680_v37  ;;  %v8722_v8 = vadd.f32 %v8611_v13, %v8291_v29  ;;  %v5920_v23 = vpop.f32.mrb[43].mxu0 }
 0x355   : > { %v6043_v54 = vadd.f32 %v8721_v9, %v10680_v37  ;;  %v8723_v61 = vadd.f32 %v5920_v23, %v3100_v2  ;;  %8668 = vmatprep.mubr.bf16.mxu1 %v6117_v24 }
 0x356   : > { %v8294_v31 = vpop.f32.mrb[44].mxu1  ;;  %v6046_v7 = vadd.f32 %v8722_v8, %v10680_v37  ;;  %8669 = vmatmul.mubr.bf16.gmra.mrb[84].mxu1 %v6118_v60  ;;  %v6093_v56 = vmax.f32 %v6045_v20, 0.0 }
 0x357   : > { %v3113_v40 = vpop.f32.mrb[45].mxu1  ;;  %v6044_v3 = vadd.f32 %v8723_v61, %v10680_v37  ;;  %v6091_v18 = vmax.f32 %v6043_v54, 0.0 }
 0x358   : > { %v8295_v57 = vpop.f32.mrb[46].mxu1  ;;  %v6094_v34 = vmax.f32 %v6046_v7, 0.0 }
 0x359   : > { %v3116_v14 = vpop.f32.mrb[47].mxu1  ;;  %v6092_v43 = vmax.f32 %v6044_v3, 0.0  ;;  %v8614_v53 = vpop.f32.mrb[44].mxu0 }
 0x35a   : > { %v8724_v22 = vadd.f32 %v8614_v53, %v8294_v31  ;;  %v5933_v16 = vpop.f32.mrb[45].mxu0  ;;  %v6120_v27 = vpack.c.bf16 %v6094_v34, %v6093_v56 }
 0x35b   : > { %v8725_v38 = vadd.f32 %v5933_v16, %v3113_v40  ;;  %v8615_v42 = vpop.f32.mrb[46].mxu0  ;;  %v6119_v35 = vpack.c.bf16 %v6092_v43, %v6091_v18 }
 0x35c   : > { %v6049_v52 = vadd.f32 %v8724_v22, %v10680_v37  ;;  %v8726_v0 = vadd.f32 %v8615_v42, %v8295_v57  ;;  %v5936_v15 = vpop.f32.mrb[47].mxu0 }
 0x35d   : > { %v6047_v12 = vadd.f32 %v8725_v38, %v10680_v37  ;;  %v8727_v1 = vadd.f32 %v5936_v15, %v3116_v14  ;;  %8672 = vmatprep.mubr.bf16.mxu1 %v6119_v35 }
 0x35e   : > { %v6050_v25 = vadd.f32 %v8726_v0, %v10680_v37  ;;  %8673 = vmatmul.mubr.bf16.gmra.mrb[88].mxu1 %v6120_v27  ;;  %v6097_v17 = vmax.f32 %v6049_v52, 0.0 }
 0x35f   : > { %v6048_v48 = vadd.f32 %v8727_v1, %v10680_v37  ;;  %v6095_v59 = vmax.f32 %v6047_v12, 0.0 }
 0x360   : > { %v6098_v11 = vmax.f32 %v6050_v25, 0.0 }
 0x361   : > { %v6096_v44 = vmax.f32 %v6048_v48, 0.0 }
 0x362   : > { %v6122_v33 = vpack.c.bf16 %v6098_v11, %v6097_v17 }
 0x363   : > { %v6121_v10 = vpack.c.bf16 %v6096_v44, %v6095_v59 }
 0x365   : > { %8676 = vmatprep.mubr.bf16.mxu1 %v6121_v10 }
 0x366   : > { %8677 = vmatmul.mubr.bf16.gmra.mrb[92].mxu1 %v6122_v33 }
 0x3e1   : > { %v8634_v39 = vpop.f32.mrb[48].mxu1 }
 0x3e2   : > { %v6228_v62 = vpop.f32.mrb[49].mxu1  ;;  %v6237_v50 = vadd.f32 %v8634_v39, %v10733_v28 }
 0x3e3   : > { %v8635_v47 = vpop.f32.mrb[50].mxu1  ;;  %v6229_v5 = vadd.f32 %v10733_v28, %v6228_v62 }
 0x3e4   : > { %v6240_v37 = vadd.f32 %v8635_v47, %v10733_v28  ;;  %v6231_v26 = vpop.f32.mrb[51].mxu1 }
 0x3e5   : > { %v6232_v58 = vadd.f32 %v10733_v28, %v6231_v26 }
 0x3e6   : > { %v7531_v30 = vpack.c.bf16 %v6240_v37, %v6237_v50 }
 0x3e7   : > { %v7526_v21 = vpack.c.bf16 %v6232_v58, %v6229_v5 }
 0x3e8   : > { %7697 = vst [vmem:[%s10742_s23 + $0x8] sm:$0xff] %v7531_v30  }
 0x3e9   : > { %7527 = vst [vmem:[%s10742_s23] sm:$0xff] %v7526_v21   ;;  %v8638_v32 = vpop.f32.mrb[52].mxu1 }
 0x3ea   : > { %v6244_v45 = vpop.f32.mrb[53].mxu1  ;;  %v6253_v4 = vadd.f32 %v8638_v32, %v10733_v28 }
 0x3eb   : > { %v8639_v41 = vpop.f32.mrb[54].mxu1  ;;  %v6245_v19 = vadd.f32 %v10733_v28, %v6244_v45 }
 0x3ec   : > { %v6256_v46 = vadd.f32 %v8639_v41, %v10733_v28  ;;  %v6247_v29 = vpop.f32.mrb[55].mxu1 }
 0x3ed   : > { %v6248_v63 = vadd.f32 %v10733_v28, %v6247_v29 }
 0x3ee   : > { %v7541_v2 = vpack.c.bf16 %v6256_v46, %v6253_v4 }
 0x3ef   : > { %v7536_v6 = vpack.c.bf16 %v6248_v63, %v6245_v19 }
 0x3f0   : > { %7699 = vst [vmem:[%s10742_s23 + $0x18] sm:$0xff] %v7541_v2  }
 0x3f1   : > { %7698 = vst [vmem:[%s10742_s23 + $0x10] sm:$0xff] %v7536_v6   ;;  %v8642_v36 = vpop.f32.mrb[56].mxu1 }
 0x3f2   : > { %v6260_v55 = vpop.f32.mrb[57].mxu1  ;;  %v6269_v49 = vadd.f32 %v8642_v36, %v10733_v28 }
 0x3f3   : > { %v8643_v51 = vpop.f32.mrb[58].mxu1  ;;  %v6261_v13 = vadd.f32 %v10733_v28, %v6260_v55 }
 0x3f4   : > { %v6272_v60 = vadd.f32 %v8643_v51, %v10733_v28  ;;  %v6263_v9 = vpop.f32.mrb[59].mxu1 }
 0x3f5   : > { %v6264_v24 = vadd.f32 %v10733_v28, %v6263_v9 }
 0x3f6   : > { %v7551_v20 = vpack.c.bf16 %v6272_v60, %v6269_v49 }
 0x3f7   : > { %v7546_v8 = vpack.c.bf16 %v6264_v24, %v6261_v13 }
 0x3f8   : > { %7701 = vst [vmem:[%s10742_s23 + $0x28] sm:$0xff] %v7551_v20  }
 0x3f9   : > { %7700 = vst [vmem:[%s10742_s23 + $0x20] sm:$0xff] %v7546_v8   ;;  %v8646_v23 = vpop.f32.mrb[60].mxu1 }
 0x3fa   : > { %v6276_v54 = vpop.f32.mrb[61].mxu1  ;;  %v6285_v61 = vadd.f32 %v8646_v23, %v10733_v28 }
 0x3fb   : > { %v8647_v31 = vpop.f32.mrb[62].mxu1  ;;  %v6277_v3 = vadd.f32 %v10733_v28, %v6276_v54 }
 0x3fc   : > { %v6288_v7 = vadd.f32 %v8647_v31, %v10733_v28  ;;  %v6279_v40 = vpop.f32.mrb[63].mxu1 }
 0x3fd   : > { %v6280_v57 = vadd.f32 %v10733_v28, %v6279_v40 }
 0x3fe   : > { %v7561_v56 = vpack.c.bf16 %v6288_v7, %v6285_v61 }
 0x3ff   : > { %v7556_v34 = vpack.c.bf16 %v6280_v57, %v6277_v3 }
 0x400   : > { %7703 = vst [vmem:[%s10742_s23 + $0x38] sm:$0xff] %v7561_v56  }
 0x401   : > { %7702 = vst [vmem:[%s10742_s23 + $0x30] sm:$0xff] %v7556_v34   ;;  %v8650_v14 = vpop.f32.mrb[64].mxu1 }
 0x402   : > { %v6292_v18 = vpop.f32.mrb[65].mxu1  ;;  %v6301_v53 = vadd.f32 %v8650_v14, %v10733_v28 }
 0x403   : > { %v8651_v43 = vpop.f32.mrb[66].mxu1  ;;  %v6293_v27 = vadd.f32 %v10733_v28, %v6292_v18 }
 0x404   : > { %v6304_v22 = vadd.f32 %v8651_v43, %v10733_v28  ;;  %v6295_v16 = vpop.f32.mrb[67].mxu1 }
 0x405   : > { %v6296_v38 = vadd.f32 %v10733_v28, %v6295_v16 }
 0x406   : > { %v7571_v42 = vpack.c.bf16 %v6304_v22, %v6301_v53 }
 0x407   : > { %v7566_v35 = vpack.c.bf16 %v6296_v38, %v6293_v27 }
 0x408   : > { %7705 = vst [vmem:[%s10742_s23 + $0x48] sm:$0xff] %v7571_v42  }
 0x409   : > { %7704 = vst [vmem:[%s10742_s23 + $0x40] sm:$0xff] %v7566_v35   ;;  %v8654_v52 = vpop.f32.mrb[68].mxu1 }
 0x40a   : > { %v6308_v0 = vpop.f32.mrb[69].mxu1  ;;  %v6317_v12 = vadd.f32 %v8654_v52, %v10733_v28 }
 0x40b   : > { %v8655_v15 = vpop.f32.mrb[70].mxu1  ;;  %v6309_v48 = vadd.f32 %v10733_v28, %v6308_v0 }
 0x40c   : > { %v6320_v1 = vadd.f32 %v8655_v15, %v10733_v28  ;;  %v6311_v25 = vpop.f32.mrb[71].mxu1 }
 0x40d   : > { %v6312_v17 = vadd.f32 %v10733_v28, %v6311_v25 }
 0x40e   : > { %v7581_v11 = vpack.c.bf16 %v6320_v1, %v6317_v12 }
 0x40f   : > { %v7576_v59 = vpack.c.bf16 %v6312_v17, %v6309_v48 }
 0x410   : > { %7707 = vst [vmem:[%s10742_s23 + $0x58] sm:$0xff] %v7581_v11  }
 0x411   : > { %7706 = vst [vmem:[%s10742_s23 + $0x50] sm:$0xff] %v7576_v59   ;;  %v8658_v44 = vpop.f32.mrb[72].mxu1 }
 0x412   : > { %v6324_v33 = vpop.f32.mrb[73].mxu1  ;;  %v6333_v39 = vadd.f32 %v8658_v44, %v10733_v28 }
 0x413   : > { %v8659_v10 = vpop.f32.mrb[74].mxu1  ;;  %v6325_v50 = vadd.f32 %v10733_v28, %v6324_v33 }
 0x414   : > { %v6336_v62 = vadd.f32 %v8659_v10, %v10733_v28  ;;  %v6327_v47 = vpop.f32.mrb[75].mxu1 }
 0x415   : > { %v6328_v37 = vadd.f32 %v10733_v28, %v6327_v47 }
 0x416   : > { %v7591_v26 = vpack.c.bf16 %v6336_v62, %v6333_v39 }
 0x417   : > { %v7586_v5 = vpack.c.bf16 %v6328_v37, %v6325_v50 }
 0x418   : > { %7709 = vst [vmem:[%s10742_s23 + $0x68] sm:$0xff] %v7591_v26  }
 0x419   : > { %7708 = vst [vmem:[%s10742_s23 + $0x60] sm:$0xff] %v7586_v5   ;;  %v8662_v58 = vpop.f32.mrb[76].mxu1 }
 0x41a   : > { %v6340_v30 = vpop.f32.mrb[77].mxu1  ;;  %v6349_v32 = vadd.f32 %v8662_v58, %v10733_v28 }
 0x41b   : > { %v8663_v21 = vpop.f32.mrb[78].mxu1  ;;  %v6341_v4 = vadd.f32 %v10733_v28, %v6340_v30 }
 0x41c   : > { %v6352_v45 = vadd.f32 %v8663_v21, %v10733_v28  ;;  %v6343_v41 = vpop.f32.mrb[79].mxu1 }
 0x41d   : > { %v6344_v46 = vadd.f32 %v10733_v28, %v6343_v41 }
 0x41e   : > { %v7601_v29 = vpack.c.bf16 %v6352_v45, %v6349_v32 }
 0x41f   : > { %v7596_v19 = vpack.c.bf16 %v6344_v46, %v6341_v4 }
 0x420   : > { %7711 = vst [vmem:[%s10742_s23 + $0x78] sm:$0xff] %v7601_v29  }
 0x421   : > { %7710 = vst [vmem:[%s10742_s23 + $0x70] sm:$0xff] %v7596_v19   ;;  %v8666_v63 = vpop.f32.mrb[80].mxu1 }
 0x422   : > { %v6356_v2 = vpop.f32.mrb[81].mxu1  ;;  %v6365_v36 = vadd.f32 %v8666_v63, %v10733_v28 }
 0x423   : > { %v8667_v6 = vpop.f32.mrb[82].mxu1  ;;  %v6357_v49 = vadd.f32 %v10733_v28, %v6356_v2 }
 0x424   : > { %v6368_v55 = vadd.f32 %v8667_v6, %v10733_v28  ;;  %v6359_v51 = vpop.f32.mrb[83].mxu1 }
 0x425   : > { %v6360_v60 = vadd.f32 %v10733_v28, %v6359_v51 }
 0x426   : > { %v7611_v9 = vpack.c.bf16 %v6368_v55, %v6365_v36 }
 0x427   : > { %v7606_v13 = vpack.c.bf16 %v6360_v60, %v6357_v49 }
 0x428   : > { %7713 = vst [vmem:[%s10742_s23 + $0x88] sm:$0xff] %v7611_v9  }
 0x429   : > { %7712 = vst [vmem:[%s10742_s23 + $0x80] sm:$0xff] %v7606_v13   ;;  %v8670_v24 = vpop.f32.mrb[84].mxu1 }
 0x42a   : > { %v6372_v20 = vpop.f32.mrb[85].mxu1  ;;  %v6381_v23 = vadd.f32 %v8670_v24, %v10733_v28 }
 0x42b   : > { %v8671_v8 = vpop.f32.mrb[86].mxu1  ;;  %v6373_v61 = vadd.f32 %v10733_v28, %v6372_v20 }
 0x42c   : > { %v6384_v54 = vadd.f32 %v8671_v8, %v10733_v28  ;;  %v6375_v31 = vpop.f32.mrb[87].mxu1 }
 0x42d   : > { %v6376_v7 = vadd.f32 %v10733_v28, %v6375_v31 }
 0x42e   : > { %v7621_v40 = vpack.c.bf16 %v6384_v54, %v6381_v23 }
 0x42f   : > { %v7616_v3 = vpack.c.bf16 %v6376_v7, %v6373_v61 }
 0x430   : > { %7715 = vst [vmem:[%s10742_s23 + $0x98] sm:$0xff] %v7621_v40  }
 0x431   : > { %7714 = vst [vmem:[%s10742_s23 + $0x90] sm:$0xff] %v7616_v3   ;;  %v8674_v57 = vpop.f32.mrb[88].mxu1 }
 0x432   : > { %v6388_v56 = vpop.f32.mrb[89].mxu1  ;;  %v6397_v14 = vadd.f32 %v8674_v57, %v10733_v28 }
 0x433   : > { %v8675_v34 = vpop.f32.mrb[90].mxu1  ;;  %v6389_v53 = vadd.f32 %v10733_v28, %v6388_v56 }
 0x434   : > { %v6400_v18 = vadd.f32 %v8675_v34, %v10733_v28  ;;  %v6391_v43 = vpop.f32.mrb[91].mxu1 }
 0x435   : > { %v6392_v22 = vadd.f32 %v10733_v28, %v6391_v43 }
 0x436   : > { %v7631_v16 = vpack.c.bf16 %v6400_v18, %v6397_v14 }
 0x437   : > { %v7626_v27 = vpack.c.bf16 %v6392_v22, %v6389_v53 }
 0x438   : > { %7717 = vst [vmem:[%s10742_s23 + $0xa8] sm:$0xff] %v7631_v16  }
 0x439   : > { %7716 = vst [vmem:[%s10742_s23 + $0xa0] sm:$0xff] %v7626_v27   ;;  %v8678_v38 = vpop.f32.mrb[92].mxu1 }
 0x43a   : > { %v6404_v42 = vpop.f32.mrb[93].mxu1  ;;  %v6413_v52 = vadd.f32 %v8678_v38, %v10733_v28 }
 0x43b   : > { %v8679_v35 = vpop.f32.mrb[94].mxu1  ;;  %v6405_v12 = vadd.f32 %v10733_v28, %v6404_v42 }
 0x43c   : > { %v6416_v0 = vadd.f32 %v8679_v35, %v10733_v28  ;;  %v6407_v15 = vpop.f32.mrb[95].mxu1 }
 0x43d   : > { %v6408_v1 = vadd.f32 %v10733_v28, %v6407_v15 }
 0x43e   : > { %v7641_v25 = vpack.c.bf16 %v6416_v0, %v6413_v52 }
 0x43f   : > { %v7636_v48 = vpack.c.bf16 %v6408_v1, %v6405_v12 }
 0x440   : > { %7719 = vst [vmem:[%s10742_s23 + $0xb8] sm:$0xff] %v7641_v25  }
 0x441   : > { %7718 = vst [vmem:[%s10742_s23 + $0xb0] sm:$0xff] %v7636_v48  }
 0x442 PF: > { %s18_s27 = sadd.s32 1, %s9304_s27  }
 0x443   : > { %p15_p4 = scmp.ge.s32.totalorder %s18_s27, 4  }
 0x445   :  { %17 = sbr.rel (!%p15_p4) target bundleno = 1 (0x1), region = 90 }

</bundles_post_ra>
